<compile_context>
chip_gen: v7x
topology: tpu7x:2x2x1
jax: 0.10.0
libtpu: 0.0.40
codegen_flags: <defaults>
</compile_context>

<pallas_src>
import functools

import jax
import jax.numpy as jnp
from jax.experimental import pallas as pl
from jax.experimental.pallas import tpu as pltpu

H = 32  # lstm_hidden_dim of StockActorPVM


def _sigmoid(x):
    # Exactly sigmoid(x) = 0.5 * (1 + tanh(x / 2)) -> a single EUP op per gate.
    return 0.5 * jnp.tanh(0.5 * x) + 0.5


# --------------------------------------------------------------------------------------
# Fused kernel: one tile of TB batches.  Lanes are asset-major: lane = a*TB + b_local.
# --------------------------------------------------------------------------------------
def _actor_fused_kernel(xT_ref, pw_ref,
                        w_ih_ref, w_hh_ref, b_lstm_ref,
                        w0h_ref, w0w_ref, b0_ref,
                        wc_ref, bc_ref, w1g_ref, b1_ref, w2_ref, b2_ref,
                        out_ref, xscr_ref, *, action_bound):
    W, BAt = xT_ref.shape            # window length, samples in this tile (= TB*A)
    A, TB = out_ref.shape            # number of assets, batches in this tile
    Hh = w_hh_ref.shape[1]           # LSTM hidden size (32)
    f32, bf16 = jnp.float32, jnp.bfloat16

    # ---- LSTM over the window (transposed: features on sublanes, samples on lanes)
    w_ih = w_ih_ref[...]             # (4H, 1) f32   (VPU pointwise)
    b = b_lstm_ref[...]              # (4H, 1) f32   b_ih + b_hh
    w_hh = w_hh_ref[...]             # (4H, H) bf16  (MXU operand)

    h = jnp.zeros((Hh, BAt), f32)
    c = jnp.zeros((Hh, BAt), f32)
    # TODO(synk): for long windows (W >~ 32) switch to lax.fori_loop(unroll=True).
    for t in range(W):
        x_t = xT_ref[t:t + 1, :]                                        # (1, BAt)
        pre = w_ih * x_t + b                                            # (4H, BAt) VPU, off dep chain
        g = jnp.dot(w_hh, h.astype(bf16), preferred_element_type=f32) + pre
        # i / f / g / o are 32-row sublane slices (8-aligned) -> no lane relayout.
        i_g = _sigmoid(g[0 * Hh:1 * Hh, :])
        f_g = _sigmoid(g[1 * Hh:2 * Hh, :])
        g_g = jnp.tanh(g[2 * Hh:3 * Hh, :])
        o_g = _sigmoid(g[3 * Hh:4 * Hh, :])
        c = f_g * c + i_g * g_g
        h = o_g * jnp.tanh(c)

    # ---- fc0 + ReLU, whole tile in one matmul (transposed)
    pw = pw_ref[...]                                                    # (1, BAt) f32
    x0 = jnp.dot(w0h_ref[...], h.astype(bf16), preferred_element_type=f32)   # (16, BAt)
    x0 = jnp.maximum(x0 + w0w_ref[...] * pw + b0_ref[...], 0.0)        # (16, BAt) = relu(fc0)

    # ---- torch's view(B*A,16) -> view(B,16,A) scramble: static slice copies only.
    # xscr[c2, j*TB + b] = x0[c, a*TB + b]  where  a*16 + c == c2*A + j.
    for c2 in range(16):
        for j in range(A):
            a, cc = divmod(c2 * A + j, 16)
            xscr_ref[c2:c2 + 1, j * TB:(j + 1) * TB] = x0[cc:cc + 1, a * TB:(a + 1) * TB]
    xscr = xscr_ref[...]                                                # (16, BAt)

    # ---- conv1d(16->32, k=1) + ReLU, one tile-wide matmul
    y = jnp.dot(wc_ref[...], xscr.astype(bf16), preferred_element_type=f32)  # (32, BAt)
    y = jnp.maximum(y + bc_ref[...], 0.0)
    yb = y.astype(bf16)

    # ---- fc1: A independent K=32 contractions (per output position j) + ReLU
    z1 = jnp.zeros((64, TB), f32)
    for j in range(A):
        z1 = z1 + jnp.dot(w1g_ref[j], yb[:, j * TB:(j + 1) * TB],
                          preferred_element_type=f32)                   # (64, TB)
    z1 = jnp.maximum(z1 + b1_ref[...], 0.0)

    # ---- fc2 + exact softmax + action-bound scale; lane-dense (A, TB) store
    z2 = jnp.dot(w2_ref[...], z1, preferred_element_type=f32) + b2_ref[...]  # (A, TB)
    z2 = z2 - jnp.max(z2, axis=0, keepdims=True)
    e = jnp.exp(z2)
    out_ref[...] = (e / jnp.sum(e, axis=0, keepdims=True)) * action_bound


# --------------------------------------------------------------------------------------
# Wrapper
# --------------------------------------------------------------------------------------
def _full_spec(arr):
    nd = arr.ndim
    return pl.BlockSpec(arr.shape, lambda i, _n=nd: (0,) * _n)


def _pick_batch_tile(B, A):
    # Prefer lane-dense tiles (TB*A multiple of 128, <= 1024 lanes) and a grid of >= 2
    # steps when the batch allows it, so v7x's two TensorCores both get work; on the
    # single-TC v5e/v6e the extra grid step costs ~0.35 us, which is negligible here.
    best = None
    for tb in range(B, 0, -1):
        if B % tb:
            continue
        lanes = tb * A
        if lanes % 128 or lanes > 1024:
            continue
        if best is None:
            best = tb
        if B // tb >= 2:
            return tb
    return best if best is not None else B


def stock_actor_pvm_forward(state, weights, params, action_bound=1.0):
    B, A, W = state.shape
    TB = _pick_batch_tile(B, A)
    G = B // TB
    BAt = TB * A

    # Layout plumbing only (no compute): per batch tile, lanes are ASSET-MAJOR
    # (lane = a*TB + b_local), time on sublanes, grid axis made explicit so every
    # block's minor dims equal the full array dims (no (8,128) divisibility issues).
    xT = (state.astype(jnp.float32)
          .reshape(G, TB, A, W)
          .transpose(0, 3, 2, 1)              # (G, W, A, TB)
          .reshape(G, W, BAt))
    pw = (weights.astype(jnp.float32)
          .reshape(G, TB, A)
          .transpose(0, 2, 1)                 # (G, A, TB)
          .reshape(G, 1, BAt))

    param_keys = ('w_ih', 'w_hh', 'b_lstm', 'w0h', 'w0w', 'b0',
                  'wc', 'bc', 'w1g', 'b1', 'w2', 'b2')
    kernel = functools.partial(_actor_fused_kernel, action_bound=float(action_bound))

    outT = pl.pallas_call(
        kernel,
        grid=(G,),
        in_specs=[pl.BlockSpec((None, W, BAt), lambda i: (i, 0, 0)),   # state (time-major)
                  pl.BlockSpec((None, 1, BAt), lambda i: (i, 0, 0))]   # previous weights
                 + [_full_spec(params[k]) for k in param_keys],
        out_specs=pl.BlockSpec((None, A, TB), lambda i: (i, 0, 0)),
        out_shape=jax.ShapeDtypeStruct((G, A, TB), jnp.float32),
        scratch_shapes=[pltpu.VMEM((16, BAt), jnp.float32)],           # view-scramble buffer
        compiler_params=pltpu.CompilerParams(dimension_semantics=("parallel",)),
    )(xT, pw, *(params[k] for k in param_keys))

    return outT.transpose(0, 2, 1).reshape(B, A)                       # (B, A)


# --------------------------------------------------------------------------------------
# Deterministic parameter init (PyTorch-default-style), pre-laid-out for the kernel.
# --------------------------------------------------------------------------------------
def init_params(key, A):
    ks = jax.random.split(key, 12)

    def u(k, shape, bound):
        return jax.random.uniform(k, shape, jnp.float32, -bound, bound)

    H4 = 4 * H
    kb = 1.0 / (H ** 0.5)
    w_ih = u(ks[0], (H4, 1), kb)                 # nn.LSTM weight_ih_l0 (input_size=1)
    w_hh = u(ks[1], (H4, H), kb)                 # nn.LSTM weight_hh_l0
    b_ih = u(ks[2], (H4,), kb)
    b_hh = u(ks[3], (H4,), kb)

    bd0 = 1.0 / ((H + 1) ** 0.5)
    w_fc0 = u(ks[4], (16, H + 1), bd0)           # nn.Linear(33, 16)
    b_fc0 = u(ks[5], (16,), bd0)

    bdc = 1.0 / (16 ** 0.5)
    w_conv = u(ks[6], (32, 16), bdc)             # nn.Conv1d(16, 32, 1) weight squeezed
    b_conv = u(ks[7], (32,), bdc)

    bd1 = 1.0 / ((32 * A) ** 0.5)
    w_fc1 = u(ks[8], (64, 32 * A), bd1)          # nn.Linear(32*A, 64)
    b_fc1 = u(ks[9], (64,), bd1)

    w_fc2 = u(ks[10], (A, 64), 0.003)            # fc2.weight.data.uniform_(-0.003, 0.003)
    b_fc2 = u(ks[11], (A,), 1.0 / (64 ** 0.5))

    params = {
        # kernel-ready layouts (MXU operands pre-cast to bf16; f32 accumulation in-kernel)
        'w_ih': w_ih,                                   # (4H, 1)  f32 (VPU pointwise)
        'w_hh': w_hh.astype(jnp.bfloat16),              # (4H, H)  bf16
        'b_lstm': (b_ih + b_hh)[:, None],               # (4H, 1)  f32
        'w0h': w_fc0[:, :H].astype(jnp.bfloat16),       # (16, H)  bf16
        'w0w': w_fc0[:, H:],                            # (16, 1)  f32 (VPU pointwise)
        'b0': b_fc0[:, None],                           # (16, 1)
        'wc': w_conv.astype(jnp.bfloat16),              # (32, 16) bf16
        'bc': b_conv[:, None],                          # (32, 1)
        # fc1 weight regrouped per output-position j: w1g[j][n, o] = w_fc1[n, o*A + j]
        'w1g': jnp.stack([w_fc1[:, j::A] for j in range(A)], axis=0).astype(jnp.bfloat16),
        'b1': b_fc1[:, None],                           # (64, 1)
        'w2': w_fc2,                                    # (A, 64)  f32 (tiny; exact logits)
        'b2': b_fc2[:, None],                           # (A, 1)
    }
    ref_params = {
        'w_ih': w_ih, 'w_hh': w_hh, 'b_lstm': b_ih + b_hh,
        'w_fc0': w_fc0, 'b_fc0': b_fc0, 'wc': w_conv, 'bc': b_conv,
        'w_fc1': w_fc1, 'b_fc1': b_fc1, 'w_fc2': w_fc2, 'b_fc2': b_fc2,
    }
    return params, ref_params


# --------------------------------------------------------------------------------------
# Pure-JAX re-implementation of the PyTorch forward (correctness cross-check, f32).
# --------------------------------------------------------------------------------------
def _reference_forward(state, weights, p, action_bound=1.0):
    B, A, W = state.shape
    x = state.reshape(B * A, W).astype(jnp.float32)
    w_ih = p['w_ih'][:, 0]
    w_hh = p['w_hh']
    b = p['b_lstm']
    Hh = w_hh.shape[1]
    h = jnp.zeros((B * A, Hh), jnp.float32)
    c = jnp.zeros((B * A, Hh), jnp.float32)
    for t in range(W):
        g = x[:, t:t + 1] * w_ih[None, :] + h @ w_hh.T + b[None, :]
        i_g = jax.nn.sigmoid(g[:, 0 * Hh:1 * Hh])
        f_g = jax.nn.sigmoid(g[:, 1 * Hh:2 * Hh])
        g_g = jnp.tanh(g[:, 2 * Hh:3 * Hh])
        o_g = jax.nn.sigmoid(g[:, 3 * Hh:4 * Hh])
        c = f_g * c + i_g * g_g
        h = o_g * jnp.tanh(c)
    feat = jnp.concatenate([h, weights.reshape(B * A, 1)], axis=-1)          # (BA, 33)
    x0 = jax.nn.relu(feat @ p['w_fc0'].T + p['b_fc0'])                       # (BA, 16)
    xv = x0.reshape(B, 16, A)                                                # torch .view
    y = jax.nn.relu(jnp.einsum('oc,bcj->boj', p['wc'], xv)
                    + p['bc'][None, :, None])                                # (B, 32, A)
    yf = y.reshape(B, 32 * A)
    z1 = jax.nn.relu(yf @ p['w_fc1'].T + p['b_fc1'])
    z2 = z1 @ p['w_fc2'].T + p['b_fc2']
    return jax.nn.softmax(z2, axis=-1) * action_bound


if __name__ == "__main__":
    key = jax.random.PRNGKey(0)
    B, A, W = 2, 8, 8        # batch, num assets (s_dim[0]), window length
    kp, ks, kw = jax.random.split(key, 3)
    params, ref_params = init_params(kp, A)
    state = jax.random.normal(ks, (B, A, W), jnp.float32)
    weights = jax.nn.softmax(jax.random.normal(kw, (B, A), jnp.float32), axis=-1)

    fwd = jax.jit(stock_actor_pvm_forward, static_argnames=("action_bound",))
    out = jax.block_until_ready(fwd(state, weights, params, action_bound=1.0))

    assert out.shape == (B, A)
    assert bool(jnp.all(jnp.isfinite(out)))
    # exact softmax: rows sum to 1 (tight tolerance)
    assert bool(jnp.all(jnp.abs(jnp.sum(out, axis=-1) - 1.0) < 1e-3))
    # cross-check against the pure-JAX f32 reference of the torch forward
    ref = _reference_forward(state, weights, ref_params, action_bound=1.0)
    assert bool(jnp.max(jnp.abs(out - ref)) < 1e-2)
    print("KERNEL_OK")
</pallas_src>

<mosaic_0001>
module attributes {stable_mosaic.version = 11 : i64} {
  func.func @_actor_fused_kernel(%arg0: i32, %arg1: memref<1x8x16xf32, #tpu.memory_space<vmem>>, %arg2: memref<1x1x16xf32, #tpu.memory_space<vmem>>, %arg3: memref<128x1xf32, #tpu.memory_space<vmem>>, %arg4: memref<128x32xbf16, #tpu.memory_space<vmem>>, %arg5: memref<128x1xf32, #tpu.memory_space<vmem>>, %arg6: memref<16x32xbf16, #tpu.memory_space<vmem>>, %arg7: memref<16x1xf32, #tpu.memory_space<vmem>>, %arg8: memref<16x1xf32, #tpu.memory_space<vmem>>, %arg9: memref<32x16xbf16, #tpu.memory_space<vmem>>, %arg10: memref<32x1xf32, #tpu.memory_space<vmem>>, %arg11: memref<8x64x32xbf16, #tpu.memory_space<vmem>>, %arg12: memref<64x1xf32, #tpu.memory_space<vmem>>, %arg13: memref<8x64xf32, #tpu.memory_space<vmem>>, %arg14: memref<8x1xf32, #tpu.memory_space<vmem>>, %arg15: memref<1x8x2xf32, #tpu.memory_space<vmem>>, %arg16: memref<16x16xf32, #tpu.memory_space<vmem>>) attributes {dimension_semantics = [#tpu.dimension_semantics<parallel>], iteration_bounds = array<i64: 1>, scalar_prefetch = 0 : i64, scratch_operands = 1 : i64, tpu.core_type = #tpu.core_type<tc>, window_params = [{transform_indices = @transform_0, window_bounds = array<i64: 1, 8, 16>}, {transform_indices = @transform_1, window_bounds = array<i64: 1, 1, 16>}, {pipeline_mode = #tpu.pipeline_mode<synchronous>, transform_indices = @transform_2, window_bounds = array<i64: 128, 1>}, {pipeline_mode = #tpu.pipeline_mode<synchronous>, transform_indices = @transform_3, window_bounds = array<i64: 128, 32>}, {pipeline_mode = #tpu.pipeline_mode<synchronous>, transform_indices = @transform_4, window_bounds = array<i64: 128, 1>}, {pipeline_mode = #tpu.pipeline_mode<synchronous>, transform_indices = @transform_5, window_bounds = array<i64: 16, 32>}, {pipeline_mode = #tpu.pipeline_mode<synchronous>, transform_indices = @transform_6, window_bounds = array<i64: 16, 1>}, {pipeline_mode = #tpu.pipeline_mode<synchronous>, transform_indices = @transform_7, window_bounds = array<i64: 16, 1>}, {pipeline_mode = #tpu.pipeline_mode<synchronous>, transform_indices = @transform_8, window_bounds = array<i64: 32, 16>}, {pipeline_mode = #tpu.pipeline_mode<synchronous>, transform_indices = @transform_9, window_bounds = array<i64: 32, 1>}, {pipeline_mode = #tpu.pipeline_mode<synchronous>, transform_indices = @transform_10, window_bounds = array<i64: 8, 64, 32>}, {pipeline_mode = #tpu.pipeline_mode<synchronous>, transform_indices = @transform_11, window_bounds = array<i64: 64, 1>}, {pipeline_mode = #tpu.pipeline_mode<synchronous>, transform_indices = @transform_12, window_bounds = array<i64: 8, 64>}, {pipeline_mode = #tpu.pipeline_mode<synchronous>, transform_indices = @transform_13, window_bounds = array<i64: 8, 1>}, {transform_indices = @transform_14, window_bounds = array<i64: 1, 8, 2>}]} {
    %c0 = arith.constant 0 : index
    %c0_0 = arith.constant 0 : index
    %0 = vector.load %arg3[%c0, %c0_0] : memref<128x1xf32, #tpu.memory_space<vmem>>, vector<128x1xf32>
    %c0_1 = arith.constant 0 : index
    %c0_2 = arith.constant 0 : index
    %1 = vector.load %arg5[%c0_1, %c0_2] : memref<128x1xf32, #tpu.memory_space<vmem>>, vector<128x1xf32>
    %c0_3 = arith.constant 0 : index
    %c0_4 = arith.constant 0 : index
    %2 = vector.load %arg4[%c0_3, %c0_4] : memref<128x32xbf16, #tpu.memory_space<vmem>>, vector<128x32xbf16>
    %cst = arith.constant 0.000000e+00 : f32
    %3 = vector.broadcast %cst : f32 to vector<32x16xf32>
    %cst_5 = arith.constant 0.000000e+00 : f32
    %4 = vector.broadcast %cst_5 : f32 to vector<32x16xf32>
    %c0_6 = arith.constant 0 : index
    %c0_7 = arith.constant 0 : index
    %c0_8 = arith.constant 0 : index
    %5 = vector.load %arg1[%c0_6, %c0_7, %c0_8] : memref<1x8x16xf32, #tpu.memory_space<vmem>>, vector<1x1x16xf32>
    %6 = vector.shape_cast %5 : vector<1x1x16xf32> to vector<1x16xf32>
    %7 = vector.broadcast %0 : vector<128x1xf32> to vector<128x16xf32>
    %8 = vector.broadcast %6 : vector<1x16xf32> to vector<128x16xf32>
    %9 = arith.mulf %7, %8 : vector<128x16xf32>
    %10 = vector.broadcast %1 : vector<128x1xf32> to vector<128x16xf32>
    %11 = arith.addf %9, %10 : vector<128x16xf32>
    %12 = arith.truncf %3 : vector<32x16xf32> to vector<32x16xbf16>
    %cst_9 = arith.constant dense<0.000000e+00> : vector<128x16xf32>
    %13 = tpu.matmul %2, %12, %cst_9 {dimension_numbers = #tpu.dot_dimension_numbers<[1], [0], [0], [1], [0, 0, 1, 1], [], []>} : vector<128x32xbf16>, vector<32x16xbf16>, vector<128x16xf32> -> vector<128x16xf32>
    %14 = arith.addf %13, %11 : vector<128x16xf32>
    %15 = vector.extract_strided_slice %14 {offsets = [0, 0], sizes = [32, 16], strides = [1, 1]} : vector<128x16xf32> to vector<32x16xf32>
    %cst_10 = arith.constant 5.000000e-01 : f32
    %16 = vector.broadcast %cst_10 : f32 to vector<32x16xf32>
    %17 = arith.mulf %16, %15 : vector<32x16xf32>
    %18 = math.tanh %17 : vector<32x16xf32>
    %cst_11 = arith.constant 5.000000e-01 : f32
    %19 = vector.broadcast %cst_11 : f32 to vector<32x16xf32>
    %20 = arith.mulf %19, %18 : vector<32x16xf32>
    %cst_12 = arith.constant 5.000000e-01 : f32
    %21 = vector.broadcast %cst_12 : f32 to vector<32x16xf32>
    %22 = arith.addf %20, %21 : vector<32x16xf32>
    %23 = vector.extract_strided_slice %14 {offsets = [32, 0], sizes = [32, 16], strides = [1, 1]} : vector<128x16xf32> to vector<32x16xf32>
    %cst_13 = arith.constant 5.000000e-01 : f32
    %24 = vector.broadcast %cst_13 : f32 to vector<32x16xf32>
    %25 = arith.mulf %24, %23 : vector<32x16xf32>
    %26 = math.tanh %25 : vector<32x16xf32>
    %cst_14 = arith.constant 5.000000e-01 : f32
    %27 = vector.broadcast %cst_14 : f32 to vector<32x16xf32>
    %28 = arith.mulf %27, %26 : vector<32x16xf32>
    %cst_15 = arith.constant 5.000000e-01 : f32
    %29 = vector.broadcast %cst_15 : f32 to vector<32x16xf32>
    %30 = arith.addf %28, %29 : vector<32x16xf32>
    %31 = vector.extract_strided_slice %14 {offsets = [64, 0], sizes = [32, 16], strides = [1, 1]} : vector<128x16xf32> to vector<32x16xf32>
    %32 = math.tanh %31 : vector<32x16xf32>
    %33 = vector.extract_strided_slice %14 {offsets = [96, 0], sizes = [32, 16], strides = [1, 1]} : vector<128x16xf32> to vector<32x16xf32>
    %cst_16 = arith.constant 5.000000e-01 : f32
    %34 = vector.broadcast %cst_16 : f32 to vector<32x16xf32>
    %35 = arith.mulf %34, %33 : vector<32x16xf32>
    %36 = math.tanh %35 : vector<32x16xf32>
    %cst_17 = arith.constant 5.000000e-01 : f32
    %37 = vector.broadcast %cst_17 : f32 to vector<32x16xf32>
    %38 = arith.mulf %37, %36 : vector<32x16xf32>
    %cst_18 = arith.constant 5.000000e-01 : f32
    %39 = vector.broadcast %cst_18 : f32 to vector<32x16xf32>
    %40 = arith.addf %38, %39 : vector<32x16xf32>
    %41 = arith.mulf %30, %4 : vector<32x16xf32>
    %42 = arith.mulf %22, %32 : vector<32x16xf32>
    %43 = arith.addf %41, %42 : vector<32x16xf32>
    %44 = math.tanh %43 : vector<32x16xf32>
    %45 = arith.mulf %40, %44 : vector<32x16xf32>
    %c0_19 = arith.constant 0 : index
    %c1 = arith.constant 1 : index
    %c0_20 = arith.constant 0 : index
    %46 = vector.load %arg1[%c0_19, %c1, %c0_20] : memref<1x8x16xf32, #tpu.memory_space<vmem>>, vector<1x1x16xf32>
    %47 = vector.shape_cast %46 : vector<1x1x16xf32> to vector<1x16xf32>
    %48 = vector.broadcast %0 : vector<128x1xf32> to vector<128x16xf32>
    %49 = vector.broadcast %47 : vector<1x16xf32> to vector<128x16xf32>
    %50 = arith.mulf %48, %49 : vector<128x16xf32>
    %51 = vector.broadcast %1 : vector<128x1xf32> to vector<128x16xf32>
    %52 = arith.addf %50, %51 : vector<128x16xf32>
    %53 = arith.truncf %45 : vector<32x16xf32> to vector<32x16xbf16>
    %cst_21 = arith.constant dense<0.000000e+00> : vector<128x16xf32>
    %54 = tpu.matmul %2, %53, %cst_21 {dimension_numbers = #tpu.dot_dimension_numbers<[1], [0], [0], [1], [0, 0, 1, 1], [], []>} : vector<128x32xbf16>, vector<32x16xbf16>, vector<128x16xf32> -> vector<128x16xf32>
    %55 = arith.addf %54, %52 : vector<128x16xf32>
    %56 = vector.extract_strided_slice %55 {offsets = [0, 0], sizes = [32, 16], strides = [1, 1]} : vector<128x16xf32> to vector<32x16xf32>
    %cst_22 = arith.constant 5.000000e-01 : f32
    %57 = vector.broadcast %cst_22 : f32 to vector<32x16xf32>
    %58 = arith.mulf %57, %56 : vector<32x16xf32>
    %59 = math.tanh %58 : vector<32x16xf32>
    %cst_23 = arith.constant 5.000000e-01 : f32
    %60 = vector.broadcast %cst_23 : f32 to vector<32x16xf32>
    %61 = arith.mulf %60, %59 : vector<32x16xf32>
    %cst_24 = arith.constant 5.000000e-01 : f32
    %62 = vector.broadcast %cst_24 : f32 to vector<32x16xf32>
    %63 = arith.addf %61, %62 : vector<32x16xf32>
    %64 = vector.extract_strided_slice %55 {offsets = [32, 0], sizes = [32, 16], strides = [1, 1]} : vector<128x16xf32> to vector<32x16xf32>
    %cst_25 = arith.constant 5.000000e-01 : f32
    %65 = vector.broadcast %cst_25 : f32 to vector<32x16xf32>
    %66 = arith.mulf %65, %64 : vector<32x16xf32>
    %67 = math.tanh %66 : vector<32x16xf32>
    %cst_26 = arith.constant 5.000000e-01 : f32
    %68 = vector.broadcast %cst_26 : f32 to vector<32x16xf32>
    %69 = arith.mulf %68, %67 : vector<32x16xf32>
    %cst_27 = arith.constant 5.000000e-01 : f32
    %70 = vector.broadcast %cst_27 : f32 to vector<32x16xf32>
    %71 = arith.addf %69, %70 : vector<32x16xf32>
    %72 = vector.extract_strided_slice %55 {offsets = [64, 0], sizes = [32, 16], strides = [1, 1]} : vector<128x16xf32> to vector<32x16xf32>
    %73 = math.tanh %72 : vector<32x16xf32>
    %74 = vector.extract_strided_slice %55 {offsets = [96, 0], sizes = [32, 16], strides = [1, 1]} : vector<128x16xf32> to vector<32x16xf32>
    %cst_28 = arith.constant 5.000000e-01 : f32
    %75 = vector.broadcast %cst_28 : f32 to vector<32x16xf32>
    %76 = arith.mulf %75, %74 : vector<32x16xf32>
    %77 = math.tanh %76 : vector<32x16xf32>
    %cst_29 = arith.constant 5.000000e-01 : f32
    %78 = vector.broadcast %cst_29 : f32 to vector<32x16xf32>
    %79 = arith.mulf %78, %77 : vector<32x16xf32>
    %cst_30 = arith.constant 5.000000e-01 : f32
    %80 = vector.broadcast %cst_30 : f32 to vector<32x16xf32>
    %81 = arith.addf %79, %80 : vector<32x16xf32>
    %82 = arith.mulf %71, %43 : vector<32x16xf32>
    %83 = arith.mulf %63, %73 : vector<32x16xf32>
    %84 = arith.addf %82, %83 : vector<32x16xf32>
    %85 = math.tanh %84 : vector<32x16xf32>
    %86 = arith.mulf %81, %85 : vector<32x16xf32>
    %c0_31 = arith.constant 0 : index
    %c2 = arith.constant 2 : index
    %c0_32 = arith.constant 0 : index
    %87 = vector.load %arg1[%c0_31, %c2, %c0_32] : memref<1x8x16xf32, #tpu.memory_space<vmem>>, vector<1x1x16xf32>
    %88 = vector.shape_cast %87 : vector<1x1x16xf32> to vector<1x16xf32>
    %89 = vector.broadcast %0 : vector<128x1xf32> to vector<128x16xf32>
    %90 = vector.broadcast %88 : vector<1x16xf32> to vector<128x16xf32>
    %91 = arith.mulf %89, %90 : vector<128x16xf32>
    %92 = vector.broadcast %1 : vector<128x1xf32> to vector<128x16xf32>
    %93 = arith.addf %91, %92 : vector<128x16xf32>
    %94 = arith.truncf %86 : vector<32x16xf32> to vector<32x16xbf16>
    %cst_33 = arith.constant dense<0.000000e+00> : vector<128x16xf32>
    %95 = tpu.matmul %2, %94, %cst_33 {dimension_numbers = #tpu.dot_dimension_numbers<[1], [0], [0], [1], [0, 0, 1, 1], [], []>} : vector<128x32xbf16>, vector<32x16xbf16>, vector<128x16xf32> -> vector<128x16xf32>
    %96 = arith.addf %95, %93 : vector<128x16xf32>
    %97 = vector.extract_strided_slice %96 {offsets = [0, 0], sizes = [32, 16], strides = [1, 1]} : vector<128x16xf32> to vector<32x16xf32>
    %cst_34 = arith.constant 5.000000e-01 : f32
    %98 = vector.broadcast %cst_34 : f32 to vector<32x16xf32>
    %99 = arith.mulf %98, %97 : vector<32x16xf32>
    %100 = math.tanh %99 : vector<32x16xf32>
    %cst_35 = arith.constant 5.000000e-01 : f32
    %101 = vector.broadcast %cst_35 : f32 to vector<32x16xf32>
    %102 = arith.mulf %101, %100 : vector<32x16xf32>
    %cst_36 = arith.constant 5.000000e-01 : f32
    %103 = vector.broadcast %cst_36 : f32 to vector<32x16xf32>
    %104 = arith.addf %102, %103 : vector<32x16xf32>
    %105 = vector.extract_strided_slice %96 {offsets = [32, 0], sizes = [32, 16], strides = [1, 1]} : vector<128x16xf32> to vector<32x16xf32>
    %cst_37 = arith.constant 5.000000e-01 : f32
    %106 = vector.broadcast %cst_37 : f32 to vector<32x16xf32>
    %107 = arith.mulf %106, %105 : vector<32x16xf32>
    %108 = math.tanh %107 : vector<32x16xf32>
    %cst_38 = arith.constant 5.000000e-01 : f32
    %109 = vector.broadcast %cst_38 : f32 to vector<32x16xf32>
    %110 = arith.mulf %109, %108 : vector<32x16xf32>
    %cst_39 = arith.constant 5.000000e-01 : f32
    %111 = vector.broadcast %cst_39 : f32 to vector<32x16xf32>
    %112 = arith.addf %110, %111 : vector<32x16xf32>
    %113 = vector.extract_strided_slice %96 {offsets = [64, 0], sizes = [32, 16], strides = [1, 1]} : vector<128x16xf32> to vector<32x16xf32>
    %114 = math.tanh %113 : vector<32x16xf32>
    %115 = vector.extract_strided_slice %96 {offsets = [96, 0], sizes = [32, 16], strides = [1, 1]} : vector<128x16xf32> to vector<32x16xf32>
    %cst_40 = arith.constant 5.000000e-01 : f32
    %116 = vector.broadcast %cst_40 : f32 to vector<32x16xf32>
    %117 = arith.mulf %116, %115 : vector<32x16xf32>
    %118 = math.tanh %117 : vector<32x16xf32>
    %cst_41 = arith.constant 5.000000e-01 : f32
    %119 = vector.broadcast %cst_41 : f32 to vector<32x16xf32>
    %120 = arith.mulf %119, %118 : vector<32x16xf32>
    %cst_42 = arith.constant 5.000000e-01 : f32
    %121 = vector.broadcast %cst_42 : f32 to vector<32x16xf32>
    %122 = arith.addf %120, %121 : vector<32x16xf32>
    %123 = arith.mulf %112, %84 : vector<32x16xf32>
    %124 = arith.mulf %104, %114 : vector<32x16xf32>
    %125 = arith.addf %123, %124 : vector<32x16xf32>
    %126 = math.tanh %125 : vector<32x16xf32>
    %127 = arith.mulf %122, %126 : vector<32x16xf32>
    %c0_43 = arith.constant 0 : index
    %c3 = arith.constant 3 : index
    %c0_44 = arith.constant 0 : index
    %128 = vector.load %arg1[%c0_43, %c3, %c0_44] : memref<1x8x16xf32, #tpu.memory_space<vmem>>, vector<1x1x16xf32>
    %129 = vector.shape_cast %128 : vector<1x1x16xf32> to vector<1x16xf32>
    %130 = vector.broadcast %0 : vector<128x1xf32> to vector<128x16xf32>
    %131 = vector.broadcast %129 : vector<1x16xf32> to vector<128x16xf32>
    %132 = arith.mulf %130, %131 : vector<128x16xf32>
    %133 = vector.broadcast %1 : vector<128x1xf32> to vector<128x16xf32>
    %134 = arith.addf %132, %133 : vector<128x16xf32>
    %135 = arith.truncf %127 : vector<32x16xf32> to vector<32x16xbf16>
    %cst_45 = arith.constant dense<0.000000e+00> : vector<128x16xf32>
    %136 = tpu.matmul %2, %135, %cst_45 {dimension_numbers = #tpu.dot_dimension_numbers<[1], [0], [0], [1], [0, 0, 1, 1], [], []>} : vector<128x32xbf16>, vector<32x16xbf16>, vector<128x16xf32> -> vector<128x16xf32>
    %137 = arith.addf %136, %134 : vector<128x16xf32>
    %138 = vector.extract_strided_slice %137 {offsets = [0, 0], sizes = [32, 16], strides = [1, 1]} : vector<128x16xf32> to vector<32x16xf32>
    %cst_46 = arith.constant 5.000000e-01 : f32
    %139 = vector.broadcast %cst_46 : f32 to vector<32x16xf32>
    %140 = arith.mulf %139, %138 : vector<32x16xf32>
    %141 = math.tanh %140 : vector<32x16xf32>
    %cst_47 = arith.constant 5.000000e-01 : f32
    %142 = vector.broadcast %cst_47 : f32 to vector<32x16xf32>
    %143 = arith.mulf %142, %141 : vector<32x16xf32>
    %cst_48 = arith.constant 5.000000e-01 : f32
    %144 = vector.broadcast %cst_48 : f32 to vector<32x16xf32>
    %145 = arith.addf %143, %144 : vector<32x16xf32>
    %146 = vector.extract_strided_slice %137 {offsets = [32, 0], sizes = [32, 16], strides = [1, 1]} : vector<128x16xf32> to vector<32x16xf32>
    %cst_49 = arith.constant 5.000000e-01 : f32
    %147 = vector.broadcast %cst_49 : f32 to vector<32x16xf32>
    %148 = arith.mulf %147, %146 : vector<32x16xf32>
    %149 = math.tanh %148 : vector<32x16xf32>
    %cst_50 = arith.constant 5.000000e-01 : f32
    %150 = vector.broadcast %cst_50 : f32 to vector<32x16xf32>
    %151 = arith.mulf %150, %149 : vector<32x16xf32>
    %cst_51 = arith.constant 5.000000e-01 : f32
    %152 = vector.broadcast %cst_51 : f32 to vector<32x16xf32>
    %153 = arith.addf %151, %152 : vector<32x16xf32>
    %154 = vector.extract_strided_slice %137 {offsets = [64, 0], sizes = [32, 16], strides = [1, 1]} : vector<128x16xf32> to vector<32x16xf32>
    %155 = math.tanh %154 : vector<32x16xf32>
    %156 = vector.extract_strided_slice %137 {offsets = [96, 0], sizes = [32, 16], strides = [1, 1]} : vector<128x16xf32> to vector<32x16xf32>
    %cst_52 = arith.constant 5.000000e-01 : f32
    %157 = vector.broadcast %cst_52 : f32 to vector<32x16xf32>
    %158 = arith.mulf %157, %156 : vector<32x16xf32>
    %159 = math.tanh %158 : vector<32x16xf32>
    %cst_53 = arith.constant 5.000000e-01 : f32
    %160 = vector.broadcast %cst_53 : f32 to vector<32x16xf32>
    %161 = arith.mulf %160, %159 : vector<32x16xf32>
    %cst_54 = arith.constant 5.000000e-01 : f32
    %162 = vector.broadcast %cst_54 : f32 to vector<32x16xf32>
    %163 = arith.addf %161, %162 : vector<32x16xf32>
    %164 = arith.mulf %153, %125 : vector<32x16xf32>
    %165 = arith.mulf %145, %155 : vector<32x16xf32>
    %166 = arith.addf %164, %165 : vector<32x16xf32>
    %167 = math.tanh %166 : vector<32x16xf32>
    %168 = arith.mulf %163, %167 : vector<32x16xf32>
    %c0_55 = arith.constant 0 : index
    %c4 = arith.constant 4 : index
    %c0_56 = arith.constant 0 : index
    %169 = vector.load %arg1[%c0_55, %c4, %c0_56] : memref<1x8x16xf32, #tpu.memory_space<vmem>>, vector<1x1x16xf32>
    %170 = vector.shape_cast %169 : vector<1x1x16xf32> to vector<1x16xf32>
    %171 = vector.broadcast %0 : vector<128x1xf32> to vector<128x16xf32>
    %172 = vector.broadcast %170 : vector<1x16xf32> to vector<128x16xf32>
    %173 = arith.mulf %171, %172 : vector<128x16xf32>
    %174 = vector.broadcast %1 : vector<128x1xf32> to vector<128x16xf32>
    %175 = arith.addf %173, %174 : vector<128x16xf32>
    %176 = arith.truncf %168 : vector<32x16xf32> to vector<32x16xbf16>
    %cst_57 = arith.constant dense<0.000000e+00> : vector<128x16xf32>
    %177 = tpu.matmul %2, %176, %cst_57 {dimension_numbers = #tpu.dot_dimension_numbers<[1], [0], [0], [1], [0, 0, 1, 1], [], []>} : vector<128x32xbf16>, vector<32x16xbf16>, vector<128x16xf32> -> vector<128x16xf32>
    %178 = arith.addf %177, %175 : vector<128x16xf32>
    %179 = vector.extract_strided_slice %178 {offsets = [0, 0], sizes = [32, 16], strides = [1, 1]} : vector<128x16xf32> to vector<32x16xf32>
    %cst_58 = arith.constant 5.000000e-01 : f32
    %180 = vector.broadcast %cst_58 : f32 to vector<32x16xf32>
    %181 = arith.mulf %180, %179 : vector<32x16xf32>
    %182 = math.tanh %181 : vector<32x16xf32>
    %cst_59 = arith.constant 5.000000e-01 : f32
    %183 = vector.broadcast %cst_59 : f32 to vector<32x16xf32>
    %184 = arith.mulf %183, %182 : vector<32x16xf32>
    %cst_60 = arith.constant 5.000000e-01 : f32
    %185 = vector.broadcast %cst_60 : f32 to vector<32x16xf32>
    %186 = arith.addf %184, %185 : vector<32x16xf32>
    %187 = vector.extract_strided_slice %178 {offsets = [32, 0], sizes = [32, 16], strides = [1, 1]} : vector<128x16xf32> to vector<32x16xf32>
    %cst_61 = arith.constant 5.000000e-01 : f32
    %188 = vector.broadcast %cst_61 : f32 to vector<32x16xf32>
    %189 = arith.mulf %188, %187 : vector<32x16xf32>
    %190 = math.tanh %189 : vector<32x16xf32>
    %cst_62 = arith.constant 5.000000e-01 : f32
    %191 = vector.broadcast %cst_62 : f32 to vector<32x16xf32>
    %192 = arith.mulf %191, %190 : vector<32x16xf32>
    %cst_63 = arith.constant 5.000000e-01 : f32
    %193 = vector.broadcast %cst_63 : f32 to vector<32x16xf32>
    %194 = arith.addf %192, %193 : vector<32x16xf32>
    %195 = vector.extract_strided_slice %178 {offsets = [64, 0], sizes = [32, 16], strides = [1, 1]} : vector<128x16xf32> to vector<32x16xf32>
    %196 = math.tanh %195 : vector<32x16xf32>
    %197 = vector.extract_strided_slice %178 {offsets = [96, 0], sizes = [32, 16], strides = [1, 1]} : vector<128x16xf32> to vector<32x16xf32>
    %cst_64 = arith.constant 5.000000e-01 : f32
    %198 = vector.broadcast %cst_64 : f32 to vector<32x16xf32>
    %199 = arith.mulf %198, %197 : vector<32x16xf32>
    %200 = math.tanh %199 : vector<32x16xf32>
    %cst_65 = arith.constant 5.000000e-01 : f32
    %201 = vector.broadcast %cst_65 : f32 to vector<32x16xf32>
    %202 = arith.mulf %201, %200 : vector<32x16xf32>
    %cst_66 = arith.constant 5.000000e-01 : f32
    %203 = vector.broadcast %cst_66 : f32 to vector<32x16xf32>
    %204 = arith.addf %202, %203 : vector<32x16xf32>
    %205 = arith.mulf %194, %166 : vector<32x16xf32>
    %206 = arith.mulf %186, %196 : vector<32x16xf32>
    %207 = arith.addf %205, %206 : vector<32x16xf32>
    %208 = math.tanh %207 : vector<32x16xf32>
    %209 = arith.mulf %204, %208 : vector<32x16xf32>
    %c0_67 = arith.constant 0 : index
    %c5 = arith.constant 5 : index
    %c0_68 = arith.constant 0 : index
    %210 = vector.load %arg1[%c0_67, %c5, %c0_68] : memref<1x8x16xf32, #tpu.memory_space<vmem>>, vector<1x1x16xf32>
    %211 = vector.shape_cast %210 : vector<1x1x16xf32> to vector<1x16xf32>
    %212 = vector.broadcast %0 : vector<128x1xf32> to vector<128x16xf32>
    %213 = vector.broadcast %211 : vector<1x16xf32> to vector<128x16xf32>
    %214 = arith.mulf %212, %213 : vector<128x16xf32>
    %215 = vector.broadcast %1 : vector<128x1xf32> to vector<128x16xf32>
    %216 = arith.addf %214, %215 : vector<128x16xf32>
    %217 = arith.truncf %209 : vector<32x16xf32> to vector<32x16xbf16>
    %cst_69 = arith.constant dense<0.000000e+00> : vector<128x16xf32>
    %218 = tpu.matmul %2, %217, %cst_69 {dimension_numbers = #tpu.dot_dimension_numbers<[1], [0], [0], [1], [0, 0, 1, 1], [], []>} : vector<128x32xbf16>, vector<32x16xbf16>, vector<128x16xf32> -> vector<128x16xf32>
    %219 = arith.addf %218, %216 : vector<128x16xf32>
    %220 = vector.extract_strided_slice %219 {offsets = [0, 0], sizes = [32, 16], strides = [1, 1]} : vector<128x16xf32> to vector<32x16xf32>
    %cst_70 = arith.constant 5.000000e-01 : f32
    %221 = vector.broadcast %cst_70 : f32 to vector<32x16xf32>
    %222 = arith.mulf %221, %220 : vector<32x16xf32>
    %223 = math.tanh %222 : vector<32x16xf32>
    %cst_71 = arith.constant 5.000000e-01 : f32
    %224 = vector.broadcast %cst_71 : f32 to vector<32x16xf32>
    %225 = arith.mulf %224, %223 : vector<32x16xf32>
    %cst_72 = arith.constant 5.000000e-01 : f32
    %226 = vector.broadcast %cst_72 : f32 to vector<32x16xf32>
    %227 = arith.addf %225, %226 : vector<32x16xf32>
    %228 = vector.extract_strided_slice %219 {offsets = [32, 0], sizes = [32, 16], strides = [1, 1]} : vector<128x16xf32> to vector<32x16xf32>
    %cst_73 = arith.constant 5.000000e-01 : f32
    %229 = vector.broadcast %cst_73 : f32 to vector<32x16xf32>
    %230 = arith.mulf %229, %228 : vector<32x16xf32>
    %231 = math.tanh %230 : vector<32x16xf32>
    %cst_74 = arith.constant 5.000000e-01 : f32
    %232 = vector.broadcast %cst_74 : f32 to vector<32x16xf32>
    %233 = arith.mulf %232, %231 : vector<32x16xf32>
    %cst_75 = arith.constant 5.000000e-01 : f32
    %234 = vector.broadcast %cst_75 : f32 to vector<32x16xf32>
    %235 = arith.addf %233, %234 : vector<32x16xf32>
    %236 = vector.extract_strided_slice %219 {offsets = [64, 0], sizes = [32, 16], strides = [1, 1]} : vector<128x16xf32> to vector<32x16xf32>
    %237 = math.tanh %236 : vector<32x16xf32>
    %238 = vector.extract_strided_slice %219 {offsets = [96, 0], sizes = [32, 16], strides = [1, 1]} : vector<128x16xf32> to vector<32x16xf32>
    %cst_76 = arith.constant 5.000000e-01 : f32
    %239 = vector.broadcast %cst_76 : f32 to vector<32x16xf32>
    %240 = arith.mulf %239, %238 : vector<32x16xf32>
    %241 = math.tanh %240 : vector<32x16xf32>
    %cst_77 = arith.constant 5.000000e-01 : f32
    %242 = vector.broadcast %cst_77 : f32 to vector<32x16xf32>
    %243 = arith.mulf %242, %241 : vector<32x16xf32>
    %cst_78 = arith.constant 5.000000e-01 : f32
    %244 = vector.broadcast %cst_78 : f32 to vector<32x16xf32>
    %245 = arith.addf %243, %244 : vector<32x16xf32>
    %246 = arith.mulf %235, %207 : vector<32x16xf32>
    %247 = arith.mulf %227, %237 : vector<32x16xf32>
    %248 = arith.addf %246, %247 : vector<32x16xf32>
    %249 = math.tanh %248 : vector<32x16xf32>
    %250 = arith.mulf %245, %249 : vector<32x16xf32>
    %c0_79 = arith.constant 0 : index
    %c6 = arith.constant 6 : index
    %c0_80 = arith.constant 0 : index
    %251 = vector.load %arg1[%c0_79, %c6, %c0_80] : memref<1x8x16xf32, #tpu.memory_space<vmem>>, vector<1x1x16xf32>
    %252 = vector.shape_cast %251 : vector<1x1x16xf32> to vector<1x16xf32>
    %253 = vector.broadcast %0 : vector<128x1xf32> to vector<128x16xf32>
    %254 = vector.broadcast %252 : vector<1x16xf32> to vector<128x16xf32>
    %255 = arith.mulf %253, %254 : vector<128x16xf32>
    %256 = vector.broadcast %1 : vector<128x1xf32> to vector<128x16xf32>
    %257 = arith.addf %255, %256 : vector<128x16xf32>
    %258 = arith.truncf %250 : vector<32x16xf32> to vector<32x16xbf16>
    %cst_81 = arith.constant dense<0.000000e+00> : vector<128x16xf32>
    %259 = tpu.matmul %2, %258, %cst_81 {dimension_numbers = #tpu.dot_dimension_numbers<[1], [0], [0], [1], [0, 0, 1, 1], [], []>} : vector<128x32xbf16>, vector<32x16xbf16>, vector<128x16xf32> -> vector<128x16xf32>
    %260 = arith.addf %259, %257 : vector<128x16xf32>
    %261 = vector.extract_strided_slice %260 {offsets = [0, 0], sizes = [32, 16], strides = [1, 1]} : vector<128x16xf32> to vector<32x16xf32>
    %cst_82 = arith.constant 5.000000e-01 : f32
    %262 = vector.broadcast %cst_82 : f32 to vector<32x16xf32>
    %263 = arith.mulf %262, %261 : vector<32x16xf32>
    %264 = math.tanh %263 : vector<32x16xf32>
    %cst_83 = arith.constant 5.000000e-01 : f32
    %265 = vector.broadcast %cst_83 : f32 to vector<32x16xf32>
    %266 = arith.mulf %265, %264 : vector<32x16xf32>
    %cst_84 = arith.constant 5.000000e-01 : f32
    %267 = vector.broadcast %cst_84 : f32 to vector<32x16xf32>
    %268 = arith.addf %266, %267 : vector<32x16xf32>
    %269 = vector.extract_strided_slice %260 {offsets = [32, 0], sizes = [32, 16], strides = [1, 1]} : vector<128x16xf32> to vector<32x16xf32>
    %cst_85 = arith.constant 5.000000e-01 : f32
    %270 = vector.broadcast %cst_85 : f32 to vector<32x16xf32>
    %271 = arith.mulf %270, %269 : vector<32x16xf32>
    %272 = math.tanh %271 : vector<32x16xf32>
    %cst_86 = arith.constant 5.000000e-01 : f32
    %273 = vector.broadcast %cst_86 : f32 to vector<32x16xf32>
    %274 = arith.mulf %273, %272 : vector<32x16xf32>
    %cst_87 = arith.constant 5.000000e-01 : f32
    %275 = vector.broadcast %cst_87 : f32 to vector<32x16xf32>
    %276 = arith.addf %274, %275 : vector<32x16xf32>
    %277 = vector.extract_strided_slice %260 {offsets = [64, 0], sizes = [32, 16], strides = [1, 1]} : vector<128x16xf32> to vector<32x16xf32>
    %278 = math.tanh %277 : vector<32x16xf32>
    %279 = vector.extract_strided_slice %260 {offsets = [96, 0], sizes = [32, 16], strides = [1, 1]} : vector<128x16xf32> to vector<32x16xf32>
    %cst_88 = arith.constant 5.000000e-01 : f32
    %280 = vector.broadcast %cst_88 : f32 to vector<32x16xf32>
    %281 = arith.mulf %280, %279 : vector<32x16xf32>
    %282 = math.tanh %281 : vector<32x16xf32>
    %cst_89 = arith.constant 5.000000e-01 : f32
    %283 = vector.broadcast %cst_89 : f32 to vector<32x16xf32>
    %284 = arith.mulf %283, %282 : vector<32x16xf32>
    %cst_90 = arith.constant 5.000000e-01 : f32
    %285 = vector.broadcast %cst_90 : f32 to vector<32x16xf32>
    %286 = arith.addf %284, %285 : vector<32x16xf32>
    %287 = arith.mulf %276, %248 : vector<32x16xf32>
    %288 = arith.mulf %268, %278 : vector<32x16xf32>
    %289 = arith.addf %287, %288 : vector<32x16xf32>
    %290 = math.tanh %289 : vector<32x16xf32>
    %291 = arith.mulf %286, %290 : vector<32x16xf32>
    %c0_91 = arith.constant 0 : index
    %c7 = arith.constant 7 : index
    %c0_92 = arith.constant 0 : index
    %292 = vector.load %arg1[%c0_91, %c7, %c0_92] : memref<1x8x16xf32, #tpu.memory_space<vmem>>, vector<1x1x16xf32>
    %293 = vector.shape_cast %292 : vector<1x1x16xf32> to vector<1x16xf32>
    %294 = vector.broadcast %0 : vector<128x1xf32> to vector<128x16xf32>
    %295 = vector.broadcast %293 : vector<1x16xf32> to vector<128x16xf32>
    %296 = arith.mulf %294, %295 : vector<128x16xf32>
    %297 = vector.broadcast %1 : vector<128x1xf32> to vector<128x16xf32>
    %298 = arith.addf %296, %297 : vector<128x16xf32>
    %299 = arith.truncf %291 : vector<32x16xf32> to vector<32x16xbf16>
    %cst_93 = arith.constant dense<0.000000e+00> : vector<128x16xf32>
    %300 = tpu.matmul %2, %299, %cst_93 {dimension_numbers = #tpu.dot_dimension_numbers<[1], [0], [0], [1], [0, 0, 1, 1], [], []>} : vector<128x32xbf16>, vector<32x16xbf16>, vector<128x16xf32> -> vector<128x16xf32>
    %301 = arith.addf %300, %298 : vector<128x16xf32>
    %302 = vector.extract_strided_slice %301 {offsets = [0, 0], sizes = [32, 16], strides = [1, 1]} : vector<128x16xf32> to vector<32x16xf32>
    %cst_94 = arith.constant 5.000000e-01 : f32
    %303 = vector.broadcast %cst_94 : f32 to vector<32x16xf32>
    %304 = arith.mulf %303, %302 : vector<32x16xf32>
    %305 = math.tanh %304 : vector<32x16xf32>
    %cst_95 = arith.constant 5.000000e-01 : f32
    %306 = vector.broadcast %cst_95 : f32 to vector<32x16xf32>
    %307 = arith.mulf %306, %305 : vector<32x16xf32>
    %cst_96 = arith.constant 5.000000e-01 : f32
    %308 = vector.broadcast %cst_96 : f32 to vector<32x16xf32>
    %309 = arith.addf %307, %308 : vector<32x16xf32>
    %310 = vector.extract_strided_slice %301 {offsets = [32, 0], sizes = [32, 16], strides = [1, 1]} : vector<128x16xf32> to vector<32x16xf32>
    %cst_97 = arith.constant 5.000000e-01 : f32
    %311 = vector.broadcast %cst_97 : f32 to vector<32x16xf32>
    %312 = arith.mulf %311, %310 : vector<32x16xf32>
    %313 = math.tanh %312 : vector<32x16xf32>
    %cst_98 = arith.constant 5.000000e-01 : f32
    %314 = vector.broadcast %cst_98 : f32 to vector<32x16xf32>
    %315 = arith.mulf %314, %313 : vector<32x16xf32>
    %cst_99 = arith.constant 5.000000e-01 : f32
    %316 = vector.broadcast %cst_99 : f32 to vector<32x16xf32>
    %317 = arith.addf %315, %316 : vector<32x16xf32>
    %318 = vector.extract_strided_slice %301 {offsets = [64, 0], sizes = [32, 16], strides = [1, 1]} : vector<128x16xf32> to vector<32x16xf32>
    %319 = math.tanh %318 : vector<32x16xf32>
    %320 = vector.extract_strided_slice %301 {offsets = [96, 0], sizes = [32, 16], strides = [1, 1]} : vector<128x16xf32> to vector<32x16xf32>
    %cst_100 = arith.constant 5.000000e-01 : f32
    %321 = vector.broadcast %cst_100 : f32 to vector<32x16xf32>
    %322 = arith.mulf %321, %320 : vector<32x16xf32>
    %323 = math.tanh %322 : vector<32x16xf32>
    %cst_101 = arith.constant 5.000000e-01 : f32
    %324 = vector.broadcast %cst_101 : f32 to vector<32x16xf32>
    %325 = arith.mulf %324, %323 : vector<32x16xf32>
    %cst_102 = arith.constant 5.000000e-01 : f32
    %326 = vector.broadcast %cst_102 : f32 to vector<32x16xf32>
    %327 = arith.addf %325, %326 : vector<32x16xf32>
    %328 = arith.mulf %317, %289 : vector<32x16xf32>
    %329 = arith.mulf %309, %319 : vector<32x16xf32>
    %330 = arith.addf %328, %329 : vector<32x16xf32>
    %331 = math.tanh %330 : vector<32x16xf32>
    %332 = arith.mulf %327, %331 : vector<32x16xf32>
    %c0_103 = arith.constant 0 : index
    %c0_104 = arith.constant 0 : index
    %c0_105 = arith.constant 0 : index
    %333 = vector.load %arg2[%c0_103, %c0_104, %c0_105] : memref<1x1x16xf32, #tpu.memory_space<vmem>>, vector<1x1x16xf32>
    %334 = vector.shape_cast %333 : vector<1x1x16xf32> to vector<1x16xf32>
    %c0_106 = arith.constant 0 : index
    %c0_107 = arith.constant 0 : index
    %335 = vector.load %arg6[%c0_106, %c0_107] : memref<16x32xbf16, #tpu.memory_space<vmem>>, vector<16x32xbf16>
    %336 = arith.truncf %332 : vector<32x16xf32> to vector<32x16xbf16>
    %cst_108 = arith.constant dense<0.000000e+00> : vector<16x16xf32>
    %337 = tpu.matmul %335, %336, %cst_108 {dimension_numbers = #tpu.dot_dimension_numbers<[1], [0], [0], [1], [0, 0, 1, 1], [], []>} : vector<16x32xbf16>, vector<32x16xbf16>, vector<16x16xf32> -> vector<16x16xf32>
    %c0_109 = arith.constant 0 : index
    %c0_110 = arith.constant 0 : index
    %338 = vector.load %arg7[%c0_109, %c0_110] : memref<16x1xf32, #tpu.memory_space<vmem>>, vector<16x1xf32>
    %339 = vector.broadcast %338 : vector<16x1xf32> to vector<16x16xf32>
    %340 = vector.broadcast %334 : vector<1x16xf32> to vector<16x16xf32>
    %341 = arith.mulf %339, %340 : vector<16x16xf32>
    %342 = arith.addf %337, %341 : vector<16x16xf32>
    %c0_111 = arith.constant 0 : index
    %c0_112 = arith.constant 0 : index
    %343 = vector.load %arg8[%c0_111, %c0_112] : memref<16x1xf32, #tpu.memory_space<vmem>>, vector<16x1xf32>
    %344 = vector.broadcast %343 : vector<16x1xf32> to vector<16x16xf32>
    %345 = arith.addf %342, %344 : vector<16x16xf32>
    %cst_113 = arith.constant 0.000000e+00 : f32
    %346 = vector.broadcast %cst_113 : f32 to vector<16x16xf32>
    %347 = arith.maximumf %345, %346 : vector<16x16xf32>
    %348 = vector.extract_strided_slice %347 {offsets = [0, 0], sizes = [1, 2], strides = [1, 1]} : vector<16x16xf32> to vector<1x2xf32>
    %c0_114 = arith.constant 0 : index
    %c0_115 = arith.constant 0 : index
    %349 = vector.load %arg16[%c0_114, %c0_115] : memref<16x16xf32, #tpu.memory_space<vmem>>, vector<1x2xf32>
    tpu.vector_store %arg16[%c0_114, %c0_115], %348 {strides = array<i32>} : memref<16x16xf32, #tpu.memory_space<vmem>>, vector<1x2xf32>,
    %350 = vector.extract_strided_slice %347 {offsets = [1, 0], sizes = [1, 2], strides = [1, 1]} : vector<16x16xf32> to vector<1x2xf32>
    %c0_116 = arith.constant 0 : index
    %c2_117 = arith.constant 2 : index
    %351 = vector.load %arg16[%c0_116, %c2_117] : memref<16x16xf32, #tpu.memory_space<vmem>>, vector<1x2xf32>
    tpu.vector_store %arg16[%c0_116, %c2_117], %350 {strides = array<i32>} : memref<16x16xf32, #tpu.memory_space<vmem>>, vector<1x2xf32>,
    %352 = vector.extract_strided_slice %347 {offsets = [2, 0], sizes = [1, 2], strides = [1, 1]} : vector<16x16xf32> to vector<1x2xf32>
    %c0_118 = arith.constant 0 : index
    %c4_119 = arith.constant 4 : index
    %353 = vector.load %arg16[%c0_118, %c4_119] : memref<16x16xf32, #tpu.memory_space<vmem>>, vector<1x2xf32>
    tpu.vector_store %arg16[%c0_118, %c4_119], %352 {strides = array<i32>} : memref<16x16xf32, #tpu.memory_space<vmem>>, vector<1x2xf32>,
    %354 = vector.extract_strided_slice %347 {offsets = [3, 0], sizes = [1, 2], strides = [1, 1]} : vector<16x16xf32> to vector<1x2xf32>
    %c0_120 = arith.constant 0 : index
    %c6_121 = arith.constant 6 : index
    %355 = vector.load %arg16[%c0_120, %c6_121] : memref<16x16xf32, #tpu.memory_space<vmem>>, vector<1x2xf32>
    tpu.vector_store %arg16[%c0_120, %c6_121], %354 {strides = array<i32>} : memref<16x16xf32, #tpu.memory_space<vmem>>, vector<1x2xf32>,
    %356 = vector.extract_strided_slice %347 {offsets = [4, 0], sizes = [1, 2], strides = [1, 1]} : vector<16x16xf32> to vector<1x2xf32>
    %c0_122 = arith.constant 0 : index
    %c8 = arith.constant 8 : index
    %357 = vector.load %arg16[%c0_122, %c8] : memref<16x16xf32, #tpu.memory_space<vmem>>, vector<1x2xf32>
    tpu.vector_store %arg16[%c0_122, %c8], %356 {strides = array<i32>} : memref<16x16xf32, #tpu.memory_space<vmem>>, vector<1x2xf32>,
    %358 = vector.extract_strided_slice %347 {offsets = [5, 0], sizes = [1, 2], strides = [1, 1]} : vector<16x16xf32> to vector<1x2xf32>
    %c0_123 = arith.constant 0 : index
    %c10 = arith.constant 10 : index
    %359 = vector.load %arg16[%c0_123, %c10] : memref<16x16xf32, #tpu.memory_space<vmem>>, vector<1x2xf32>
    tpu.vector_store %arg16[%c0_123, %c10], %358 {strides = array<i32>} : memref<16x16xf32, #tpu.memory_space<vmem>>, vector<1x2xf32>,
    %360 = vector.extract_strided_slice %347 {offsets = [6, 0], sizes = [1, 2], strides = [1, 1]} : vector<16x16xf32> to vector<1x2xf32>
    %c0_124 = arith.constant 0 : index
    %c12 = arith.constant 12 : index
    %361 = vector.load %arg16[%c0_124, %c12] : memref<16x16xf32, #tpu.memory_space<vmem>>, vector<1x2xf32>
    tpu.vector_store %arg16[%c0_124, %c12], %360 {strides = array<i32>} : memref<16x16xf32, #tpu.memory_space<vmem>>, vector<1x2xf32>,
    %362 = vector.extract_strided_slice %347 {offsets = [7, 0], sizes = [1, 2], strides = [1, 1]} : vector<16x16xf32> to vector<1x2xf32>
    %c0_125 = arith.constant 0 : index
    %c14 = arith.constant 14 : index
    %363 = vector.load %arg16[%c0_125, %c14] : memref<16x16xf32, #tpu.memory_space<vmem>>, vector<1x2xf32>
    tpu.vector_store %arg16[%c0_125, %c14], %362 {strides = array<i32>} : memref<16x16xf32, #tpu.memory_space<vmem>>, vector<1x2xf32>,
    %364 = vector.extract_strided_slice %347 {offsets = [8, 0], sizes = [1, 2], strides = [1, 1]} : vector<16x16xf32> to vector<1x2xf32>
    %c1_126 = arith.constant 1 : index
    %c0_127 = arith.constant 0 : index
    %365 = vector.load %arg16[%c1_126, %c0_127] : memref<16x16xf32, #tpu.memory_space<vmem>>, vector<1x2xf32>
    tpu.vector_store %arg16[%c1_126, %c0_127], %364 {strides = array<i32>} : memref<16x16xf32, #tpu.memory_space<vmem>>, vector<1x2xf32>,
    %366 = vector.extract_strided_slice %347 {offsets = [9, 0], sizes = [1, 2], strides = [1, 1]} : vector<16x16xf32> to vector<1x2xf32>
    %c1_128 = arith.constant 1 : index
    %c2_129 = arith.constant 2 : index
    %367 = vector.load %arg16[%c1_128, %c2_129] : memref<16x16xf32, #tpu.memory_space<vmem>>, vector<1x2xf32>
    tpu.vector_store %arg16[%c1_128, %c2_129], %366 {strides = array<i32>} : memref<16x16xf32, #tpu.memory_space<vmem>>, vector<1x2xf32>,
    %368 = vector.extract_strided_slice %347 {offsets = [10, 0], sizes = [1, 2], strides = [1, 1]} : vector<16x16xf32> to vector<1x2xf32>
    %c1_130 = arith.constant 1 : index
    %c4_131 = arith.constant 4 : index
    %369 = vector.load %arg16[%c1_130, %c4_131] : memref<16x16xf32, #tpu.memory_space<vmem>>, vector<1x2xf32>
    tpu.vector_store %arg16[%c1_130, %c4_131], %368 {strides = array<i32>} : memref<16x16xf32, #tpu.memory_space<vmem>>, vector<1x2xf32>,
    %370 = vector.extract_strided_slice %347 {offsets = [11, 0], sizes = [1, 2], strides = [1, 1]} : vector<16x16xf32> to vector<1x2xf32>
    %c1_132 = arith.constant 1 : index
    %c6_133 = arith.constant 6 : index
    %371 = vector.load %arg16[%c1_132, %c6_133] : memref<16x16xf32, #tpu.memory_space<vmem>>, vector<1x2xf32>
    tpu.vector_store %arg16[%c1_132, %c6_133], %370 {strides = array<i32>} : memref<16x16xf32, #tpu.memory_space<vmem>>, vector<1x2xf32>,
    %372 = vector.extract_strided_slice %347 {offsets = [12, 0], sizes = [1, 2], strides = [1, 1]} : vector<16x16xf32> to vector<1x2xf32>
    %c1_134 = arith.constant 1 : index
    %c8_135 = arith.constant 8 : index
    %373 = vector.load %arg16[%c1_134, %c8_135] : memref<16x16xf32, #tpu.memory_space<vmem>>, vector<1x2xf32>
    tpu.vector_store %arg16[%c1_134, %c8_135], %372 {strides = array<i32>} : memref<16x16xf32, #tpu.memory_space<vmem>>, vector<1x2xf32>,
    %374 = vector.extract_strided_slice %347 {offsets = [13, 0], sizes = [1, 2], strides = [1, 1]} : vector<16x16xf32> to vector<1x2xf32>
    %c1_136 = arith.constant 1 : index
    %c10_137 = arith.constant 10 : index
    %375 = vector.load %arg16[%c1_136, %c10_137] : memref<16x16xf32, #tpu.memory_space<vmem>>, vector<1x2xf32>
    tpu.vector_store %arg16[%c1_136, %c10_137], %374 {strides = array<i32>} : memref<16x16xf32, #tpu.memory_space<vmem>>, vector<1x2xf32>,
    %376 = vector.extract_strided_slice %347 {offsets = [14, 0], sizes = [1, 2], strides = [1, 1]} : vector<16x16xf32> to vector<1x2xf32>
    %c1_138 = arith.constant 1 : index
    %c12_139 = arith.constant 12 : index
    %377 = vector.load %arg16[%c1_138, %c12_139] : memref<16x16xf32, #tpu.memory_space<vmem>>, vector<1x2xf32>
    tpu.vector_store %arg16[%c1_138, %c12_139], %376 {strides = array<i32>} : memref<16x16xf32, #tpu.memory_space<vmem>>, vector<1x2xf32>,
    %378 = vector.extract_strided_slice %347 {offsets = [15, 0], sizes = [1, 2], strides = [1, 1]} : vector<16x16xf32> to vector<1x2xf32>
    %c1_140 = arith.constant 1 : index
    %c14_141 = arith.constant 14 : index
    %379 = vector.load %arg16[%c1_140, %c14_141] : memref<16x16xf32, #tpu.memory_space<vmem>>, vector<1x2xf32>
    tpu.vector_store %arg16[%c1_140, %c14_141], %378 {strides = array<i32>} : memref<16x16xf32, #tpu.memory_space<vmem>>, vector<1x2xf32>,
    %380 = vector.extract_strided_slice %347 {offsets = [0, 2], sizes = [1, 2], strides = [1, 1]} : vector<16x16xf32> to vector<1x2xf32>
    %c2_142 = arith.constant 2 : index
    %c0_143 = arith.constant 0 : index
    %381 = vector.load %arg16[%c2_142, %c0_143] : memref<16x16xf32, #tpu.memory_space<vmem>>, vector<1x2xf32>
    tpu.vector_store %arg16[%c2_142, %c0_143], %380 {strides = array<i32>} : memref<16x16xf32, #tpu.memory_space<vmem>>, vector<1x2xf32>,
    %382 = vector.extract_strided_slice %347 {offsets = [1, 2], sizes = [1, 2], strides = [1, 1]} : vector<16x16xf32> to vector<1x2xf32>
    %c2_144 = arith.constant 2 : index
    %c2_145 = arith.constant 2 : index
    %383 = vector.load %arg16[%c2_144, %c2_145] : memref<16x16xf32, #tpu.memory_space<vmem>>, vector<1x2xf32>
    tpu.vector_store %arg16[%c2_144, %c2_145], %382 {strides = array<i32>} : memref<16x16xf32, #tpu.memory_space<vmem>>, vector<1x2xf32>,
    %384 = vector.extract_strided_slice %347 {offsets = [2, 2], sizes = [1, 2], strides = [1, 1]} : vector<16x16xf32> to vector<1x2xf32>
    %c2_146 = arith.constant 2 : index
    %c4_147 = arith.constant 4 : index
    %385 = vector.load %arg16[%c2_146, %c4_147] : memref<16x16xf32, #tpu.memory_space<vmem>>, vector<1x2xf32>
    tpu.vector_store %arg16[%c2_146, %c4_147], %384 {strides = array<i32>} : memref<16x16xf32, #tpu.memory_space<vmem>>, vector<1x2xf32>,
    %386 = vector.extract_strided_slice %347 {offsets = [3, 2], sizes = [1, 2], strides = [1, 1]} : vector<16x16xf32> to vector<1x2xf32>
    %c2_148 = arith.constant 2 : index
    %c6_149 = arith.constant 6 : index
    %387 = vector.load %arg16[%c2_148, %c6_149] : memref<16x16xf32, #tpu.memory_space<vmem>>, vector<1x2xf32>
    tpu.vector_store %arg16[%c2_148, %c6_149], %386 {strides = array<i32>} : memref<16x16xf32, #tpu.memory_space<vmem>>, vector<1x2xf32>,
    %388 = vector.extract_strided_slice %347 {offsets = [4, 2], sizes = [1, 2], strides = [1, 1]} : vector<16x16xf32> to vector<1x2xf32>
    %c2_150 = arith.constant 2 : index
    %c8_151 = arith.constant 8 : index
    %389 = vector.load %arg16[%c2_150, %c8_151] : memref<16x16xf32, #tpu.memory_space<vmem>>, vector<1x2xf32>
    tpu.vector_store %arg16[%c2_150, %c8_151], %388 {strides = array<i32>} : memref<16x16xf32, #tpu.memory_space<vmem>>, vector<1x2xf32>,
    %390 = vector.extract_strided_slice %347 {offsets = [5, 2], sizes = [1, 2], strides = [1, 1]} : vector<16x16xf32> to vector<1x2xf32>
    %c2_152 = arith.constant 2 : index
    %c10_153 = arith.constant 10 : index
    %391 = vector.load %arg16[%c2_152, %c10_153] : memref<16x16xf32, #tpu.memory_space<vmem>>, vector<1x2xf32>
    tpu.vector_store %arg16[%c2_152, %c10_153], %390 {strides = array<i32>} : memref<16x16xf32, #tpu.memory_space<vmem>>, vector<1x2xf32>,
    %392 = vector.extract_strided_slice %347 {offsets = [6, 2], sizes = [1, 2], strides = [1, 1]} : vector<16x16xf32> to vector<1x2xf32>
    %c2_154 = arith.constant 2 : index
    %c12_155 = arith.constant 12 : index
    %393 = vector.load %arg16[%c2_154, %c12_155] : memref<16x16xf32, #tpu.memory_space<vmem>>, vector<1x2xf32>
    tpu.vector_store %arg16[%c2_154, %c12_155], %392 {strides = array<i32>} : memref<16x16xf32, #tpu.memory_space<vmem>>, vector<1x2xf32>,
    %394 = vector.extract_strided_slice %347 {offsets = [7, 2], sizes = [1, 2], strides = [1, 1]} : vector<16x16xf32> to vector<1x2xf32>
    %c2_156 = arith.constant 2 : index
    %c14_157 = arith.constant 14 : index
    %395 = vector.load %arg16[%c2_156, %c14_157] : memref<16x16xf32, #tpu.memory_space<vmem>>, vector<1x2xf32>
    tpu.vector_store %arg16[%c2_156, %c14_157], %394 {strides = array<i32>} : memref<16x16xf32, #tpu.memory_space<vmem>>, vector<1x2xf32>,
    %396 = vector.extract_strided_slice %347 {offsets = [8, 2], sizes = [1, 2], strides = [1, 1]} : vector<16x16xf32> to vector<1x2xf32>
    %c3_158 = arith.constant 3 : index
    %c0_159 = arith.constant 0 : index
    %397 = vector.load %arg16[%c3_158, %c0_159] : memref<16x16xf32, #tpu.memory_space<vmem>>, vector<1x2xf32>
    tpu.vector_store %arg16[%c3_158, %c0_159], %396 {strides = array<i32>} : memref<16x16xf32, #tpu.memory_space<vmem>>, vector<1x2xf32>,
    %398 = vector.extract_strided_slice %347 {offsets = [9, 2], sizes = [1, 2], strides = [1, 1]} : vector<16x16xf32> to vector<1x2xf32>
    %c3_160 = arith.constant 3 : index
    %c2_161 = arith.constant 2 : index
    %399 = vector.load %arg16[%c3_160, %c2_161] : memref<16x16xf32, #tpu.memory_space<vmem>>, vector<1x2xf32>
    tpu.vector_store %arg16[%c3_160, %c2_161], %398 {strides = array<i32>} : memref<16x16xf32, #tpu.memory_space<vmem>>, vector<1x2xf32>,
    %400 = vector.extract_strided_slice %347 {offsets = [10, 2], sizes = [1, 2], strides = [1, 1]} : vector<16x16xf32> to vector<1x2xf32>
    %c3_162 = arith.constant 3 : index
    %c4_163 = arith.constant 4 : index
    %401 = vector.load %arg16[%c3_162, %c4_163] : memref<16x16xf32, #tpu.memory_space<vmem>>, vector<1x2xf32>
    tpu.vector_store %arg16[%c3_162, %c4_163], %400 {strides = array<i32>} : memref<16x16xf32, #tpu.memory_space<vmem>>, vector<1x2xf32>,
    %402 = vector.extract_strided_slice %347 {offsets = [11, 2], sizes = [1, 2], strides = [1, 1]} : vector<16x16xf32> to vector<1x2xf32>
    %c3_164 = arith.constant 3 : index
    %c6_165 = arith.constant 6 : index
    %403 = vector.load %arg16[%c3_164, %c6_165] : memref<16x16xf32, #tpu.memory_space<vmem>>, vector<1x2xf32>
    tpu.vector_store %arg16[%c3_164, %c6_165], %402 {strides = array<i32>} : memref<16x16xf32, #tpu.memory_space<vmem>>, vector<1x2xf32>,
    %404 = vector.extract_strided_slice %347 {offsets = [12, 2], sizes = [1, 2], strides = [1, 1]} : vector<16x16xf32> to vector<1x2xf32>
    %c3_166 = arith.constant 3 : index
    %c8_167 = arith.constant 8 : index
    %405 = vector.load %arg16[%c3_166, %c8_167] : memref<16x16xf32, #tpu.memory_space<vmem>>, vector<1x2xf32>
    tpu.vector_store %arg16[%c3_166, %c8_167], %404 {strides = array<i32>} : memref<16x16xf32, #tpu.memory_space<vmem>>, vector<1x2xf32>,
    %406 = vector.extract_strided_slice %347 {offsets = [13, 2], sizes = [1, 2], strides = [1, 1]} : vector<16x16xf32> to vector<1x2xf32>
    %c3_168 = arith.constant 3 : index
    %c10_169 = arith.constant 10 : index
    %407 = vector.load %arg16[%c3_168, %c10_169] : memref<16x16xf32, #tpu.memory_space<vmem>>, vector<1x2xf32>
    tpu.vector_store %arg16[%c3_168, %c10_169], %406 {strides = array<i32>} : memref<16x16xf32, #tpu.memory_space<vmem>>, vector<1x2xf32>,
    %408 = vector.extract_strided_slice %347 {offsets = [14, 2], sizes = [1, 2], strides = [1, 1]} : vector<16x16xf32> to vector<1x2xf32>
    %c3_170 = arith.constant 3 : index
    %c12_171 = arith.constant 12 : index
    %409 = vector.load %arg16[%c3_170, %c12_171] : memref<16x16xf32, #tpu.memory_space<vmem>>, vector<1x2xf32>
    tpu.vector_store %arg16[%c3_170, %c12_171], %408 {strides = array<i32>} : memref<16x16xf32, #tpu.memory_space<vmem>>, vector<1x2xf32>,
    %410 = vector.extract_strided_slice %347 {offsets = [15, 2], sizes = [1, 2], strides = [1, 1]} : vector<16x16xf32> to vector<1x2xf32>
    %c3_172 = arith.constant 3 : index
    %c14_173 = arith.constant 14 : index
    %411 = vector.load %arg16[%c3_172, %c14_173] : memref<16x16xf32, #tpu.memory_space<vmem>>, vector<1x2xf32>
    tpu.vector_store %arg16[%c3_172, %c14_173], %410 {strides = array<i32>} : memref<16x16xf32, #tpu.memory_space<vmem>>, vector<1x2xf32>,
    %412 = vector.extract_strided_slice %347 {offsets = [0, 4], sizes = [1, 2], strides = [1, 1]} : vector<16x16xf32> to vector<1x2xf32>
    %c4_174 = arith.constant 4 : index
    %c0_175 = arith.constant 0 : index
    %413 = vector.load %arg16[%c4_174, %c0_175] : memref<16x16xf32, #tpu.memory_space<vmem>>, vector<1x2xf32>
    tpu.vector_store %arg16[%c4_174, %c0_175], %412 {strides = array<i32>} : memref<16x16xf32, #tpu.memory_space<vmem>>, vector<1x2xf32>,
    %414 = vector.extract_strided_slice %347 {offsets = [1, 4], sizes = [1, 2], strides = [1, 1]} : vector<16x16xf32> to vector<1x2xf32>
    %c4_176 = arith.constant 4 : index
    %c2_177 = arith.constant 2 : index
    %415 = vector.load %arg16[%c4_176, %c2_177] : memref<16x16xf32, #tpu.memory_space<vmem>>, vector<1x2xf32>
    tpu.vector_store %arg16[%c4_176, %c2_177], %414 {strides = array<i32>} : memref<16x16xf32, #tpu.memory_space<vmem>>, vector<1x2xf32>,
    %416 = vector.extract_strided_slice %347 {offsets = [2, 4], sizes = [1, 2], strides = [1, 1]} : vector<16x16xf32> to vector<1x2xf32>
    %c4_178 = arith.constant 4 : index
    %c4_179 = arith.constant 4 : index
    %417 = vector.load %arg16[%c4_178, %c4_179] : memref<16x16xf32, #tpu.memory_space<vmem>>, vector<1x2xf32>
    tpu.vector_store %arg16[%c4_178, %c4_179], %416 {strides = array<i32>} : memref<16x16xf32, #tpu.memory_space<vmem>>, vector<1x2xf32>,
    %418 = vector.extract_strided_slice %347 {offsets = [3, 4], sizes = [1, 2], strides = [1, 1]} : vector<16x16xf32> to vector<1x2xf32>
    %c4_180 = arith.constant 4 : index
    %c6_181 = arith.constant 6 : index
    %419 = vector.load %arg16[%c4_180, %c6_181] : memref<16x16xf32, #tpu.memory_space<vmem>>, vector<1x2xf32>
    tpu.vector_store %arg16[%c4_180, %c6_181], %418 {strides = array<i32>} : memref<16x16xf32, #tpu.memory_space<vmem>>, vector<1x2xf32>,
    %420 = vector.extract_strided_slice %347 {offsets = [4, 4], sizes = [1, 2], strides = [1, 1]} : vector<16x16xf32> to vector<1x2xf32>
    %c4_182 = arith.constant 4 : index
    %c8_183 = arith.constant 8 : index
    %421 = vector.load %arg16[%c4_182, %c8_183] : memref<16x16xf32, #tpu.memory_space<vmem>>, vector<1x2xf32>
    tpu.vector_store %arg16[%c4_182, %c8_183], %420 {strides = array<i32>} : memref<16x16xf32, #tpu.memory_space<vmem>>, vector<1x2xf32>,
    %422 = vector.extract_strided_slice %347 {offsets = [5, 4], sizes = [1, 2], strides = [1, 1]} : vector<16x16xf32> to vector<1x2xf32>
    %c4_184 = arith.constant 4 : index
    %c10_185 = arith.constant 10 : index
    %423 = vector.load %arg16[%c4_184, %c10_185] : memref<16x16xf32, #tpu.memory_space<vmem>>, vector<1x2xf32>
    tpu.vector_store %arg16[%c4_184, %c10_185], %422 {strides = array<i32>} : memref<16x16xf32, #tpu.memory_space<vmem>>, vector<1x2xf32>,
    %424 = vector.extract_strided_slice %347 {offsets = [6, 4], sizes = [1, 2], strides = [1, 1]} : vector<16x16xf32> to vector<1x2xf32>
    %c4_186 = arith.constant 4 : index
    %c12_187 = arith.constant 12 : index
    %425 = vector.load %arg16[%c4_186, %c12_187] : memref<16x16xf32, #tpu.memory_space<vmem>>, vector<1x2xf32>
    tpu.vector_store %arg16[%c4_186, %c12_187], %424 {strides = array<i32>} : memref<16x16xf32, #tpu.memory_space<vmem>>, vector<1x2xf32>,
    %426 = vector.extract_strided_slice %347 {offsets = [7, 4], sizes = [1, 2], strides = [1, 1]} : vector<16x16xf32> to vector<1x2xf32>
    %c4_188 = arith.constant 4 : index
    %c14_189 = arith.constant 14 : index
    %427 = vector.load %arg16[%c4_188, %c14_189] : memref<16x16xf32, #tpu.memory_space<vmem>>, vector<1x2xf32>
    tpu.vector_store %arg16[%c4_188, %c14_189], %426 {strides = array<i32>} : memref<16x16xf32, #tpu.memory_space<vmem>>, vector<1x2xf32>,
    %428 = vector.extract_strided_slice %347 {offsets = [8, 4], sizes = [1, 2], strides = [1, 1]} : vector<16x16xf32> to vector<1x2xf32>
    %c5_190 = arith.constant 5 : index
    %c0_191 = arith.constant 0 : index
    %429 = vector.load %arg16[%c5_190, %c0_191] : memref<16x16xf32, #tpu.memory_space<vmem>>, vector<1x2xf32>
    tpu.vector_store %arg16[%c5_190, %c0_191], %428 {strides = array<i32>} : memref<16x16xf32, #tpu.memory_space<vmem>>, vector<1x2xf32>,
    %430 = vector.extract_strided_slice %347 {offsets = [9, 4], sizes = [1, 2], strides = [1, 1]} : vector<16x16xf32> to vector<1x2xf32>
    %c5_192 = arith.constant 5 : index
    %c2_193 = arith.constant 2 : index
    %431 = vector.load %arg16[%c5_192, %c2_193] : memref<16x16xf32, #tpu.memory_space<vmem>>, vector<1x2xf32>
    tpu.vector_store %arg16[%c5_192, %c2_193], %430 {strides = array<i32>} : memref<16x16xf32, #tpu.memory_space<vmem>>, vector<1x2xf32>,
    %432 = vector.extract_strided_slice %347 {offsets = [10, 4], sizes = [1, 2], strides = [1, 1]} : vector<16x16xf32> to vector<1x2xf32>
    %c5_194 = arith.constant 5 : index
    %c4_195 = arith.constant 4 : index
    %433 = vector.load %arg16[%c5_194, %c4_195] : memref<16x16xf32, #tpu.memory_space<vmem>>, vector<1x2xf32>
    tpu.vector_store %arg16[%c5_194, %c4_195], %432 {strides = array<i32>} : memref<16x16xf32, #tpu.memory_space<vmem>>, vector<1x2xf32>,
    %434 = vector.extract_strided_slice %347 {offsets = [11, 4], sizes = [1, 2], strides = [1, 1]} : vector<16x16xf32> to vector<1x2xf32>
    %c5_196 = arith.constant 5 : index
    %c6_197 = arith.constant 6 : index
    %435 = vector.load %arg16[%c5_196, %c6_197] : memref<16x16xf32, #tpu.memory_space<vmem>>, vector<1x2xf32>
    tpu.vector_store %arg16[%c5_196, %c6_197], %434 {strides = array<i32>} : memref<16x16xf32, #tpu.memory_space<vmem>>, vector<1x2xf32>,
    %436 = vector.extract_strided_slice %347 {offsets = [12, 4], sizes = [1, 2], strides = [1, 1]} : vector<16x16xf32> to vector<1x2xf32>
    %c5_198 = arith.constant 5 : index
    %c8_199 = arith.constant 8 : index
    %437 = vector.load %arg16[%c5_198, %c8_199] : memref<16x16xf32, #tpu.memory_space<vmem>>, vector<1x2xf32>
    tpu.vector_store %arg16[%c5_198, %c8_199], %436 {strides = array<i32>} : memref<16x16xf32, #tpu.memory_space<vmem>>, vector<1x2xf32>,
    %438 = vector.extract_strided_slice %347 {offsets = [13, 4], sizes = [1, 2], strides = [1, 1]} : vector<16x16xf32> to vector<1x2xf32>
    %c5_200 = arith.constant 5 : index
    %c10_201 = arith.constant 10 : index
    %439 = vector.load %arg16[%c5_200, %c10_201] : memref<16x16xf32, #tpu.memory_space<vmem>>, vector<1x2xf32>
    tpu.vector_store %arg16[%c5_200, %c10_201], %438 {strides = array<i32>} : memref<16x16xf32, #tpu.memory_space<vmem>>, vector<1x2xf32>,
    %440 = vector.extract_strided_slice %347 {offsets = [14, 4], sizes = [1, 2], strides = [1, 1]} : vector<16x16xf32> to vector<1x2xf32>
    %c5_202 = arith.constant 5 : index
    %c12_203 = arith.constant 12 : index
    %441 = vector.load %arg16[%c5_202, %c12_203] : memref<16x16xf32, #tpu.memory_space<vmem>>, vector<1x2xf32>
    tpu.vector_store %arg16[%c5_202, %c12_203], %440 {strides = array<i32>} : memref<16x16xf32, #tpu.memory_space<vmem>>, vector<1x2xf32>,
    %442 = vector.extract_strided_slice %347 {offsets = [15, 4], sizes = [1, 2], strides = [1, 1]} : vector<16x16xf32> to vector<1x2xf32>
    %c5_204 = arith.constant 5 : index
    %c14_205 = arith.constant 14 : index
    %443 = vector.load %arg16[%c5_204, %c14_205] : memref<16x16xf32, #tpu.memory_space<vmem>>, vector<1x2xf32>
    tpu.vector_store %arg16[%c5_204, %c14_205], %442 {strides = array<i32>} : memref<16x16xf32, #tpu.memory_space<vmem>>, vector<1x2xf32>,
    %444 = vector.extract_strided_slice %347 {offsets = [0, 6], sizes = [1, 2], strides = [1, 1]} : vector<16x16xf32> to vector<1x2xf32>
    %c6_206 = arith.constant 6 : index
    %c0_207 = arith.constant 0 : index
    %445 = vector.load %arg16[%c6_206, %c0_207] : memref<16x16xf32, #tpu.memory_space<vmem>>, vector<1x2xf32>
    tpu.vector_store %arg16[%c6_206, %c0_207], %444 {strides = array<i32>} : memref<16x16xf32, #tpu.memory_space<vmem>>, vector<1x2xf32>,
    %446 = vector.extract_strided_slice %347 {offsets = [1, 6], sizes = [1, 2], strides = [1, 1]} : vector<16x16xf32> to vector<1x2xf32>
    %c6_208 = arith.constant 6 : index
    %c2_209 = arith.constant 2 : index
    %447 = vector.load %arg16[%c6_208, %c2_209] : memref<16x16xf32, #tpu.memory_space<vmem>>, vector<1x2xf32>
    tpu.vector_store %arg16[%c6_208, %c2_209], %446 {strides = array<i32>} : memref<16x16xf32, #tpu.memory_space<vmem>>, vector<1x2xf32>,
    %448 = vector.extract_strided_slice %347 {offsets = [2, 6], sizes = [1, 2], strides = [1, 1]} : vector<16x16xf32> to vector<1x2xf32>
    %c6_210 = arith.constant 6 : index
    %c4_211 = arith.constant 4 : index
    %449 = vector.load %arg16[%c6_210, %c4_211] : memref<16x16xf32, #tpu.memory_space<vmem>>, vector<1x2xf32>
    tpu.vector_store %arg16[%c6_210, %c4_211], %448 {strides = array<i32>} : memref<16x16xf32, #tpu.memory_space<vmem>>, vector<1x2xf32>,
    %450 = vector.extract_strided_slice %347 {offsets = [3, 6], sizes = [1, 2], strides = [1, 1]} : vector<16x16xf32> to vector<1x2xf32>
    %c6_212 = arith.constant 6 : index
    %c6_213 = arith.constant 6 : index
    %451 = vector.load %arg16[%c6_212, %c6_213] : memref<16x16xf32, #tpu.memory_space<vmem>>, vector<1x2xf32>
    tpu.vector_store %arg16[%c6_212, %c6_213], %450 {strides = array<i32>} : memref<16x16xf32, #tpu.memory_space<vmem>>, vector<1x2xf32>,
    %452 = vector.extract_strided_slice %347 {offsets = [4, 6], sizes = [1, 2], strides = [1, 1]} : vector<16x16xf32> to vector<1x2xf32>
    %c6_214 = arith.constant 6 : index
    %c8_215 = arith.constant 8 : index
    %453 = vector.load %arg16[%c6_214, %c8_215] : memref<16x16xf32, #tpu.memory_space<vmem>>, vector<1x2xf32>
    tpu.vector_store %arg16[%c6_214, %c8_215], %452 {strides = array<i32>} : memref<16x16xf32, #tpu.memory_space<vmem>>, vector<1x2xf32>,
    %454 = vector.extract_strided_slice %347 {offsets = [5, 6], sizes = [1, 2], strides = [1, 1]} : vector<16x16xf32> to vector<1x2xf32>
    %c6_216 = arith.constant 6 : index
    %c10_217 = arith.constant 10 : index
    %455 = vector.load %arg16[%c6_216, %c10_217] : memref<16x16xf32, #tpu.memory_space<vmem>>, vector<1x2xf32>
    tpu.vector_store %arg16[%c6_216, %c10_217], %454 {strides = array<i32>} : memref<16x16xf32, #tpu.memory_space<vmem>>, vector<1x2xf32>,
    %456 = vector.extract_strided_slice %347 {offsets = [6, 6], sizes = [1, 2], strides = [1, 1]} : vector<16x16xf32> to vector<1x2xf32>
    %c6_218 = arith.constant 6 : index
    %c12_219 = arith.constant 12 : index
    %457 = vector.load %arg16[%c6_218, %c12_219] : memref<16x16xf32, #tpu.memory_space<vmem>>, vector<1x2xf32>
    tpu.vector_store %arg16[%c6_218, %c12_219], %456 {strides = array<i32>} : memref<16x16xf32, #tpu.memory_space<vmem>>, vector<1x2xf32>,
    %458 = vector.extract_strided_slice %347 {offsets = [7, 6], sizes = [1, 2], strides = [1, 1]} : vector<16x16xf32> to vector<1x2xf32>
    %c6_220 = arith.constant 6 : index
    %c14_221 = arith.constant 14 : index
    %459 = vector.load %arg16[%c6_220, %c14_221] : memref<16x16xf32, #tpu.memory_space<vmem>>, vector<1x2xf32>
    tpu.vector_store %arg16[%c6_220, %c14_221], %458 {strides = array<i32>} : memref<16x16xf32, #tpu.memory_space<vmem>>, vector<1x2xf32>,
    %460 = vector.extract_strided_slice %347 {offsets = [8, 6], sizes = [1, 2], strides = [1, 1]} : vector<16x16xf32> to vector<1x2xf32>
    %c7_222 = arith.constant 7 : index
    %c0_223 = arith.constant 0 : index
    %461 = vector.load %arg16[%c7_222, %c0_223] : memref<16x16xf32, #tpu.memory_space<vmem>>, vector<1x2xf32>
    tpu.vector_store %arg16[%c7_222, %c0_223], %460 {strides = array<i32>} : memref<16x16xf32, #tpu.memory_space<vmem>>, vector<1x2xf32>,
    %462 = vector.extract_strided_slice %347 {offsets = [9, 6], sizes = [1, 2], strides = [1, 1]} : vector<16x16xf32> to vector<1x2xf32>
    %c7_224 = arith.constant 7 : index
    %c2_225 = arith.constant 2 : index
    %463 = vector.load %arg16[%c7_224, %c2_225] : memref<16x16xf32, #tpu.memory_space<vmem>>, vector<1x2xf32>
    tpu.vector_store %arg16[%c7_224, %c2_225], %462 {strides = array<i32>} : memref<16x16xf32, #tpu.memory_space<vmem>>, vector<1x2xf32>,
    %464 = vector.extract_strided_slice %347 {offsets = [10, 6], sizes = [1, 2], strides = [1, 1]} : vector<16x16xf32> to vector<1x2xf32>
    %c7_226 = arith.constant 7 : index
    %c4_227 = arith.constant 4 : index
    %465 = vector.load %arg16[%c7_226, %c4_227] : memref<16x16xf32, #tpu.memory_space<vmem>>, vector<1x2xf32>
    tpu.vector_store %arg16[%c7_226, %c4_227], %464 {strides = array<i32>} : memref<16x16xf32, #tpu.memory_space<vmem>>, vector<1x2xf32>,
    %466 = vector.extract_strided_slice %347 {offsets = [11, 6], sizes = [1, 2], strides = [1, 1]} : vector<16x16xf32> to vector<1x2xf32>
    %c7_228 = arith.constant 7 : index
    %c6_229 = arith.constant 6 : index
    %467 = vector.load %arg16[%c7_228, %c6_229] : memref<16x16xf32, #tpu.memory_space<vmem>>, vector<1x2xf32>
    tpu.vector_store %arg16[%c7_228, %c6_229], %466 {strides = array<i32>} : memref<16x16xf32, #tpu.memory_space<vmem>>, vector<1x2xf32>,
    %468 = vector.extract_strided_slice %347 {offsets = [12, 6], sizes = [1, 2], strides = [1, 1]} : vector<16x16xf32> to vector<1x2xf32>
    %c7_230 = arith.constant 7 : index
    %c8_231 = arith.constant 8 : index
    %469 = vector.load %arg16[%c7_230, %c8_231] : memref<16x16xf32, #tpu.memory_space<vmem>>, vector<1x2xf32>
    tpu.vector_store %arg16[%c7_230, %c8_231], %468 {strides = array<i32>} : memref<16x16xf32, #tpu.memory_space<vmem>>, vector<1x2xf32>,
    %470 = vector.extract_strided_slice %347 {offsets = [13, 6], sizes = [1, 2], strides = [1, 1]} : vector<16x16xf32> to vector<1x2xf32>
    %c7_232 = arith.constant 7 : index
    %c10_233 = arith.constant 10 : index
    %471 = vector.load %arg16[%c7_232, %c10_233] : memref<16x16xf32, #tpu.memory_space<vmem>>, vector<1x2xf32>
    tpu.vector_store %arg16[%c7_232, %c10_233], %470 {strides = array<i32>} : memref<16x16xf32, #tpu.memory_space<vmem>>, vector<1x2xf32>,
    %472 = vector.extract_strided_slice %347 {offsets = [14, 6], sizes = [1, 2], strides = [1, 1]} : vector<16x16xf32> to vector<1x2xf32>
    %c7_234 = arith.constant 7 : index
    %c12_235 = arith.constant 12 : index
    %473 = vector.load %arg16[%c7_234, %c12_235] : memref<16x16xf32, #tpu.memory_space<vmem>>, vector<1x2xf32>
    tpu.vector_store %arg16[%c7_234, %c12_235], %472 {strides = array<i32>} : memref<16x16xf32, #tpu.memory_space<vmem>>, vector<1x2xf32>,
    %474 = vector.extract_strided_slice %347 {offsets = [15, 6], sizes = [1, 2], strides = [1, 1]} : vector<16x16xf32> to vector<1x2xf32>
    %c7_236 = arith.constant 7 : index
    %c14_237 = arith.constant 14 : index
    %475 = vector.load %arg16[%c7_236, %c14_237] : memref<16x16xf32, #tpu.memory_space<vmem>>, vector<1x2xf32>
    tpu.vector_store %arg16[%c7_236, %c14_237], %474 {strides = array<i32>} : memref<16x16xf32, #tpu.memory_space<vmem>>, vector<1x2xf32>,
    %476 = vector.extract_strided_slice %347 {offsets = [0, 8], sizes = [1, 2], strides = [1, 1]} : vector<16x16xf32> to vector<1x2xf32>
    %c8_238 = arith.constant 8 : index
    %c0_239 = arith.constant 0 : index
    %477 = vector.load %arg16[%c8_238, %c0_239] : memref<16x16xf32, #tpu.memory_space<vmem>>, vector<1x2xf32>
    tpu.vector_store %arg16[%c8_238, %c0_239], %476 {strides = array<i32>} : memref<16x16xf32, #tpu.memory_space<vmem>>, vector<1x2xf32>,
    %478 = vector.extract_strided_slice %347 {offsets = [1, 8], sizes = [1, 2], strides = [1, 1]} : vector<16x16xf32> to vector<1x2xf32>
    %c8_240 = arith.constant 8 : index
    %c2_241 = arith.constant 2 : index
    %479 = vector.load %arg16[%c8_240, %c2_241] : memref<16x16xf32, #tpu.memory_space<vmem>>, vector<1x2xf32>
    tpu.vector_store %arg16[%c8_240, %c2_241], %478 {strides = array<i32>} : memref<16x16xf32, #tpu.memory_space<vmem>>, vector<1x2xf32>,
    %480 = vector.extract_strided_slice %347 {offsets = [2, 8], sizes = [1, 2], strides = [1, 1]} : vector<16x16xf32> to vector<1x2xf32>
    %c8_242 = arith.constant 8 : index
    %c4_243 = arith.constant 4 : index
    %481 = vector.load %arg16[%c8_242, %c4_243] : memref<16x16xf32, #tpu.memory_space<vmem>>, vector<1x2xf32>
    tpu.vector_store %arg16[%c8_242, %c4_243], %480 {strides = array<i32>} : memref<16x16xf32, #tpu.memory_space<vmem>>, vector<1x2xf32>,
    %482 = vector.extract_strided_slice %347 {offsets = [3, 8], sizes = [1, 2], strides = [1, 1]} : vector<16x16xf32> to vector<1x2xf32>
    %c8_244 = arith.constant 8 : index
    %c6_245 = arith.constant 6 : index
    %483 = vector.load %arg16[%c8_244, %c6_245] : memref<16x16xf32, #tpu.memory_space<vmem>>, vector<1x2xf32>
    tpu.vector_store %arg16[%c8_244, %c6_245], %482 {strides = array<i32>} : memref<16x16xf32, #tpu.memory_space<vmem>>, vector<1x2xf32>,
    %484 = vector.extract_strided_slice %347 {offsets = [4, 8], sizes = [1, 2], strides = [1, 1]} : vector<16x16xf32> to vector<1x2xf32>
    %c8_246 = arith.constant 8 : index
    %c8_247 = arith.constant 8 : index
    %485 = vector.load %arg16[%c8_246, %c8_247] : memref<16x16xf32, #tpu.memory_space<vmem>>, vector<1x2xf32>
    tpu.vector_store %arg16[%c8_246, %c8_247], %484 {strides = array<i32>} : memref<16x16xf32, #tpu.memory_space<vmem>>, vector<1x2xf32>,
    %486 = vector.extract_strided_slice %347 {offsets = [5, 8], sizes = [1, 2], strides = [1, 1]} : vector<16x16xf32> to vector<1x2xf32>
    %c8_248 = arith.constant 8 : index
    %c10_249 = arith.constant 10 : index
    %487 = vector.load %arg16[%c8_248, %c10_249] : memref<16x16xf32, #tpu.memory_space<vmem>>, vector<1x2xf32>
    tpu.vector_store %arg16[%c8_248, %c10_249], %486 {strides = array<i32>} : memref<16x16xf32, #tpu.memory_space<vmem>>, vector<1x2xf32>,
    %488 = vector.extract_strided_slice %347 {offsets = [6, 8], sizes = [1, 2], strides = [1, 1]} : vector<16x16xf32> to vector<1x2xf32>
    %c8_250 = arith.constant 8 : index
    %c12_251 = arith.constant 12 : index
    %489 = vector.load %arg16[%c8_250, %c12_251] : memref<16x16xf32, #tpu.memory_space<vmem>>, vector<1x2xf32>
    tpu.vector_store %arg16[%c8_250, %c12_251], %488 {strides = array<i32>} : memref<16x16xf32, #tpu.memory_space<vmem>>, vector<1x2xf32>,
    %490 = vector.extract_strided_slice %347 {offsets = [7, 8], sizes = [1, 2], strides = [1, 1]} : vector<16x16xf32> to vector<1x2xf32>
    %c8_252 = arith.constant 8 : index
    %c14_253 = arith.constant 14 : index
    %491 = vector.load %arg16[%c8_252, %c14_253] : memref<16x16xf32, #tpu.memory_space<vmem>>, vector<1x2xf32>
    tpu.vector_store %arg16[%c8_252, %c14_253], %490 {strides = array<i32>} : memref<16x16xf32, #tpu.memory_space<vmem>>, vector<1x2xf32>,
    %492 = vector.extract_strided_slice %347 {offsets = [8, 8], sizes = [1, 2], strides = [1, 1]} : vector<16x16xf32> to vector<1x2xf32>
    %c9 = arith.constant 9 : index
    %c0_254 = arith.constant 0 : index
    %493 = vector.load %arg16[%c9, %c0_254] : memref<16x16xf32, #tpu.memory_space<vmem>>, vector<1x2xf32>
    tpu.vector_store %arg16[%c9, %c0_254], %492 {strides = array<i32>} : memref<16x16xf32, #tpu.memory_space<vmem>>, vector<1x2xf32>,
    %494 = vector.extract_strided_slice %347 {offsets = [9, 8], sizes = [1, 2], strides = [1, 1]} : vector<16x16xf32> to vector<1x2xf32>
    %c9_255 = arith.constant 9 : index
    %c2_256 = arith.constant 2 : index
    %495 = vector.load %arg16[%c9_255, %c2_256] : memref<16x16xf32, #tpu.memory_space<vmem>>, vector<1x2xf32>
    tpu.vector_store %arg16[%c9_255, %c2_256], %494 {strides = array<i32>} : memref<16x16xf32, #tpu.memory_space<vmem>>, vector<1x2xf32>,
    %496 = vector.extract_strided_slice %347 {offsets = [10, 8], sizes = [1, 2], strides = [1, 1]} : vector<16x16xf32> to vector<1x2xf32>
    %c9_257 = arith.constant 9 : index
    %c4_258 = arith.constant 4 : index
    %497 = vector.load %arg16[%c9_257, %c4_258] : memref<16x16xf32, #tpu.memory_space<vmem>>, vector<1x2xf32>
    tpu.vector_store %arg16[%c9_257, %c4_258], %496 {strides = array<i32>} : memref<16x16xf32, #tpu.memory_space<vmem>>, vector<1x2xf32>,
    %498 = vector.extract_strided_slice %347 {offsets = [11, 8], sizes = [1, 2], strides = [1, 1]} : vector<16x16xf32> to vector<1x2xf32>
    %c9_259 = arith.constant 9 : index
    %c6_260 = arith.constant 6 : index
    %499 = vector.load %arg16[%c9_259, %c6_260] : memref<16x16xf32, #tpu.memory_space<vmem>>, vector<1x2xf32>
    tpu.vector_store %arg16[%c9_259, %c6_260], %498 {strides = array<i32>} : memref<16x16xf32, #tpu.memory_space<vmem>>, vector<1x2xf32>,
    %500 = vector.extract_strided_slice %347 {offsets = [12, 8], sizes = [1, 2], strides = [1, 1]} : vector<16x16xf32> to vector<1x2xf32>
    %c9_261 = arith.constant 9 : index
    %c8_262 = arith.constant 8 : index
    %501 = vector.load %arg16[%c9_261, %c8_262] : memref<16x16xf32, #tpu.memory_space<vmem>>, vector<1x2xf32>
    tpu.vector_store %arg16[%c9_261, %c8_262], %500 {strides = array<i32>} : memref<16x16xf32, #tpu.memory_space<vmem>>, vector<1x2xf32>,
    %502 = vector.extract_strided_slice %347 {offsets = [13, 8], sizes = [1, 2], strides = [1, 1]} : vector<16x16xf32> to vector<1x2xf32>
    %c9_263 = arith.constant 9 : index
    %c10_264 = arith.constant 10 : index
    %503 = vector.load %arg16[%c9_263, %c10_264] : memref<16x16xf32, #tpu.memory_space<vmem>>, vector<1x2xf32>
    tpu.vector_store %arg16[%c9_263, %c10_264], %502 {strides = array<i32>} : memref<16x16xf32, #tpu.memory_space<vmem>>, vector<1x2xf32>,
    %504 = vector.extract_strided_slice %347 {offsets = [14, 8], sizes = [1, 2], strides = [1, 1]} : vector<16x16xf32> to vector<1x2xf32>
    %c9_265 = arith.constant 9 : index
    %c12_266 = arith.constant 12 : index
    %505 = vector.load %arg16[%c9_265, %c12_266] : memref<16x16xf32, #tpu.memory_space<vmem>>, vector<1x2xf32>
    tpu.vector_store %arg16[%c9_265, %c12_266], %504 {strides = array<i32>} : memref<16x16xf32, #tpu.memory_space<vmem>>, vector<1x2xf32>,
    %506 = vector.extract_strided_slice %347 {offsets = [15, 8], sizes = [1, 2], strides = [1, 1]} : vector<16x16xf32> to vector<1x2xf32>
    %c9_267 = arith.constant 9 : index
    %c14_268 = arith.constant 14 : index
    %507 = vector.load %arg16[%c9_267, %c14_268] : memref<16x16xf32, #tpu.memory_space<vmem>>, vector<1x2xf32>
    tpu.vector_store %arg16[%c9_267, %c14_268], %506 {strides = array<i32>} : memref<16x16xf32, #tpu.memory_space<vmem>>, vector<1x2xf32>,
    %508 = vector.extract_strided_slice %347 {offsets = [0, 10], sizes = [1, 2], strides = [1, 1]} : vector<16x16xf32> to vector<1x2xf32>
    %c10_269 = arith.constant 10 : index
    %c0_270 = arith.constant 0 : index
    %509 = vector.load %arg16[%c10_269, %c0_270] : memref<16x16xf32, #tpu.memory_space<vmem>>, vector<1x2xf32>
    tpu.vector_store %arg16[%c10_269, %c0_270], %508 {strides = array<i32>} : memref<16x16xf32, #tpu.memory_space<vmem>>, vector<1x2xf32>,
    %510 = vector.extract_strided_slice %347 {offsets = [1, 10], sizes = [1, 2], strides = [1, 1]} : vector<16x16xf32> to vector<1x2xf32>
    %c10_271 = arith.constant 10 : index
    %c2_272 = arith.constant 2 : index
    %511 = vector.load %arg16[%c10_271, %c2_272] : memref<16x16xf32, #tpu.memory_space<vmem>>, vector<1x2xf32>
    tpu.vector_store %arg16[%c10_271, %c2_272], %510 {strides = array<i32>} : memref<16x16xf32, #tpu.memory_space<vmem>>, vector<1x2xf32>,
    %512 = vector.extract_strided_slice %347 {offsets = [2, 10], sizes = [1, 2], strides = [1, 1]} : vector<16x16xf32> to vector<1x2xf32>
    %c10_273 = arith.constant 10 : index
    %c4_274 = arith.constant 4 : index
    %513 = vector.load %arg16[%c10_273, %c4_274] : memref<16x16xf32, #tpu.memory_space<vmem>>, vector<1x2xf32>
    tpu.vector_store %arg16[%c10_273, %c4_274], %512 {strides = array<i32>} : memref<16x16xf32, #tpu.memory_space<vmem>>, vector<1x2xf32>,
    %514 = vector.extract_strided_slice %347 {offsets = [3, 10], sizes = [1, 2], strides = [1, 1]} : vector<16x16xf32> to vector<1x2xf32>
    %c10_275 = arith.constant 10 : index
    %c6_276 = arith.constant 6 : index
    %515 = vector.load %arg16[%c10_275, %c6_276] : memref<16x16xf32, #tpu.memory_space<vmem>>, vector<1x2xf32>
    tpu.vector_store %arg16[%c10_275, %c6_276], %514 {strides = array<i32>} : memref<16x16xf32, #tpu.memory_space<vmem>>, vector<1x2xf32>,
    %516 = vector.extract_strided_slice %347 {offsets = [4, 10], sizes = [1, 2], strides = [1, 1]} : vector<16x16xf32> to vector<1x2xf32>
    %c10_277 = arith.constant 10 : index
    %c8_278 = arith.constant 8 : index
    %517 = vector.load %arg16[%c10_277, %c8_278] : memref<16x16xf32, #tpu.memory_space<vmem>>, vector<1x2xf32>
    tpu.vector_store %arg16[%c10_277, %c8_278], %516 {strides = array<i32>} : memref<16x16xf32, #tpu.memory_space<vmem>>, vector<1x2xf32>,
    %518 = vector.extract_strided_slice %347 {offsets = [5, 10], sizes = [1, 2], strides = [1, 1]} : vector<16x16xf32> to vector<1x2xf32>
    %c10_279 = arith.constant 10 : index
    %c10_280 = arith.constant 10 : index
    %519 = vector.load %arg16[%c10_279, %c10_280] : memref<16x16xf32, #tpu.memory_space<vmem>>, vector<1x2xf32>
    tpu.vector_store %arg16[%c10_279, %c10_280], %518 {strides = array<i32>} : memref<16x16xf32, #tpu.memory_space<vmem>>, vector<1x2xf32>,
    %520 = vector.extract_strided_slice %347 {offsets = [6, 10], sizes = [1, 2], strides = [1, 1]} : vector<16x16xf32> to vector<1x2xf32>
    %c10_281 = arith.constant 10 : index
    %c12_282 = arith.constant 12 : index
    %521 = vector.load %arg16[%c10_281, %c12_282] : memref<16x16xf32, #tpu.memory_space<vmem>>, vector<1x2xf32>
    tpu.vector_store %arg16[%c10_281, %c12_282], %520 {strides = array<i32>} : memref<16x16xf32, #tpu.memory_space<vmem>>, vector<1x2xf32>,
    %522 = vector.extract_strided_slice %347 {offsets = [7, 10], sizes = [1, 2], strides = [1, 1]} : vector<16x16xf32> to vector<1x2xf32>
    %c10_283 = arith.constant 10 : index
    %c14_284 = arith.constant 14 : index
    %523 = vector.load %arg16[%c10_283, %c14_284] : memref<16x16xf32, #tpu.memory_space<vmem>>, vector<1x2xf32>
    tpu.vector_store %arg16[%c10_283, %c14_284], %522 {strides = array<i32>} : memref<16x16xf32, #tpu.memory_space<vmem>>, vector<1x2xf32>,
    %524 = vector.extract_strided_slice %347 {offsets = [8, 10], sizes = [1, 2], strides = [1, 1]} : vector<16x16xf32> to vector<1x2xf32>
    %c11 = arith.constant 11 : index
    %c0_285 = arith.constant 0 : index
    %525 = vector.load %arg16[%c11, %c0_285] : memref<16x16xf32, #tpu.memory_space<vmem>>, vector<1x2xf32>
    tpu.vector_store %arg16[%c11, %c0_285], %524 {strides = array<i32>} : memref<16x16xf32, #tpu.memory_space<vmem>>, vector<1x2xf32>,
    %526 = vector.extract_strided_slice %347 {offsets = [9, 10], sizes = [1, 2], strides = [1, 1]} : vector<16x16xf32> to vector<1x2xf32>
    %c11_286 = arith.constant 11 : index
    %c2_287 = arith.constant 2 : index
    %527 = vector.load %arg16[%c11_286, %c2_287] : memref<16x16xf32, #tpu.memory_space<vmem>>, vector<1x2xf32>
    tpu.vector_store %arg16[%c11_286, %c2_287], %526 {strides = array<i32>} : memref<16x16xf32, #tpu.memory_space<vmem>>, vector<1x2xf32>,
    %528 = vector.extract_strided_slice %347 {offsets = [10, 10], sizes = [1, 2], strides = [1, 1]} : vector<16x16xf32> to vector<1x2xf32>
    %c11_288 = arith.constant 11 : index
    %c4_289 = arith.constant 4 : index
    %529 = vector.load %arg16[%c11_288, %c4_289] : memref<16x16xf32, #tpu.memory_space<vmem>>, vector<1x2xf32>
    tpu.vector_store %arg16[%c11_288, %c4_289], %528 {strides = array<i32>} : memref<16x16xf32, #tpu.memory_space<vmem>>, vector<1x2xf32>,
    %530 = vector.extract_strided_slice %347 {offsets = [11, 10], sizes = [1, 2], strides = [1, 1]} : vector<16x16xf32> to vector<1x2xf32>
    %c11_290 = arith.constant 11 : index
    %c6_291 = arith.constant 6 : index
    %531 = vector.load %arg16[%c11_290, %c6_291] : memref<16x16xf32, #tpu.memory_space<vmem>>, vector<1x2xf32>
    tpu.vector_store %arg16[%c11_290, %c6_291], %530 {strides = array<i32>} : memref<16x16xf32, #tpu.memory_space<vmem>>, vector<1x2xf32>,
    %532 = vector.extract_strided_slice %347 {offsets = [12, 10], sizes = [1, 2], strides = [1, 1]} : vector<16x16xf32> to vector<1x2xf32>
    %c11_292 = arith.constant 11 : index
    %c8_293 = arith.constant 8 : index
    %533 = vector.load %arg16[%c11_292, %c8_293] : memref<16x16xf32, #tpu.memory_space<vmem>>, vector<1x2xf32>
    tpu.vector_store %arg16[%c11_292, %c8_293], %532 {strides = array<i32>} : memref<16x16xf32, #tpu.memory_space<vmem>>, vector<1x2xf32>,
    %534 = vector.extract_strided_slice %347 {offsets = [13, 10], sizes = [1, 2], strides = [1, 1]} : vector<16x16xf32> to vector<1x2xf32>
    %c11_294 = arith.constant 11 : index
    %c10_295 = arith.constant 10 : index
    %535 = vector.load %arg16[%c11_294, %c10_295] : memref<16x16xf32, #tpu.memory_space<vmem>>, vector<1x2xf32>
    tpu.vector_store %arg16[%c11_294, %c10_295], %534 {strides = array<i32>} : memref<16x16xf32, #tpu.memory_space<vmem>>, vector<1x2xf32>,
    %536 = vector.extract_strided_slice %347 {offsets = [14, 10], sizes = [1, 2], strides = [1, 1]} : vector<16x16xf32> to vector<1x2xf32>
    %c11_296 = arith.constant 11 : index
    %c12_297 = arith.constant 12 : index
    %537 = vector.load %arg16[%c11_296, %c12_297] : memref<16x16xf32, #tpu.memory_space<vmem>>, vector<1x2xf32>
    tpu.vector_store %arg16[%c11_296, %c12_297], %536 {strides = array<i32>} : memref<16x16xf32, #tpu.memory_space<vmem>>, vector<1x2xf32>,
    %538 = vector.extract_strided_slice %347 {offsets = [15, 10], sizes = [1, 2], strides = [1, 1]} : vector<16x16xf32> to vector<1x2xf32>
    %c11_298 = arith.constant 11 : index
    %c14_299 = arith.constant 14 : index
    %539 = vector.load %arg16[%c11_298, %c14_299] : memref<16x16xf32, #tpu.memory_space<vmem>>, vector<1x2xf32>
    tpu.vector_store %arg16[%c11_298, %c14_299], %538 {strides = array<i32>} : memref<16x16xf32, #tpu.memory_space<vmem>>, vector<1x2xf32>,
    %540 = vector.extract_strided_slice %347 {offsets = [0, 12], sizes = [1, 2], strides = [1, 1]} : vector<16x16xf32> to vector<1x2xf32>
    %c12_300 = arith.constant 12 : index
    %c0_301 = arith.constant 0 : index
    %541 = vector.load %arg16[%c12_300, %c0_301] : memref<16x16xf32, #tpu.memory_space<vmem>>, vector<1x2xf32>
    tpu.vector_store %arg16[%c12_300, %c0_301], %540 {strides = array<i32>} : memref<16x16xf32, #tpu.memory_space<vmem>>, vector<1x2xf32>,
    %542 = vector.extract_strided_slice %347 {offsets = [1, 12], sizes = [1, 2], strides = [1, 1]} : vector<16x16xf32> to vector<1x2xf32>
    %c12_302 = arith.constant 12 : index
    %c2_303 = arith.constant 2 : index
    %543 = vector.load %arg16[%c12_302, %c2_303] : memref<16x16xf32, #tpu.memory_space<vmem>>, vector<1x2xf32>
    tpu.vector_store %arg16[%c12_302, %c2_303], %542 {strides = array<i32>} : memref<16x16xf32, #tpu.memory_space<vmem>>, vector<1x2xf32>,
    %544 = vector.extract_strided_slice %347 {offsets = [2, 12], sizes = [1, 2], strides = [1, 1]} : vector<16x16xf32> to vector<1x2xf32>
    %c12_304 = arith.constant 12 : index
    %c4_305 = arith.constant 4 : index
    %545 = vector.load %arg16[%c12_304, %c4_305] : memref<16x16xf32, #tpu.memory_space<vmem>>, vector<1x2xf32>
    tpu.vector_store %arg16[%c12_304, %c4_305], %544 {strides = array<i32>} : memref<16x16xf32, #tpu.memory_space<vmem>>, vector<1x2xf32>,
    %546 = vector.extract_strided_slice %347 {offsets = [3, 12], sizes = [1, 2], strides = [1, 1]} : vector<16x16xf32> to vector<1x2xf32>
    %c12_306 = arith.constant 12 : index
    %c6_307 = arith.constant 6 : index
    %547 = vector.load %arg16[%c12_306, %c6_307] : memref<16x16xf32, #tpu.memory_space<vmem>>, vector<1x2xf32>
    tpu.vector_store %arg16[%c12_306, %c6_307], %546 {strides = array<i32>} : memref<16x16xf32, #tpu.memory_space<vmem>>, vector<1x2xf32>,
    %548 = vector.extract_strided_slice %347 {offsets = [4, 12], sizes = [1, 2], strides = [1, 1]} : vector<16x16xf32> to vector<1x2xf32>
    %c12_308 = arith.constant 12 : index
    %c8_309 = arith.constant 8 : index
    %549 = vector.load %arg16[%c12_308, %c8_309] : memref<16x16xf32, #tpu.memory_space<vmem>>, vector<1x2xf32>
    tpu.vector_store %arg16[%c12_308, %c8_309], %548 {strides = array<i32>} : memref<16x16xf32, #tpu.memory_space<vmem>>, vector<1x2xf32>,
    %550 = vector.extract_strided_slice %347 {offsets = [5, 12], sizes = [1, 2], strides = [1, 1]} : vector<16x16xf32> to vector<1x2xf32>
    %c12_310 = arith.constant 12 : index
    %c10_311 = arith.constant 10 : index
    %551 = vector.load %arg16[%c12_310, %c10_311] : memref<16x16xf32, #tpu.memory_space<vmem>>, vector<1x2xf32>
    tpu.vector_store %arg16[%c12_310, %c10_311], %550 {strides = array<i32>} : memref<16x16xf32, #tpu.memory_space<vmem>>, vector<1x2xf32>,
    %552 = vector.extract_strided_slice %347 {offsets = [6, 12], sizes = [1, 2], strides = [1, 1]} : vector<16x16xf32> to vector<1x2xf32>
    %c12_312 = arith.constant 12 : index
    %c12_313 = arith.constant 12 : index
    %553 = vector.load %arg16[%c12_312, %c12_313] : memref<16x16xf32, #tpu.memory_space<vmem>>, vector<1x2xf32>
    tpu.vector_store %arg16[%c12_312, %c12_313], %552 {strides = array<i32>} : memref<16x16xf32, #tpu.memory_space<vmem>>, vector<1x2xf32>,
    %554 = vector.extract_strided_slice %347 {offsets = [7, 12], sizes = [1, 2], strides = [1, 1]} : vector<16x16xf32> to vector<1x2xf32>
    %c12_314 = arith.constant 12 : index
    %c14_315 = arith.constant 14 : index
    %555 = vector.load %arg16[%c12_314, %c14_315] : memref<16x16xf32, #tpu.memory_space<vmem>>, vector<1x2xf32>
    tpu.vector_store %arg16[%c12_314, %c14_315], %554 {strides = array<i32>} : memref<16x16xf32, #tpu.memory_space<vmem>>, vector<1x2xf32>,
    %556 = vector.extract_strided_slice %347 {offsets = [8, 12], sizes = [1, 2], strides = [1, 1]} : vector<16x16xf32> to vector<1x2xf32>
    %c13 = arith.constant 13 : index
    %c0_316 = arith.constant 0 : index
    %557 = vector.load %arg16[%c13, %c0_316] : memref<16x16xf32, #tpu.memory_space<vmem>>, vector<1x2xf32>
    tpu.vector_store %arg16[%c13, %c0_316], %556 {strides = array<i32>} : memref<16x16xf32, #tpu.memory_space<vmem>>, vector<1x2xf32>,
    %558 = vector.extract_strided_slice %347 {offsets = [9, 12], sizes = [1, 2], strides = [1, 1]} : vector<16x16xf32> to vector<1x2xf32>
    %c13_317 = arith.constant 13 : index
    %c2_318 = arith.constant 2 : index
    %559 = vector.load %arg16[%c13_317, %c2_318] : memref<16x16xf32, #tpu.memory_space<vmem>>, vector<1x2xf32>
    tpu.vector_store %arg16[%c13_317, %c2_318], %558 {strides = array<i32>} : memref<16x16xf32, #tpu.memory_space<vmem>>, vector<1x2xf32>,
    %560 = vector.extract_strided_slice %347 {offsets = [10, 12], sizes = [1, 2], strides = [1, 1]} : vector<16x16xf32> to vector<1x2xf32>
    %c13_319 = arith.constant 13 : index
    %c4_320 = arith.constant 4 : index
    %561 = vector.load %arg16[%c13_319, %c4_320] : memref<16x16xf32, #tpu.memory_space<vmem>>, vector<1x2xf32>
    tpu.vector_store %arg16[%c13_319, %c4_320], %560 {strides = array<i32>} : memref<16x16xf32, #tpu.memory_space<vmem>>, vector<1x2xf32>,
    %562 = vector.extract_strided_slice %347 {offsets = [11, 12], sizes = [1, 2], strides = [1, 1]} : vector<16x16xf32> to vector<1x2xf32>
    %c13_321 = arith.constant 13 : index
    %c6_322 = arith.constant 6 : index
    %563 = vector.load %arg16[%c13_321, %c6_322] : memref<16x16xf32, #tpu.memory_space<vmem>>, vector<1x2xf32>
    tpu.vector_store %arg16[%c13_321, %c6_322], %562 {strides = array<i32>} : memref<16x16xf32, #tpu.memory_space<vmem>>, vector<1x2xf32>,
    %564 = vector.extract_strided_slice %347 {offsets = [12, 12], sizes = [1, 2], strides = [1, 1]} : vector<16x16xf32> to vector<1x2xf32>
    %c13_323 = arith.constant 13 : index
    %c8_324 = arith.constant 8 : index
    %565 = vector.load %arg16[%c13_323, %c8_324] : memref<16x16xf32, #tpu.memory_space<vmem>>, vector<1x2xf32>
    tpu.vector_store %arg16[%c13_323, %c8_324], %564 {strides = array<i32>} : memref<16x16xf32, #tpu.memory_space<vmem>>, vector<1x2xf32>,
    %566 = vector.extract_strided_slice %347 {offsets = [13, 12], sizes = [1, 2], strides = [1, 1]} : vector<16x16xf32> to vector<1x2xf32>
    %c13_325 = arith.constant 13 : index
    %c10_326 = arith.constant 10 : index
    %567 = vector.load %arg16[%c13_325, %c10_326] : memref<16x16xf32, #tpu.memory_space<vmem>>, vector<1x2xf32>
    tpu.vector_store %arg16[%c13_325, %c10_326], %566 {strides = array<i32>} : memref<16x16xf32, #tpu.memory_space<vmem>>, vector<1x2xf32>,
    %568 = vector.extract_strided_slice %347 {offsets = [14, 12], sizes = [1, 2], strides = [1, 1]} : vector<16x16xf32> to vector<1x2xf32>
    %c13_327 = arith.constant 13 : index
    %c12_328 = arith.constant 12 : index
    %569 = vector.load %arg16[%c13_327, %c12_328] : memref<16x16xf32, #tpu.memory_space<vmem>>, vector<1x2xf32>
    tpu.vector_store %arg16[%c13_327, %c12_328], %568 {strides = array<i32>} : memref<16x16xf32, #tpu.memory_space<vmem>>, vector<1x2xf32>,
    %570 = vector.extract_strided_slice %347 {offsets = [15, 12], sizes = [1, 2], strides = [1, 1]} : vector<16x16xf32> to vector<1x2xf32>
    %c13_329 = arith.constant 13 : index
    %c14_330 = arith.constant 14 : index
    %571 = vector.load %arg16[%c13_329, %c14_330] : memref<16x16xf32, #tpu.memory_space<vmem>>, vector<1x2xf32>
    tpu.vector_store %arg16[%c13_329, %c14_330], %570 {strides = array<i32>} : memref<16x16xf32, #tpu.memory_space<vmem>>, vector<1x2xf32>,
    %572 = vector.extract_strided_slice %347 {offsets = [0, 14], sizes = [1, 2], strides = [1, 1]} : vector<16x16xf32> to vector<1x2xf32>
    %c14_331 = arith.constant 14 : index
    %c0_332 = arith.constant 0 : index
    %573 = vector.load %arg16[%c14_331, %c0_332] : memref<16x16xf32, #tpu.memory_space<vmem>>, vector<1x2xf32>
    tpu.vector_store %arg16[%c14_331, %c0_332], %572 {strides = array<i32>} : memref<16x16xf32, #tpu.memory_space<vmem>>, vector<1x2xf32>,
    %574 = vector.extract_strided_slice %347 {offsets = [1, 14], sizes = [1, 2], strides = [1, 1]} : vector<16x16xf32> to vector<1x2xf32>
    %c14_333 = arith.constant 14 : index
    %c2_334 = arith.constant 2 : index
    %575 = vector.load %arg16[%c14_333, %c2_334] : memref<16x16xf32, #tpu.memory_space<vmem>>, vector<1x2xf32>
    tpu.vector_store %arg16[%c14_333, %c2_334], %574 {strides = array<i32>} : memref<16x16xf32, #tpu.memory_space<vmem>>, vector<1x2xf32>,
    %576 = vector.extract_strided_slice %347 {offsets = [2, 14], sizes = [1, 2], strides = [1, 1]} : vector<16x16xf32> to vector<1x2xf32>
    %c14_335 = arith.constant 14 : index
    %c4_336 = arith.constant 4 : index
    %577 = vector.load %arg16[%c14_335, %c4_336] : memref<16x16xf32, #tpu.memory_space<vmem>>, vector<1x2xf32>
    tpu.vector_store %arg16[%c14_335, %c4_336], %576 {strides = array<i32>} : memref<16x16xf32, #tpu.memory_space<vmem>>, vector<1x2xf32>,
    %578 = vector.extract_strided_slice %347 {offsets = [3, 14], sizes = [1, 2], strides = [1, 1]} : vector<16x16xf32> to vector<1x2xf32>
    %c14_337 = arith.constant 14 : index
    %c6_338 = arith.constant 6 : index
    %579 = vector.load %arg16[%c14_337, %c6_338] : memref<16x16xf32, #tpu.memory_space<vmem>>, vector<1x2xf32>
    tpu.vector_store %arg16[%c14_337, %c6_338], %578 {strides = array<i32>} : memref<16x16xf32, #tpu.memory_space<vmem>>, vector<1x2xf32>,
    %580 = vector.extract_strided_slice %347 {offsets = [4, 14], sizes = [1, 2], strides = [1, 1]} : vector<16x16xf32> to vector<1x2xf32>
    %c14_339 = arith.constant 14 : index
    %c8_340 = arith.constant 8 : index
    %581 = vector.load %arg16[%c14_339, %c8_340] : memref<16x16xf32, #tpu.memory_space<vmem>>, vector<1x2xf32>
    tpu.vector_store %arg16[%c14_339, %c8_340], %580 {strides = array<i32>} : memref<16x16xf32, #tpu.memory_space<vmem>>, vector<1x2xf32>,
    %582 = vector.extract_strided_slice %347 {offsets = [5, 14], sizes = [1, 2], strides = [1, 1]} : vector<16x16xf32> to vector<1x2xf32>
    %c14_341 = arith.constant 14 : index
    %c10_342 = arith.constant 10 : index
    %583 = vector.load %arg16[%c14_341, %c10_342] : memref<16x16xf32, #tpu.memory_space<vmem>>, vector<1x2xf32>
    tpu.vector_store %arg16[%c14_341, %c10_342], %582 {strides = array<i32>} : memref<16x16xf32, #tpu.memory_space<vmem>>, vector<1x2xf32>,
    %584 = vector.extract_strided_slice %347 {offsets = [6, 14], sizes = [1, 2], strides = [1, 1]} : vector<16x16xf32> to vector<1x2xf32>
    %c14_343 = arith.constant 14 : index
    %c12_344 = arith.constant 12 : index
    %585 = vector.load %arg16[%c14_343, %c12_344] : memref<16x16xf32, #tpu.memory_space<vmem>>, vector<1x2xf32>
    tpu.vector_store %arg16[%c14_343, %c12_344], %584 {strides = array<i32>} : memref<16x16xf32, #tpu.memory_space<vmem>>, vector<1x2xf32>,
    %586 = vector.extract_strided_slice %347 {offsets = [7, 14], sizes = [1, 2], strides = [1, 1]} : vector<16x16xf32> to vector<1x2xf32>
    %c14_345 = arith.constant 14 : index
    %c14_346 = arith.constant 14 : index
    %587 = vector.load %arg16[%c14_345, %c14_346] : memref<16x16xf32, #tpu.memory_space<vmem>>, vector<1x2xf32>
    tpu.vector_store %arg16[%c14_345, %c14_346], %586 {strides = array<i32>} : memref<16x16xf32, #tpu.memory_space<vmem>>, vector<1x2xf32>,
    %588 = vector.extract_strided_slice %347 {offsets = [8, 14], sizes = [1, 2], strides = [1, 1]} : vector<16x16xf32> to vector<1x2xf32>
    %c15 = arith.constant 15 : index
    %c0_347 = arith.constant 0 : index
    %589 = vector.load %arg16[%c15, %c0_347] : memref<16x16xf32, #tpu.memory_space<vmem>>, vector<1x2xf32>
    tpu.vector_store %arg16[%c15, %c0_347], %588 {strides = array<i32>} : memref<16x16xf32, #tpu.memory_space<vmem>>, vector<1x2xf32>,
    %590 = vector.extract_strided_slice %347 {offsets = [9, 14], sizes = [1, 2], strides = [1, 1]} : vector<16x16xf32> to vector<1x2xf32>
    %c15_348 = arith.constant 15 : index
    %c2_349 = arith.constant 2 : index
    %591 = vector.load %arg16[%c15_348, %c2_349] : memref<16x16xf32, #tpu.memory_space<vmem>>, vector<1x2xf32>
    tpu.vector_store %arg16[%c15_348, %c2_349], %590 {strides = array<i32>} : memref<16x16xf32, #tpu.memory_space<vmem>>, vector<1x2xf32>,
    %592 = vector.extract_strided_slice %347 {offsets = [10, 14], sizes = [1, 2], strides = [1, 1]} : vector<16x16xf32> to vector<1x2xf32>
    %c15_350 = arith.constant 15 : index
    %c4_351 = arith.constant 4 : index
    %593 = vector.load %arg16[%c15_350, %c4_351] : memref<16x16xf32, #tpu.memory_space<vmem>>, vector<1x2xf32>
    tpu.vector_store %arg16[%c15_350, %c4_351], %592 {strides = array<i32>} : memref<16x16xf32, #tpu.memory_space<vmem>>, vector<1x2xf32>,
    %594 = vector.extract_strided_slice %347 {offsets = [11, 14], sizes = [1, 2], strides = [1, 1]} : vector<16x16xf32> to vector<1x2xf32>
    %c15_352 = arith.constant 15 : index
    %c6_353 = arith.constant 6 : index
    %595 = vector.load %arg16[%c15_352, %c6_353] : memref<16x16xf32, #tpu.memory_space<vmem>>, vector<1x2xf32>
    tpu.vector_store %arg16[%c15_352, %c6_353], %594 {strides = array<i32>} : memref<16x16xf32, #tpu.memory_space<vmem>>, vector<1x2xf32>,
    %596 = vector.extract_strided_slice %347 {offsets = [12, 14], sizes = [1, 2], strides = [1, 1]} : vector<16x16xf32> to vector<1x2xf32>
    %c15_354 = arith.constant 15 : index
    %c8_355 = arith.constant 8 : index
    %597 = vector.load %arg16[%c15_354, %c8_355] : memref<16x16xf32, #tpu.memory_space<vmem>>, vector<1x2xf32>
    tpu.vector_store %arg16[%c15_354, %c8_355], %596 {strides = array<i32>} : memref<16x16xf32, #tpu.memory_space<vmem>>, vector<1x2xf32>,
    %598 = vector.extract_strided_slice %347 {offsets = [13, 14], sizes = [1, 2], strides = [1, 1]} : vector<16x16xf32> to vector<1x2xf32>
    %c15_356 = arith.constant 15 : index
    %c10_357 = arith.constant 10 : index
    %599 = vector.load %arg16[%c15_356, %c10_357] : memref<16x16xf32, #tpu.memory_space<vmem>>, vector<1x2xf32>
    tpu.vector_store %arg16[%c15_356, %c10_357], %598 {strides = array<i32>} : memref<16x16xf32, #tpu.memory_space<vmem>>, vector<1x2xf32>,
    %600 = vector.extract_strided_slice %347 {offsets = [14, 14], sizes = [1, 2], strides = [1, 1]} : vector<16x16xf32> to vector<1x2xf32>
    %c15_358 = arith.constant 15 : index
    %c12_359 = arith.constant 12 : index
    %601 = vector.load %arg16[%c15_358, %c12_359] : memref<16x16xf32, #tpu.memory_space<vmem>>, vector<1x2xf32>
    tpu.vector_store %arg16[%c15_358, %c12_359], %600 {strides = array<i32>} : memref<16x16xf32, #tpu.memory_space<vmem>>, vector<1x2xf32>,
    %602 = vector.extract_strided_slice %347 {offsets = [15, 14], sizes = [1, 2], strides = [1, 1]} : vector<16x16xf32> to vector<1x2xf32>
    %c15_360 = arith.constant 15 : index
    %c14_361 = arith.constant 14 : index
    %603 = vector.load %arg16[%c15_360, %c14_361] : memref<16x16xf32, #tpu.memory_space<vmem>>, vector<1x2xf32>
    tpu.vector_store %arg16[%c15_360, %c14_361], %602 {strides = array<i32>} : memref<16x16xf32, #tpu.memory_space<vmem>>, vector<1x2xf32>,
    %c0_362 = arith.constant 0 : index
    %c0_363 = arith.constant 0 : index
    %604 = vector.load %arg16[%c0_362, %c0_363] : memref<16x16xf32, #tpu.memory_space<vmem>>, vector<16x16xf32>
    %c0_364 = arith.constant 0 : index
    %c0_365 = arith.constant 0 : index
    %605 = vector.load %arg9[%c0_364, %c0_365] : memref<32x16xbf16, #tpu.memory_space<vmem>>, vector<32x16xbf16>
    %606 = arith.truncf %604 : vector<16x16xf32> to vector<16x16xbf16>
    %cst_366 = arith.constant dense<0.000000e+00> : vector<32x16xf32>
    %607 = tpu.matmul %605, %606, %cst_366 {dimension_numbers = #tpu.dot_dimension_numbers<[1], [0], [0], [1], [0, 0, 1, 1], [], []>} : vector<32x16xbf16>, vector<16x16xbf16>, vector<32x16xf32> -> vector<32x16xf32>
    %c0_367 = arith.constant 0 : index
    %c0_368 = arith.constant 0 : index
    %608 = vector.load %arg10[%c0_367, %c0_368] : memref<32x1xf32, #tpu.memory_space<vmem>>, vector<32x1xf32>
    %609 = vector.broadcast %608 : vector<32x1xf32> to vector<32x16xf32>
    %610 = arith.addf %607, %609 : vector<32x16xf32>
    %cst_369 = arith.constant 0.000000e+00 : f32
    %611 = vector.broadcast %cst_369 : f32 to vector<32x16xf32>
    %612 = arith.maximumf %610, %611 : vector<32x16xf32>
    %613 = arith.truncf %612 : vector<32x16xf32> to vector<32x16xbf16>
    %cst_370 = arith.constant 0.000000e+00 : f32
    %614 = vector.broadcast %cst_370 : f32 to vector<64x2xf32>
    %c0_371 = arith.constant 0 : index
    %c0_372 = arith.constant 0 : index
    %c0_373 = arith.constant 0 : index
    %615 = vector.load %arg11[%c0_371, %c0_372, %c0_373] : memref<8x64x32xbf16, #tpu.memory_space<vmem>>, vector<1x64x32xbf16>
    %616 = vector.shape_cast %615 : vector<1x64x32xbf16> to vector<64x32xbf16>
    %617 = vector.extract_strided_slice %613 {offsets = [0, 0], sizes = [32, 2], strides = [1, 1]} : vector<32x16xbf16> to vector<32x2xbf16>
    %cst_374 = arith.constant dense<0.000000e+00> : vector<64x2xf32>
    %618 = tpu.matmul %616, %617, %cst_374 {dimension_numbers = #tpu.dot_dimension_numbers<[1], [0], [0], [1], [0, 0, 1, 1], [], []>} : vector<64x32xbf16>, vector<32x2xbf16>, vector<64x2xf32> -> vector<64x2xf32>
    %619 = arith.addf %614, %618 : vector<64x2xf32>
    %c1_375 = arith.constant 1 : index
    %c0_376 = arith.constant 0 : index
    %c0_377 = arith.constant 0 : index
    %620 = vector.load %arg11[%c1_375, %c0_376, %c0_377] : memref<8x64x32xbf16, #tpu.memory_space<vmem>>, vector<1x64x32xbf16>
    %621 = vector.shape_cast %620 : vector<1x64x32xbf16> to vector<64x32xbf16>
    %622 = vector.extract_strided_slice %613 {offsets = [0, 2], sizes = [32, 2], strides = [1, 1]} : vector<32x16xbf16> to vector<32x2xbf16>
    %cst_378 = arith.constant dense<0.000000e+00> : vector<64x2xf32>
    %623 = tpu.matmul %621, %622, %cst_378 {dimension_numbers = #tpu.dot_dimension_numbers<[1], [0], [0], [1], [0, 0, 1, 1], [], []>} : vector<64x32xbf16>, vector<32x2xbf16>, vector<64x2xf32> -> vector<64x2xf32>
    %624 = arith.addf %619, %623 : vector<64x2xf32>
    %c2_379 = arith.constant 2 : index
    %c0_380 = arith.constant 0 : index
    %c0_381 = arith.constant 0 : index
    %625 = vector.load %arg11[%c2_379, %c0_380, %c0_381] : memref<8x64x32xbf16, #tpu.memory_space<vmem>>, vector<1x64x32xbf16>
    %626 = vector.shape_cast %625 : vector<1x64x32xbf16> to vector<64x32xbf16>
    %627 = vector.extract_strided_slice %613 {offsets = [0, 4], sizes = [32, 2], strides = [1, 1]} : vector<32x16xbf16> to vector<32x2xbf16>
    %cst_382 = arith.constant dense<0.000000e+00> : vector<64x2xf32>
    %628 = tpu.matmul %626, %627, %cst_382 {dimension_numbers = #tpu.dot_dimension_numbers<[1], [0], [0], [1], [0, 0, 1, 1], [], []>} : vector<64x32xbf16>, vector<32x2xbf16>, vector<64x2xf32> -> vector<64x2xf32>
    %629 = arith.addf %624, %628 : vector<64x2xf32>
    %c3_383 = arith.constant 3 : index
    %c0_384 = arith.constant 0 : index
    %c0_385 = arith.constant 0 : index
    %630 = vector.load %arg11[%c3_383, %c0_384, %c0_385] : memref<8x64x32xbf16, #tpu.memory_space<vmem>>, vector<1x64x32xbf16>
    %631 = vector.shape_cast %630 : vector<1x64x32xbf16> to vector<64x32xbf16>
    %632 = vector.extract_strided_slice %613 {offsets = [0, 6], sizes = [32, 2], strides = [1, 1]} : vector<32x16xbf16> to vector<32x2xbf16>
    %cst_386 = arith.constant dense<0.000000e+00> : vector<64x2xf32>
    %633 = tpu.matmul %631, %632, %cst_386 {dimension_numbers = #tpu.dot_dimension_numbers<[1], [0], [0], [1], [0, 0, 1, 1], [], []>} : vector<64x32xbf16>, vector<32x2xbf16>, vector<64x2xf32> -> vector<64x2xf32>
    %634 = arith.addf %629, %633 : vector<64x2xf32>
    %c4_387 = arith.constant 4 : index
    %c0_388 = arith.constant 0 : index
    %c0_389 = arith.constant 0 : index
    %635 = vector.load %arg11[%c4_387, %c0_388, %c0_389] : memref<8x64x32xbf16, #tpu.memory_space<vmem>>, vector<1x64x32xbf16>
    %636 = vector.shape_cast %635 : vector<1x64x32xbf16> to vector<64x32xbf16>
    %637 = vector.extract_strided_slice %613 {offsets = [0, 8], sizes = [32, 2], strides = [1, 1]} : vector<32x16xbf16> to vector<32x2xbf16>
    %cst_390 = arith.constant dense<0.000000e+00> : vector<64x2xf32>
    %638 = tpu.matmul %636, %637, %cst_390 {dimension_numbers = #tpu.dot_dimension_numbers<[1], [0], [0], [1], [0, 0, 1, 1], [], []>} : vector<64x32xbf16>, vector<32x2xbf16>, vector<64x2xf32> -> vector<64x2xf32>
    %639 = arith.addf %634, %638 : vector<64x2xf32>
    %c5_391 = arith.constant 5 : index
    %c0_392 = arith.constant 0 : index
    %c0_393 = arith.constant 0 : index
    %640 = vector.load %arg11[%c5_391, %c0_392, %c0_393] : memref<8x64x32xbf16, #tpu.memory_space<vmem>>, vector<1x64x32xbf16>
    %641 = vector.shape_cast %640 : vector<1x64x32xbf16> to vector<64x32xbf16>
    %642 = vector.extract_strided_slice %613 {offsets = [0, 10], sizes = [32, 2], strides = [1, 1]} : vector<32x16xbf16> to vector<32x2xbf16>
    %cst_394 = arith.constant dense<0.000000e+00> : vector<64x2xf32>
    %643 = tpu.matmul %641, %642, %cst_394 {dimension_numbers = #tpu.dot_dimension_numbers<[1], [0], [0], [1], [0, 0, 1, 1], [], []>} : vector<64x32xbf16>, vector<32x2xbf16>, vector<64x2xf32> -> vector<64x2xf32>
    %644 = arith.addf %639, %643 : vector<64x2xf32>
    %c6_395 = arith.constant 6 : index
    %c0_396 = arith.constant 0 : index
    %c0_397 = arith.constant 0 : index
    %645 = vector.load %arg11[%c6_395, %c0_396, %c0_397] : memref<8x64x32xbf16, #tpu.memory_space<vmem>>, vector<1x64x32xbf16>
    %646 = vector.shape_cast %645 : vector<1x64x32xbf16> to vector<64x32xbf16>
    %647 = vector.extract_strided_slice %613 {offsets = [0, 12], sizes = [32, 2], strides = [1, 1]} : vector<32x16xbf16> to vector<32x2xbf16>
    %cst_398 = arith.constant dense<0.000000e+00> : vector<64x2xf32>
    %648 = tpu.matmul %646, %647, %cst_398 {dimension_numbers = #tpu.dot_dimension_numbers<[1], [0], [0], [1], [0, 0, 1, 1], [], []>} : vector<64x32xbf16>, vector<32x2xbf16>, vector<64x2xf32> -> vector<64x2xf32>
    %649 = arith.addf %644, %648 : vector<64x2xf32>
    %c7_399 = arith.constant 7 : index
    %c0_400 = arith.constant 0 : index
    %c0_401 = arith.constant 0 : index
    %650 = vector.load %arg11[%c7_399, %c0_400, %c0_401] : memref<8x64x32xbf16, #tpu.memory_space<vmem>>, vector<1x64x32xbf16>
    %651 = vector.shape_cast %650 : vector<1x64x32xbf16> to vector<64x32xbf16>
    %652 = vector.extract_strided_slice %613 {offsets = [0, 14], sizes = [32, 2], strides = [1, 1]} : vector<32x16xbf16> to vector<32x2xbf16>
    %cst_402 = arith.constant dense<0.000000e+00> : vector<64x2xf32>
    %653 = tpu.matmul %651, %652, %cst_402 {dimension_numbers = #tpu.dot_dimension_numbers<[1], [0], [0], [1], [0, 0, 1, 1], [], []>} : vector<64x32xbf16>, vector<32x2xbf16>, vector<64x2xf32> -> vector<64x2xf32>
    %654 = arith.addf %649, %653 : vector<64x2xf32>
    %c0_403 = arith.constant 0 : index
    %c0_404 = arith.constant 0 : index
    %655 = vector.load %arg12[%c0_403, %c0_404] : memref<64x1xf32, #tpu.memory_space<vmem>>, vector<64x1xf32>
    %656 = vector.broadcast %655 : vector<64x1xf32> to vector<64x2xf32>
    %657 = arith.addf %654, %656 : vector<64x2xf32>
    %cst_405 = arith.constant 0.000000e+00 : f32
    %658 = vector.broadcast %cst_405 : f32 to vector<64x2xf32>
    %659 = arith.maximumf %657, %658 : vector<64x2xf32>
    %c0_406 = arith.constant 0 : index
    %c0_407 = arith.constant 0 : index
    %660 = vector.load %arg13[%c0_406, %c0_407] : memref<8x64xf32, #tpu.memory_space<vmem>>, vector<8x64xf32>
    %cst_408 = arith.constant dense<0.000000e+00> : vector<8x2xf32>
    %661 = tpu.matmul %660, %659, %cst_408 {dimension_numbers = #tpu.dot_dimension_numbers<[1], [0], [0], [1], [0, 0, 1, 1], [], []>} : vector<8x64xf32>, vector<64x2xf32>, vector<8x2xf32> -> vector<8x2xf32>
    %c0_409 = arith.constant 0 : index
    %c0_410 = arith.constant 0 : index
    %662 = vector.load %arg14[%c0_409, %c0_410] : memref<8x1xf32, #tpu.memory_space<vmem>>, vector<8x1xf32>
    %663 = vector.broadcast %662 : vector<8x1xf32> to vector<8x2xf32>
    %664 = arith.addf %661, %663 : vector<8x2xf32>
    %cst_411 = arith.constant dense<0xFF800000> : vector<2xf32>
    %665 = vector.multi_reduction <maximumf>, %664, %cst_411 [0] : vector<8x2xf32> to vector<2xf32>
    %666 = vector.shape_cast %665 : vector<2xf32> to vector<1x2xf32>
    %667 = vector.broadcast %666 : vector<1x2xf32> to vector<8x2xf32>
    %668 = arith.subf %664, %667 : vector<8x2xf32>
    %669 = math.exp %668 : vector<8x2xf32>
    %cst_412 = arith.constant dense<0.000000e+00> : vector<2xf32>
    %670 = vector.multi_reduction <add>, %669, %cst_412 [0] : vector<8x2xf32> to vector<2xf32>
    %671 = vector.shape_cast %670 : vector<2xf32> to vector<1x2xf32>
    %672 = vector.broadcast %671 : vector<1x2xf32> to vector<8x2xf32>
    %673 = arith.divf %669, %672 : vector<8x2xf32>
    %cst_413 = arith.constant 1.000000e+00 : f32
    %674 = vector.broadcast %cst_413 : f32 to vector<8x2xf32>
    %675 = arith.mulf %673, %674 : vector<8x2xf32>
    %c0_414 = arith.constant 0 : index
    %c0_415 = arith.constant 0 : index
    %c0_416 = arith.constant 0 : index
    %676 = vector.load %arg15[%c0_414, %c0_415, %c0_416] : memref<1x8x2xf32, #tpu.memory_space<vmem>>, vector<1x8x2xf32>
    %677 = vector.shape_cast %676 : vector<1x8x2xf32> to vector<8x2xf32>
    %678 = vector.shape_cast %675 : vector<8x2xf32> to vector<1x8x2xf32>
    tpu.vector_store %arg15[%c0_414, %c0_415, %c0_416], %678 {strides = array<i32>} : memref<1x8x2xf32, #tpu.memory_space<vmem>>, vector<1x8x2xf32>,
    return
  }
  func.func @transform_0(%arg0: i32) -> (i32, i32, i32) {
    %c0_i32 = arith.constant 0 : i32
    %c0_i32_0 = arith.constant 0 : i32
    %c0_i32_1 = arith.constant 0 : i32
    return %arg0, %c0_i32, %c0_i32_0 : i32, i32, i32
  }
  func.func @transform_1(%arg0: i32) -> (i32, i32, i32) {
    %c0_i32 = arith.constant 0 : i32
    %c0_i32_0 = arith.constant 0 : i32
    %c0_i32_1 = arith.constant 0 : i32
    return %arg0, %c0_i32, %c0_i32_0 : i32, i32, i32
  }
  func.func @transform_2(%arg0: i32) -> (i32, i32) {
    %c0_i32 = arith.constant 0 : i32
    %c0_i32_0 = arith.constant 0 : i32
    %c0_i32_1 = arith.constant 0 : i32
    return %c0_i32, %c0_i32_0 : i32, i32
  }
  func.func @transform_3(%arg0: i32) -> (i32, i32) {
    %c0_i32 = arith.constant 0 : i32
    %c0_i32_0 = arith.constant 0 : i32
    %c0_i32_1 = arith.constant 0 : i32
    return %c0_i32, %c0_i32_0 : i32, i32
  }
  func.func @transform_4(%arg0: i32) -> (i32, i32) {
    %c0_i32 = arith.constant 0 : i32
    %c0_i32_0 = arith.constant 0 : i32
    %c0_i32_1 = arith.constant 0 : i32
    return %c0_i32, %c0_i32_0 : i32, i32
  }
  func.func @transform_5(%arg0: i32) -> (i32, i32) {
    %c0_i32 = arith.constant 0 : i32
    %c0_i32_0 = arith.constant 0 : i32
    %c0_i32_1 = arith.constant 0 : i32
    return %c0_i32, %c0_i32_0 : i32, i32
  }
  func.func @transform_6(%arg0: i32) -> (i32, i32) {
    %c0_i32 = arith.constant 0 : i32
    %c0_i32_0 = arith.constant 0 : i32
    %c0_i32_1 = arith.constant 0 : i32
    return %c0_i32, %c0_i32_0 : i32, i32
  }
  func.func @transform_7(%arg0: i32) -> (i32, i32) {
    %c0_i32 = arith.constant 0 : i32
    %c0_i32_0 = arith.constant 0 : i32
    %c0_i32_1 = arith.constant 0 : i32
    return %c0_i32, %c0_i32_0 : i32, i32
  }
  func.func @transform_8(%arg0: i32) -> (i32, i32) {
    %c0_i32 = arith.constant 0 : i32
    %c0_i32_0 = arith.constant 0 : i32
    %c0_i32_1 = arith.constant 0 : i32
    return %c0_i32, %c0_i32_0 : i32, i32
  }
  func.func @transform_9(%arg0: i32) -> (i32, i32) {
    %c0_i32 = arith.constant 0 : i32
    %c0_i32_0 = arith.constant 0 : i32
    %c0_i32_1 = arith.constant 0 : i32
    return %c0_i32, %c0_i32_0 : i32, i32
  }
  func.func @transform_10(%arg0: i32) -> (i32, i32, i32) {
    %c0_i32 = arith.constant 0 : i32
    %c0_i32_0 = arith.constant 0 : i32
    %c0_i32_1 = arith.constant 0 : i32
    %c0_i32_2 = arith.constant 0 : i32
    return %c0_i32, %c0_i32_0, %c0_i32_1 : i32, i32, i32
  }
  func.func @transform_11(%arg0: i32) -> (i32, i32) {
    %c0_i32 = arith.constant 0 : i32
    %c0_i32_0 = arith.constant 0 : i32
    %c0_i32_1 = arith.constant 0 : i32
    return %c0_i32, %c0_i32_0 : i32, i32
  }
  func.func @transform_12(%arg0: i32) -> (i32, i32) {
    %c0_i32 = arith.constant 0 : i32
    %c0_i32_0 = arith.constant 0 : i32
    %c0_i32_1 = arith.constant 0 : i32
    return %c0_i32, %c0_i32_0 : i32, i32
  }
  func.func @transform_13(%arg0: i32) -> (i32, i32) {
    %c0_i32 = arith.constant 0 : i32
    %c0_i32_0 = arith.constant 0 : i32
    %c0_i32_1 = arith.constant 0 : i32
    return %c0_i32, %c0_i32_0 : i32, i32
  }
  func.func @transform_14(%arg0: i32) -> (i32, i32, i32) {
    %c0_i32 = arith.constant 0 : i32
    %c0_i32_0 = arith.constant 0 : i32
    %c0_i32_1 = arith.constant 0 : i32
    return %arg0, %c0_i32, %c0_i32_0 : i32, i32, i32
  }
}

</mosaic_0001>

<bundles_post_ra>
// kernel: stock_actor_pvm_forward.1
= control target key start
LH: loop header
LB: loop body
LE: loop exit
PB: predicated region body
PF: predicated region fallthrough
CT: control target
= control target key end

     0   :  { %v4617_v0 = vmov 0   ;;  %vm333_vm0 = vcmask 261120   ;;  %vm4619_vm1 = vmmov 0   ;;  %vm2073_vm2 = vcmask 8192   ;;  %s4622_s26 = smov 122   ;;  %s4623_s27 = smov 120   ;;  %s6431_s2 = inlined_call_operand.vmem [shape: f32[128,1], index: 2, kind: input, shape index: {}]   ;;  %s6432_s3 = inlined_call_operand.vmem [shape: bf16[128,32], index: 3, kind: input, shape index: {}]   ;;  %s6433_s4 = inlined_call_operand.vmem [shape: f32[128,1], index: 4, kind: input, shape index: {}]   ;;  %s6434_s6 = inlined_call_operand.vmem [shape: f32[16,1], index: 6, kind: input, shape index: {}]   ;;  %s6435_s7 = inlined_call_operand.vmem [shape: f32[16,1], index: 7, kind: input, shape index: {}]   ;;  %s6436_s0 = inlined_call_operand.vmem [shape: f32[1,8,16], index: 0, kind: input, shape index: {}]   ;;  %s6437_s5 = inlined_call_operand.vmem [shape: bf16[16,32], index: 5, kind: input, shape index: {}]   ;;  %s6438_s1 = inlined_call_operand.vmem [shape: f32[1,1,16], index: 1, kind: input, shape index: {}]   ;;  %s6439_s9 = inlined_call_operand.vmem [shape: f32[32,1], index: 9, kind: input, shape index: {}]   ;;  %s6440_s8 = inlined_call_operand.vmem [shape: bf16[32,16], index: 8, kind: input, shape index: {}]   ;;  %s6441_s10 = inlined_call_operand.vmem [shape: bf16[8,64,32], index: 10, kind: input, shape index: {}]   ;;  %s6442_s11 = inlined_call_operand.vmem [shape: f32[64,1], index: 11, kind: input, shape index: {}]   ;;  %s6443_s13 = inlined_call_operand.vmem [shape: f32[8,1], index: 13, kind: input, shape index: {}]   ;;  %s6444_s12 = inlined_call_operand.vmem [shape: f32[8,64], index: 12, kind: input, shape index: {}]   ;;  %s6445_s14 = inlined_call_operand.vmem [shape: f32[1,8,2], index: 14, kind: output, shape index: {}]  }
   0x1   :  { %4233 = vset.pattern.permute.xlu1 %v4617_v0  ;;  %4232 = vset.pattern.permute.xlu0 %v4617_v0  ;;  %v52_v1 = vld [vmem:[%s6431_s2 + $0x20] sm:$0xff]  ;;  %v4235_v4 = vld [vmem:[%s6432_s3 + $0x10] sm:$0xff]   ;;  %v4236_v5 = vld [vmem:[%s6432_s3 + $0x8] sm:$0xff]   ;;  %s4624_s28 = smov 118   ;;  %s4625_s29 = smov 116   ;;  %vm2336_vm3 = vcmask 130048  }
   0x2   :  { %v48_v2 = vld [vmem:[%s6431_s2] sm:$0xff]  ;;  %3857 = vmatprep.subr.bf16.mxu0 %v4617_v0  ;;  %4156 = vmatprep.subr.bf16.mxu1 %v4617_v0  ;;  %v4237_v6 = vld [vmem:[%s6432_s3 + $0x18] sm:$0xff]   ;;  %v53_v7 = vld [vmem:[%s6431_s2 + $0x28] sm:$0xff]  ;;  %s4626_s30 = smov 114   ;;  %s4627_s15 = smov 2   ;;  %vm2079_vm4 = vcmask 25617  }
   0x3   :  { %v4234_v3 = vld [vmem:[%s6432_s3] sm:$0xff]   ;;  %3858 = vmatpush3.bf16.msra.mxu0 %v4617_v0  ;;  %4157 = vmatpush3.bf16.msra.mxu1 %v4617_v0  ;;  %v49_v8 = vld [vmem:[%s6431_s2 + $0x8] sm:$0xff]  ;;  %v4763_v15 = vld [vmem:[%s6432_s3 + $0x30] sm:$0xff]   ;;  %s4628_s16 = smov 4   ;;  %s4631_s17 = smov 10   ;;  %vm2084_vm5 = vcmask 43042  }
   0x4   :  { %119 = vperm.xlu1 %4233, %v52_v1   ;;  %99 = vperm.xlu0 %4232, %v48_v2   ;;  %v4238_v9 = vld [vmem:[%s6432_s3 + $0x20] sm:$0xff]   ;;  %v65_v10 = vld [vmem:[%s6433_s4 + $0x8] sm:$0xff]  ;;  %6458 = vst [vmem:[#allocation4_spill] sm:$0xff] %v4763_v15  ;;  %v51_v16 = vld [vmem:[%s6431_s2 + $0x18] sm:$0xff]  ;;  %s4632_s18 = smov 12   ;;  %s4633_s19 = smov 14  }
   0x5   :  { %3859 = vmatprep.mubr.msk.bf16.mxu0 %vm333_vm0, %v4234_v3  ;;  %3863 = vmatprep.mubr.msk.bf16.mxu1 %vm333_vm0, %v4235_v4  ;;  %v64_v11 = vld [vmem:[%s6433_s4] sm:$0xff]  ;;  %v4752_v12 = vld [vmem:[%s6432_s3 + $0x28] sm:$0xff]   ;;  %v50_v17 = vld [vmem:[%s6431_s2 + $0x10] sm:$0xff]  ;;  %vm2089_vm6 = vcmask 60467   ;;  %vm2094_vm7 = vcmask 77892   ;;  %vm2099_vm8 = vcmask 95317  }
   0x6   :  { %3860 = vmatmul.mubr.msk.bf16.vlgmr.msra.gmra.mrb[0].mxu0 %vm333_vm0, %v4236_v5  ;;  %3864 = vmatmul.mubr.msk.bf16.vlgmr.msra.gmra.mrb[0].mxu1 %vm333_vm0, %v4237_v6  ;;  %6457 = vst [vmem:[#allocation3_spill] sm:$0xff] %v4752_v12  ;;  %v69_v13 = vld [vmem:[%s6433_s4 + $0x28] sm:$0xff]  ;;  %v68_v14 = vld [vmem:[%s6433_s4 + $0x20] sm:$0xff]  ;;  %v4778_v18 = vld [vmem:[%s6432_s3 + $0x38] sm:$0xff]   ;;  %vm2104_vm9 = vcmask 112742   ;;  %vm2109_vm10 = vcmask 130167  }
   0x7   :  { %3939 = vmatprep.mubr.msk.bf16.mxu0 %vm333_vm0, %v4234_v3  ;;  %3867 = vmatprep.mubr.msk.bf16.mxu1 %vm333_vm0, %v4238_v9  ;;  %6459 = vst [vmem:[#allocation5_spill] sm:$0xff] %v4778_v18  ;;  %v55_v19 = vld [vmem:[%s6431_s2 + $0x38] sm:$0xff]  ;;  %v54_v20 = vld [vmem:[%s6431_s2 + $0x30] sm:$0xff]  ;;  %v57_v21 = vld [vmem:[%s6431_s2 + $0x48] sm:$0xff]  ;;  %vm3408_vm11 = vcmask 523264   ;;  %vm3482_vm12 = vcmask 15360  }
   0x8   :  { %124 = vperm.xlu1 %4233, %v53_v7   ;;  %104 = vperm.xlu0 %4232, %v49_v8   ;;  %v56_v22 = vld [vmem:[%s6431_s2 + $0x40] sm:$0xff]  ;;  %v67_v23 = vld [vmem:[%s6433_s4 + $0x18] sm:$0xff]  ;;  %v66_v24 = vld [vmem:[%s6433_s4 + $0x10] sm:$0xff] }
   0x9   :  { %v71_v25 = vld [vmem:[%s6433_s4 + $0x38] sm:$0xff]  ;;  %v70_v26 = vld [vmem:[%s6433_s4 + $0x30] sm:$0xff]  ;;  %v73_v27 = vld [vmem:[%s6433_s4 + $0x48] sm:$0xff] }
   0xa   :  { %v72_v28 = vld [vmem:[%s6433_s4 + $0x40] sm:$0xff]  ;;  %v59_v29 = vld [vmem:[%s6431_s2 + $0x58] sm:$0xff]  ;;  %v58_v30 = vld [vmem:[%s6431_s2 + $0x50] sm:$0xff] }
   0xb   :  { %v75_v31 = vld [vmem:[%s6433_s4 + $0x58] sm:$0xff]  ;;  %v74_v32 = vld [vmem:[%s6433_s4 + $0x50] sm:$0xff]  ;;  %v61_v33 = vld [vmem:[%s6431_s2 + $0x68] sm:$0xff] }
   0xc   :  { %204 = vperm.xlu1 %4233, %v65_v10   ;;  %199 = vperm.xlu0 %4232, %v64_v11   ;;  %v60_v34 = vld [vmem:[%s6431_s2 + $0x60] sm:$0xff]  ;;  %v77_v35 = vld [vmem:[%s6433_s4 + $0x68] sm:$0xff]  ;;  %v63_v37 = vld [vmem:[%s6431_s2 + $0x78] sm:$0xff] }
   0xd   :  { %v76_v36 = vld [vmem:[%s6433_s4 + $0x60] sm:$0xff]  ;;  %v62_v38 = vld [vmem:[%s6431_s2 + $0x70] sm:$0xff]  ;;  %v79_v39 = vld [vmem:[%s6433_s4 + $0x78] sm:$0xff]  ;;  %s4630_s2 = smov 8  }
   0xe   :  { %3868 = vmatmul.mubr.msk.bf16.gmra.mrb[4].mxu1 %vm333_vm0, %v4752_v12  ;;  %v78_v40 = vld [vmem:[%s6433_s4 + $0x70] sm:$0xff]  ;;  %v1989_v41 = vld [vmem:[%s6434_s6 + $0x8] sm:$0xff]  ;;  %v1988_v42 = vld [vmem:[%s6434_s6] sm:$0xff] }
   0xf   :  { %3871 = vmatprep.mubr.msk.bf16.mxu1 %vm333_vm0, %v4763_v15  ;;  %v2058_v43 = vld [vmem:[%s6435_s7 + $0x8] sm:$0xff]  ;;  %v2057_v44 = vld [vmem:[%s6435_s7] sm:$0xff] }
  0x10   :  { %224 = vperm.xlu1 %4233, %v69_v13   ;;  %219 = vperm.xlu0 %4232, %v68_v14   ;;  %v4864_v45 = vld [vmem:[%s6436_s0 + $0x1] ss:$0 sm:$0xff]  ;;  %v4869_v46 = vld [vmem:[%s6436_s0 + $0x2] ss:$0 sm:$0xff]  ;;  %v4874_v47 = vld [vmem:[%s6436_s0 + $0x3] ss:$0 sm:$0xff] }
  0x11   :  { %v4883_v50 = vld [vmem:[%s6436_s0 + $0x4] ss:$0 sm:$0xff]  ;;  %v4888_v51 = vld [vmem:[%s6436_s0 + $0x5] ss:$0 sm:$0xff]  ;;  %v4897_v54 = vld [vmem:[%s6436_s0 + $0x6] ss:$0 sm:$0xff] }
  0x12   :  { %v4902_v55 = vld [vmem:[%s6436_s0 + $0x7] ss:$0 sm:$0xff] }
  0x14   :  { %114 = vperm.xlu1 %4233, %v51_v16   ;;  %109 = vperm.xlu0 %4232, %v50_v17  }
  0x16   :  { %3872 = vmatmul.mubr.msk.bf16.gmra.mrb[8].mxu1 %vm333_vm0, %v4778_v18 }
  0x17   :  { %3879 = vmatprep.mubr.msk.bf16.mxu1 %vm333_vm0, %v4234_v3 }
  0x18   :  { %134 = vperm.xlu1 %4233, %v55_v19   ;;  %129 = vperm.xlu0 %4232, %v54_v20  }
  0x1c   :  { %144 = vperm.xlu1 %4233, %v57_v21   ;;  %139 = vperm.xlu0 %4232, %v56_v22  }
  0x20   :  { %214 = vperm.xlu1 %4233, %v67_v23   ;;  %209 = vperm.xlu0 %4232, %v66_v24  }
  0x24   :  { %234 = vperm.xlu1 %4233, %v71_v25   ;;  %229 = vperm.xlu0 %4232, %v70_v26  }
  0x28   :  { %244 = vperm.xlu1 %4233, %v73_v27   ;;  %239 = vperm.xlu0 %4232, %v72_v28  }
  0x2c   :  { %154 = vperm.xlu1 %4233, %v59_v29   ;;  %149 = vperm.xlu0 %4232, %v58_v30  }
  0x30   :  { %254 = vperm.xlu1 %4233, %v75_v31   ;;  %249 = vperm.xlu0 %4232, %v74_v32  }
  0x34   :  { %164 = vperm.xlu1 %4233, %v61_v33   ;;  %159 = vperm.xlu0 %4232, %v60_v34  }
  0x38   :  { %264 = vperm.xlu1 %4233, %v77_v35   ;;  %259 = vperm.xlu0 %4232, %v76_v36  }
  0x3c   :  { %174 = vperm.xlu1 %4233, %v63_v37   ;;  %169 = vperm.xlu0 %4232, %v62_v38  }
  0x40   :  { %274 = vperm.xlu1 %4233, %v79_v39   ;;  %269 = vperm.xlu0 %4232, %v78_v40  }
  0x44   :  { %1997 = vperm.xlu1 %4233, %v1989_v41   ;;  %1992 = vperm.xlu0 %4232, %v1988_v42  }
  0x48   :  { %2066 = vperm.xlu1 %4233, %v2058_v43   ;;  %2061 = vperm.xlu0 %4232, %v2057_v44  }
  0x83   :  { %v4876_v48 = vpop.permute.xlu1 %119  ;;  %v4878_v49 = vpop.permute.xlu0 %99 }
  0x84   :  { %v532_v52 = vmul.f32 %v4864_v45, %v4878_v49  ;;  %v536_v53 = vmul.f32 %v4864_v45, %v4876_v48  ;;  %v740_v56 = vmul.f32 %v4869_v46, %v4878_v49  ;;  %v744_v57 = vmul.f32 %v4869_v46, %v4876_v48 }
  0x85   :  { %v948_v58 = vmul.f32 %v4874_v47, %v4878_v49  ;;  %v952_v59 = vmul.f32 %v4874_v47, %v4876_v48  ;;  %v1156_v60 = vmul.f32 %v4883_v50, %v4878_v49  ;;  %v1160_v61 = vmul.f32 %v4883_v50, %v4876_v48 }
  0x86   :  { %v1364_v62 = vmul.f32 %v4888_v51, %v4878_v49  ;;  %v1368_v63 = vmul.f32 %v4888_v51, %v4876_v48  ;;  %v1572_v2 = vmul.f32 %v4897_v54, %v4878_v49  ;;  %v1576_v3 = vmul.f32 %v4897_v54, %v4876_v48 }
  0x87   :  { %v4920_v0 = vpop.permute.xlu1 %124  ;;  %v4922_v1 = vpop.permute.xlu0 %104  ;;  %v1780_v4 = vmul.f32 %v4902_v55, %v4878_v49  ;;  %v1784_v5 = vmul.f32 %v4902_v55, %v4876_v48 }
  0x88   :  { %6460 = vst [vmem:[#allocation6_spill] sm:$0xff] %v4920_v0  ;;  %v533_v6 = vmul.f32 %v4864_v45, %v4922_v1  ;;  %v537_v7 = vmul.f32 %v4864_v45, %v4920_v0  ;;  %v741_v8 = vmul.f32 %v4869_v46, %v4922_v1  ;;  %v745_v9 = vmul.f32 %v4869_v46, %v4920_v0 }
  0x89   :  { %v949_v10 = vmul.f32 %v4874_v47, %v4922_v1  ;;  %v953_v11 = vmul.f32 %v4874_v47, %v4920_v0  ;;  %v1157_v13 = vmul.f32 %v4883_v50, %v4922_v1  ;;  %v1161_v14 = vmul.f32 %v4883_v50, %v4920_v0 }
  0x8a   :  { %v1365_v16 = vmul.f32 %v4888_v51, %v4922_v1  ;;  %v1369_v17 = vmul.f32 %v4888_v51, %v4920_v0  ;;  %v1573_v21 = vmul.f32 %v4897_v54, %v4922_v1  ;;  %v1577_v22 = vmul.f32 %v4897_v54, %v4920_v0 }
  0x8b   :  { %v4952_v19 = vpop.permute.xlu1 %204  ;;  %v4954_v20 = vpop.permute.xlu0 %199  ;;  %v1781_v23 = vmul.f32 %v4902_v55, %v4922_v1  ;;  %v1785_v24 = vmul.f32 %v4902_v55, %v4920_v0 }
  0x8c   :  { %6461 = vst [vmem:[#allocation7_spill] sm:$0xff] %v4952_v19  ;;  %6462 = vst [vmem:[#allocation8_spill] sm:$0xff] %v4954_v20  ;;  %v4965_v25 = vadd.f32 %v532_v52, %v4954_v20  ;;  %v4968_v26 = vadd.f32 %v533_v6, %v4952_v19  ;;  %v4971_v27 = vadd.f32 %v740_v56, %v4954_v20 }
  0x8d   :  { %v4974_v28 = vadd.f32 %v741_v8, %v4952_v19  ;;  %v4977_v29 = vadd.f32 %v948_v58, %v4954_v20  ;;  %v4980_v30 = vadd.f32 %v949_v10, %v4952_v19  ;;  %v4983_v31 = vadd.f32 %v1156_v60, %v4954_v20 }
  0x8e   :  { %6463 = vst [vmem:[#allocation9_spill] sm:$0xff] %v4965_v25  ;;  %6464 = vst [vmem:[#allocation10_spill] sm:$0xff] %v4968_v26  ;;  %v4986_v32 = vadd.f32 %v1157_v13, %v4952_v19  ;;  %v4989_v33 = vadd.f32 %v1364_v62, %v4954_v20  ;;  %v4992_v34 = vadd.f32 %v1365_v16, %v4952_v19 }
  0x8f   :  { %6465 = vst [vmem:[#allocation11_spill] sm:$0xff] %v4971_v27  ;;  %6466 = vst [vmem:[#allocation12_spill] sm:$0xff] %v4974_v28  ;;  %v4994_v35 = vpop.permute.xlu1 %224  ;;  %v4996_v36 = vpop.permute.xlu0 %219  ;;  %v4999_v37 = vadd.f32 %v1572_v2, %v4954_v20  ;;  %v5002_v38 = vadd.f32 %v1573_v21, %v4952_v19  ;;  %v5005_v39 = vadd.f32 %v1780_v4, %v4954_v20 }
  0x90   :  { %6467 = vst [vmem:[#allocation13_spill] sm:$0xff] %v4977_v29  ;;  %6468 = vst [vmem:[#allocation14_spill] sm:$0xff] %v4980_v30  ;;  %v5008_v40 = vadd.f32 %v1781_v23, %v4952_v19  ;;  %v5011_v41 = vadd.f32 %v536_v53, %v4996_v36  ;;  %v5014_v42 = vadd.f32 %v537_v7, %v4994_v35 }
  0x91   :  { %6469 = vst [vmem:[#allocation15_spill] sm:$0xff] %v4983_v31  ;;  %6470 = vst [vmem:[#allocation16_spill] sm:$0xff] %v4986_v32  ;;  %v5017_v43 = vadd.f32 %v744_v57, %v4996_v36  ;;  %v5020_v44 = vadd.f32 %v745_v9, %v4994_v35  ;;  %v5023_v52 = vadd.f32 %v952_v59, %v4996_v36 }
  0x92   :  { %6471 = vst [vmem:[#allocation17_spill] sm:$0xff] %v4989_v33  ;;  %6472 = vst [vmem:[#allocation18_spill] sm:$0xff] %v4992_v34  ;;  %v5026_v56 = vadd.f32 %v953_v11, %v4994_v35  ;;  %v5029_v58 = vadd.f32 %v1160_v61, %v4996_v36  ;;  %v5032_v53 = vadd.f32 %v1161_v14, %v4994_v35 }
  0x93   :  { %6473 = vst [vmem:[#allocation19_spill] sm:$0xff] %v4994_v35  ;;  %6474 = vst [vmem:[#allocation20_spill] sm:$0xff] %v4996_v36  ;;  %v5035_v60 = vadd.f32 %v1368_v63, %v4996_v36  ;;  %v5038_v57 = vadd.f32 %v1369_v17, %v4994_v35  ;;  %v5040_v62 = vpop.permute.xlu1 %114  ;;  %v5042_v2 = vpop.permute.xlu0 %109  ;;  %v5045_v59 = vadd.f32 %v1576_v3, %v4996_v36 }
  0x94   :  { %6475 = vst [vmem:[#allocation21_spill] sm:$0xff] %v4999_v37  ;;  %6476 = vst [vmem:[#allocation22_spill] sm:$0xff] %v5002_v38  ;;  %v5048_v4 = vadd.f32 %v1577_v22, %v4994_v35  ;;  %v5051_v61 = vadd.f32 %v1784_v5, %v4996_v36  ;;  %v5054_v6 = vadd.f32 %v1785_v24, %v4994_v35 }
  0x95   :  { %6477 = vst [vmem:[#allocation23_spill] sm:$0xff] %v5005_v39  ;;  %6478 = vst [vmem:[#allocation24_spill] sm:$0xff] %v5008_v40  ;;  %v534_v63 = vmul.f32 %v4864_v45, %v5042_v2  ;;  %v535_v7 = vmul.f32 %v4864_v45, %v5040_v62  ;;  %v742_v8 = vmul.f32 %v4869_v46, %v5042_v2 }
  0x96   :  { %6479 = vst [vmem:[#allocation25_spill] sm:$0xff] %v5011_v41  ;;  %6480 = vst [vmem:[#allocation26_spill] sm:$0xff] %v5014_v42  ;;  %v743_v3 = vmul.f32 %v4869_v46, %v5040_v62  ;;  %v950_v9 = vmul.f32 %v4874_v47, %v5042_v2  ;;  %v951_v5 = vmul.f32 %v4874_v47, %v5040_v62 }
  0x97   :  { %6481 = vst [vmem:[#allocation27_spill] sm:$0xff] %v5017_v43  ;;  %6482 = vst [vmem:[#allocation28_spill] sm:$0xff] %v5020_v44  ;;  %v1158_v10 = vmul.f32 %v4883_v50, %v5042_v2  ;;  %v1159_v11 = vmul.f32 %v4883_v50, %v5040_v62  ;;  %v1366_v13 = vmul.f32 %v4888_v51, %v5042_v2  ;;  %v5076_v16 = vpop.permute.xlu1 %134  ;;  %v5078_v17 = vpop.permute.xlu0 %129 }
  0x98   :  { %6483 = vst [vmem:[#allocation29_spill] sm:$0xff] %v5023_v52  ;;  %6484 = vst [vmem:[#allocation30_spill] sm:$0xff] %v5026_v56  ;;  %v1367_v14 = vmul.f32 %v4888_v51, %v5040_v62  ;;  %v1574_v21 = vmul.f32 %v4897_v54, %v5042_v2  ;;  %v1575_v22 = vmul.f32 %v4897_v54, %v5040_v62 }
  0x99   :  { %6485 = vst [vmem:[#allocation31_spill] sm:$0xff] %v5029_v58  ;;  %6486 = vst [vmem:[#allocation32_spill] sm:$0xff] %v5032_v53  ;;  %v1782_v23 = vmul.f32 %v4902_v55, %v5042_v2  ;;  %v1783_v24 = vmul.f32 %v4902_v55, %v5040_v62  ;;  %v746_v40 = vmul.f32 %v4869_v46, %v5078_v17 }
  0x9a   :  { %6487 = vst [vmem:[#allocation33_spill] sm:$0xff] %v5035_v60  ;;  %6488 = vst [vmem:[#allocation34_spill] sm:$0xff] %v5038_v57  ;;  %v747_v39 = vmul.f32 %v4869_v46, %v5076_v16  ;;  %v1162_v38 = vmul.f32 %v4883_v50, %v5078_v17  ;;  %v1163_v37 = vmul.f32 %v4883_v50, %v5076_v16 }
  0x9b   :  { %6489 = vst [vmem:[#allocation35_spill] sm:$0xff] %v5045_v59  ;;  %6490 = vst [vmem:[#allocation36_spill] sm:$0xff] %v5048_v4  ;;  %v954_v4 = vmul.f32 %v4874_v47, %v5078_v17  ;;  %v955_v59 = vmul.f32 %v4874_v47, %v5076_v16  ;;  %v1370_v57 = vmul.f32 %v4888_v51, %v5078_v17  ;;  %v5108_v34 = vpop.permute.xlu1 %144  ;;  %v5110_v33 = vpop.permute.xlu0 %139 }
  0x9c   :  { %6491 = vst [vmem:[#allocation37_spill] sm:$0xff] %v5051_v61  ;;  %6492 = vst [vmem:[#allocation38_spill] sm:$0xff] %v5054_v6  ;;  %v538_v6 = vmul.f32 %v4864_v45, %v5078_v17  ;;  %v539_v61 = vmul.f32 %v4864_v45, %v5076_v16  ;;  %v1371_v60 = vmul.f32 %v4888_v51, %v5076_v16 }
  0x9d   :  { %6493 = vst [vmem:[#allocation39_spill] sm:$0xff] %v5076_v16  ;;  %6494 = vst [vmem:[#allocation40_spill] sm:$0xff] %v5108_v34  ;;  %v1578_v53 = vmul.f32 %v4897_v54, %v5078_v17  ;;  %v1579_v58 = vmul.f32 %v4897_v54, %v5076_v16  ;;  %v1786_v32 = vmul.f32 %v4902_v55, %v5078_v17 }
  0x9e   :  { %6495 = vst [vmem:[#allocation41_spill] sm:$0xff] %v5110_v33  ;;  %v1787_v31 = vmul.f32 %v4902_v55, %v5076_v16  ;;  %v540_v56 = vmul.f32 %v4864_v45, %v5110_v33  ;;  %v541_v52 = vmul.f32 %v4864_v45, %v5108_v34  ;;  %v748_v30 = vmul.f32 %v4869_v46, %v5110_v33 }
  0x9f   :  { %v749_v29 = vmul.f32 %v4869_v46, %v5108_v34  ;;  %v956_v44 = vmul.f32 %v4874_v47, %v5110_v33  ;;  %v957_v43 = vmul.f32 %v4874_v47, %v5108_v34  ;;  %v1164_v28 = vmul.f32 %v4883_v50, %v5110_v33  ;;  %v5140_v26 = vpop.permute.xlu1 %214  ;;  %v5142_v25 = vpop.permute.xlu0 %209 }
  0xa0   :  { %v1165_v27 = vmul.f32 %v4883_v50, %v5108_v34  ;;  %v1372_v42 = vmul.f32 %v4888_v51, %v5110_v33  ;;  %v1373_v41 = vmul.f32 %v4888_v51, %v5108_v34  ;;  %v1580_v18 = vmul.f32 %v4897_v54, %v5110_v33 }
  0xa1   :  { %v1581_v15 = vmul.f32 %v4897_v54, %v5108_v34  ;;  %v1788_v12 = vmul.f32 %v4902_v55, %v5110_v33  ;;  %v1789_v35 = vmul.f32 %v4902_v55, %v5108_v34  ;;  %v5153_v36 = vadd.f32 %v534_v63, %v5142_v25 }
  0xa2   :  { %v5156_v19 = vadd.f32 %v535_v7, %v5140_v26  ;;  %v5159_v20 = vadd.f32 %v742_v8, %v5142_v25  ;;  %v5162_v16 = vadd.f32 %v743_v3, %v5140_v26  ;;  %v5165_v0 = vadd.f32 %v950_v9, %v5142_v25 }
  0xa3   :  { %v5168_v33 = vadd.f32 %v951_v5, %v5140_v26  ;;  %v5171_v34 = vadd.f32 %v1158_v10, %v5142_v25  ;;  %v5174_v63 = vadd.f32 %v1159_v11, %v5140_v26  ;;  %v5177_v7 = vadd.f32 %v1366_v13, %v5142_v25  ;;  %v5182_v3 = vpop.permute.xlu1 %234 }
  0xa4   :  { %6496 = vst [vmem:[#allocation42_spill] sm:$0xff] %v5162_v16  ;;  %6497 = vst [vmem:[#allocation43_spill] sm:$0xff] %v5165_v0  ;;  %v5180_v8 = vadd.f32 %v1367_v14, %v5140_v26  ;;  %v5184_v16 = vpop.permute.xlu0 %229  ;;  %v5187_v9 = vadd.f32 %v1574_v21, %v5142_v25  ;;  %v5190_v5 = vadd.f32 %v1575_v22, %v5140_v26 }
  0xa5   :  { %6498 = vst [vmem:[#allocation44_spill] sm:$0xff] %v5168_v33  ;;  %6499 = vst [vmem:[#allocation45_spill] sm:$0xff] %v5171_v34  ;;  %v5193_v10 = vadd.f32 %v1782_v23, %v5142_v25  ;;  %v5196_v11 = vadd.f32 %v1783_v24, %v5140_v26  ;;  %v5199_v13 = vadd.f32 %v538_v6, %v5184_v16 }
  0xa6   :  { %6500 = vst [vmem:[#allocation46_spill] sm:$0xff] %v5174_v63  ;;  %6501 = vst [vmem:[#allocation47_spill] sm:$0xff] %v5177_v7  ;;  %v5202_v14 = vadd.f32 %v539_v61, %v5182_v3  ;;  %v5208_v21 = vadd.f32 %v747_v39, %v5182_v3  ;;  %v5211_v22 = vadd.f32 %v954_v4, %v5184_v16 }
  0xa7   :  { %6502 = vst [vmem:[#allocation48_spill] sm:$0xff] %v5180_v8  ;;  %6503 = vst [vmem:[#allocation49_spill] sm:$0xff] %v5187_v9  ;;  %v5205_v8 = vadd.f32 %v746_v40, %v5184_v16  ;;  %v5214_v23 = vadd.f32 %v955_v59, %v5182_v3  ;;  %v5217_v24 = vadd.f32 %v1162_v38, %v5184_v16  ;;  %v5228_v39 = vpop.permute.xlu1 %244 }
  0xa8   :  { %6504 = vst [vmem:[#allocation50_spill] sm:$0xff] %v5190_v5  ;;  %6505 = vst [vmem:[#allocation51_spill] sm:$0xff] %v5193_v10  ;;  %v5220_v6 = vadd.f32 %v1163_v37, %v5182_v3  ;;  %v5223_v61 = vadd.f32 %v1370_v57, %v5184_v16  ;;  %v5226_v40 = vadd.f32 %v1371_v60, %v5182_v3 }
  0xa9   :  { %6506 = vst [vmem:[#allocation52_spill] sm:$0xff] %v5196_v11  ;;  %6507 = vst [vmem:[#allocation53_spill] sm:$0xff] %v5211_v22  ;;  %v5230_v11 = vpop.permute.xlu0 %239  ;;  %v5233_v4 = vadd.f32 %v1578_v53, %v5184_v16  ;;  %v5236_v59 = vadd.f32 %v1579_v58, %v5182_v3  ;;  %v5239_v38 = vadd.f32 %v1786_v32, %v5184_v16 }
  0xaa   :  { %6508 = vst [vmem:[#allocation54_spill] sm:$0xff] %v5214_v23  ;;  %6509 = vst [vmem:[#allocation55_spill] sm:$0xff] %v5217_v24  ;;  %v5242_v37 = vadd.f32 %v1787_v31, %v5182_v3  ;;  %v5245_v57 = vadd.f32 %v540_v56, %v5230_v11  ;;  %v5248_v60 = vadd.f32 %v541_v52, %v5228_v39 }
  0xab   :  { %6510 = vst [vmem:[#allocation56_spill] sm:$0xff] %v5220_v6  ;;  %6511 = vst [vmem:[#allocation57_spill] sm:$0xff] %v5223_v61  ;;  %v5251_v10 = vadd.f32 %v748_v30, %v5230_v11  ;;  %v5254_v53 = vadd.f32 %v749_v29, %v5228_v39  ;;  %v5257_v58 = vadd.f32 %v956_v44, %v5230_v11  ;;  %v5274_v29 = vpop.permute.xlu1 %154 }
  0xac   :  { %6512 = vst [vmem:[#allocation58_spill] sm:$0xff] %v5226_v40  ;;  %6513 = vst [vmem:[#allocation59_spill] sm:$0xff] %v5233_v4  ;;  %v5260_v32 = vadd.f32 %v957_v43, %v5228_v39  ;;  %v5263_v31 = vadd.f32 %v1164_v28, %v5230_v11  ;;  %v5266_v56 = vadd.f32 %v1165_v27, %v5228_v39 }
  0xad   :  { %6514 = vst [vmem:[#allocation60_spill] sm:$0xff] %v5236_v59  ;;  %6515 = vst [vmem:[#allocation61_spill] sm:$0xff] %v5239_v38  ;;  %v5269_v52 = vadd.f32 %v1372_v42, %v5230_v11  ;;  %v5272_v30 = vadd.f32 %v1373_v41, %v5228_v39  ;;  %v5279_v44 = vadd.f32 %v1580_v18, %v5230_v11 }
  0xae   :  { %6516 = vst [vmem:[#allocation62_spill] sm:$0xff] %v5242_v37  ;;  %6517 = vst [vmem:[#allocation63_spill] sm:$0xff] %v5257_v58  ;;  %v5276_v37 = vpop.permute.xlu0 %149  ;;  %v5282_v43 = vadd.f32 %v1581_v15, %v5228_v39  ;;  %v5285_v28 = vadd.f32 %v1788_v12, %v5230_v11  ;;  %v5288_v27 = vadd.f32 %v1789_v35, %v5228_v39 }
  0xaf   :  { %6518 = vst [vmem:[#allocation64_spill] sm:$0xff] %v5260_v32  ;;  %6519 = vst [vmem:[#allocation65_spill] sm:$0xff] %v5263_v31  ;;  %v542_v41 = vmul.f32 %v4864_v45, %v5276_v37  ;;  %v543_v42 = vmul.f32 %v4864_v45, %v5274_v29  ;;  %v750_v38 = vmul.f32 %v4869_v46, %v5276_v37 }
  0xb0   :  { %6520 = vst [vmem:[#allocation66_spill] sm:$0xff] %v5266_v56  ;;  %6521 = vst [vmem:[#allocation67_spill] sm:$0xff] %v5269_v52  ;;  %v751_v18 = vmul.f32 %v4869_v46, %v5274_v29  ;;  %v958_v15 = vmul.f32 %v4874_v47, %v5276_v37  ;;  %v959_v12 = vmul.f32 %v4874_v47, %v5274_v29 }
  0xb1   :  { %6522 = vst [vmem:[#allocation68_spill] sm:$0xff] %v5272_v30  ;;  %6523 = vst [vmem:[#allocation69_spill] sm:$0xff] %v5279_v44  ;;  %v1166_v35 = vmul.f32 %v4883_v50, %v5276_v37  ;;  %v5310_v44 = vpop.permute.xlu1 %254  ;;  %v1582_v4 = vmul.f32 %v4897_v54, %v5276_v37  ;;  %v1583_v5 = vmul.f32 %v4897_v54, %v5274_v29 }
  0xb2   :  { %6524 = vst [vmem:[#allocation70_spill] sm:$0xff] %v5282_v43  ;;  %6525 = vst [vmem:[#allocation71_spill] sm:$0xff] %v5285_v28  ;;  %v1374_v28 = vmul.f32 %v4888_v51, %v5276_v37  ;;  %v1375_v43 = vmul.f32 %v4888_v51, %v5274_v29  ;;  %v5312_v59 = vpop.permute.xlu0 %249  ;;  %v1790_v9 = vmul.f32 %v4902_v55, %v5276_v37 }
  0xb3   :  { %6526 = vst [vmem:[#allocation72_spill] sm:$0xff] %v5288_v27  ;;  %v1167_v27 = vmul.f32 %v4883_v50, %v5274_v29  ;;  %v1791_v30 = vmul.f32 %v4902_v55, %v5274_v29  ;;  %v5323_v52 = vadd.f32 %v542_v41, %v5312_v59  ;;  %v5326_v40 = vadd.f32 %v543_v42, %v5310_v44 }
  0xb4   :  { %v5329_v61 = vadd.f32 %v750_v38, %v5312_v59  ;;  %v5332_v7 = vadd.f32 %v751_v18, %v5310_v44  ;;  %v5335_v56 = vadd.f32 %v958_v15, %v5312_v59  ;;  %v5338_v31 = vadd.f32 %v959_v12, %v5310_v44 }
  0xb5   :  { %v5341_v6 = vadd.f32 %v1166_v35, %v5312_v59  ;;  %v5344_v41 = vadd.f32 %v1167_v27, %v5310_v44  ;;  %v5347_v42 = vadd.f32 %v1374_v28, %v5312_v59  ;;  %v5350_v38 = vadd.f32 %v1375_v43, %v5310_v44  ;;  %v5352_v18 = vpop.permute.xlu1 %164 }
  0xb6   :  { %6527 = vst [vmem:[#allocation73_spill] sm:$0xff] %v5335_v56  ;;  %6528 = vst [vmem:[#allocation74_spill] sm:$0xff] %v5338_v31  ;;  %v5354_v24 = vpop.permute.xlu0 %159  ;;  %v5357_v15 = vadd.f32 %v1582_v4, %v5312_v59  ;;  %v5360_v12 = vadd.f32 %v1583_v5, %v5310_v44  ;;  %v5363_v35 = vadd.f32 %v1790_v9, %v5312_v59 }
  0xb7   :  { %6529 = vst [vmem:[#allocation75_spill] sm:$0xff] %v5341_v6  ;;  %6530 = vst [vmem:[#allocation76_spill] sm:$0xff] %v5344_v41  ;;  %v5366_v27 = vadd.f32 %v1791_v30, %v5310_v44  ;;  %v544_v43 = vmul.f32 %v4864_v45, %v5354_v24  ;;  %v545_v28 = vmul.f32 %v4864_v45, %v5352_v18 }
  0xb8   :  { %6531 = vst [vmem:[#allocation77_spill] sm:$0xff] %v5347_v42  ;;  %6532 = vst [vmem:[#allocation78_spill] sm:$0xff] %v5350_v38  ;;  %v752_v38 = vmul.f32 %v4869_v46, %v5354_v24  ;;  %v753_v4 = vmul.f32 %v4869_v46, %v5352_v18  ;;  %v960_v5 = vmul.f32 %v4874_v47, %v5354_v24 }
  0xb9   :  { %6533 = vst [vmem:[#allocation79_spill] sm:$0xff] %v5357_v15  ;;  %6534 = vst [vmem:[#allocation80_spill] sm:$0xff] %v5360_v12  ;;  %v961_v9 = vmul.f32 %v4874_v47, %v5352_v18  ;;  %v1168_v30 = vmul.f32 %v4883_v50, %v5354_v24  ;;  %v1377_v12 = vmul.f32 %v4888_v51, %v5352_v18  ;;  %v5388_v15 = vpop.permute.xlu1 %264 }
  0xba   :  { %6535 = vst [vmem:[#allocation81_spill] sm:$0xff] %v5363_v35  ;;  %6536 = vst [vmem:[#allocation82_spill] sm:$0xff] %v5366_v27  ;;  %v1169_v27 = vmul.f32 %v4883_v50, %v5352_v18  ;;  %v1376_v35 = vmul.f32 %v4888_v51, %v5354_v24  ;;  %v5390_v42 = vpop.permute.xlu0 %259  ;;  %v1584_v41 = vmul.f32 %v4897_v54, %v5354_v24 }
  0xbb   :  { %v1585_v6 = vmul.f32 %v4897_v54, %v5352_v18  ;;  %v1792_v63 = vmul.f32 %v4902_v55, %v5354_v24  ;;  %v1793_v34 = vmul.f32 %v4902_v55, %v5352_v18  ;;  %v5401_v32 = vadd.f32 %v544_v43, %v5390_v42 }
  0xbc   :  { %v5404_v31 = vadd.f32 %v545_v28, %v5388_v15  ;;  %v5407_v58 = vadd.f32 %v752_v38, %v5390_v42  ;;  %v5410_v56 = vadd.f32 %v753_v4, %v5388_v15  ;;  %v5413_v23 = vadd.f32 %v960_v5, %v5390_v42 }
  0xbd   :  { %v5416_v22 = vadd.f32 %v961_v9, %v5388_v15  ;;  %v5419_v33 = vadd.f32 %v1168_v30, %v5390_v42  ;;  %v5422_v43 = vadd.f32 %v1169_v27, %v5388_v15  ;;  %v5425_v28 = vadd.f32 %v1376_v35, %v5390_v42  ;;  %v5430_v4 = vpop.permute.xlu1 %174 }
  0xbe   :  { %6537 = vst [vmem:[#allocation83_spill] sm:$0xff] %v5407_v58  ;;  %6538 = vst [vmem:[#allocation84_spill] sm:$0xff] %v5410_v56  ;;  %v5428_v38 = vadd.f32 %v1377_v12, %v5388_v15  ;;  %v5432_v0 = vpop.permute.xlu0 %169  ;;  %v5435_v5 = vadd.f32 %v1584_v41, %v5390_v42  ;;  %v5438_v9 = vadd.f32 %v1585_v6, %v5388_v15 }
  0xbf   :  { %6539 = vst [vmem:[#allocation85_spill] sm:$0xff] %v5413_v23  ;;  %6540 = vst [vmem:[#allocation86_spill] sm:$0xff] %v5416_v22  ;;  %v5441_v30 = vadd.f32 %v1792_v63, %v5390_v42  ;;  %v5444_v27 = vadd.f32 %v1793_v34, %v5388_v15  ;;  %v546_v12 = vmul.f32 %v4864_v45, %v5432_v0 }
  0xc0   :  { %6541 = vst [vmem:[#allocation87_spill] sm:$0xff] %v5419_v33  ;;  %6542 = vst [vmem:[#allocation88_spill] sm:$0xff] %v5422_v43  ;;  %v547_v35 = vmul.f32 %v4864_v45, %v5430_v4  ;;  %v755_v41 = vmul.f32 %v4869_v46, %v5430_v4  ;;  %v962_v6 = vmul.f32 %v4874_v47, %v5432_v0 }
  0xc1   :  { %6543 = vst [vmem:[#allocation89_spill] sm:$0xff] %v5425_v28  ;;  %6544 = vst [vmem:[#allocation90_spill] sm:$0xff] %v5428_v38  ;;  %v754_v38 = vmul.f32 %v4869_v46, %v5432_v0  ;;  %v963_v63 = vmul.f32 %v4874_v47, %v5430_v4  ;;  %v1170_v34 = vmul.f32 %v4883_v50, %v5432_v0 }
  0xc2   :  { %6545 = vst [vmem:[#allocation91_spill] sm:$0xff] %v5435_v5  ;;  %6546 = vst [vmem:[#allocation92_spill] sm:$0xff] %v5438_v9  ;;  %v1378_v45 = vmul.f32 %v4888_v51, %v5432_v0  ;;  %v5466_v9 = vpop.permute.xlu1 %274  ;;  %v5468_v46 = vpop.permute.xlu0 %269  ;;  %v1586_v5 = vmul.f32 %v4897_v54, %v5432_v0  ;;  %v1587_v47 = vmul.f32 %v4897_v54, %v5430_v4 }
  0xc3   :  { %6547 = vst [vmem:[#allocation93_spill] sm:$0xff] %v5441_v30  ;;  %6548 = vst [vmem:[#allocation94_spill] sm:$0xff] %v5444_v27  ;;  %v1171_v27 = vmul.f32 %v4883_v50, %v5430_v4  ;;  %v1379_v30 = vmul.f32 %v4888_v51, %v5430_v4  ;;  %v1794_v28 = vmul.f32 %v4902_v55, %v5432_v0 }
  0xc4   :  { %v1795_v50 = vmul.f32 %v4902_v55, %v5430_v4  ;;  %v5479_v43 = vadd.f32 %v546_v12, %v5468_v46  ;;  %v5482_v51 = vadd.f32 %v547_v35, %v5466_v9  ;;  %v5485_v33 = vadd.f32 %v754_v38, %v5468_v46 }
  0xc5   :  { %v5488_v22 = vadd.f32 %v755_v41, %v5466_v9  ;;  %v5491_v54 = vadd.f32 %v962_v6, %v5468_v46  ;;  %v5494_v23 = vadd.f32 %v963_v63, %v5466_v9  ;;  %v5497_v55 = vadd.f32 %v1170_v34, %v5468_v46 }
  0xc6   :  { %6549 = vst [vmem:[#allocation95_spill] sm:$0xff] %v5485_v33  ;;  %v5500_v12 = vadd.f32 %v1171_v27, %v5466_v9  ;;  %v5503_v35 = vadd.f32 %v1378_v45, %v5468_v46  ;;  %v5506_v38 = vadd.f32 %v1379_v30, %v5466_v9  ;;  %v5509_v41 = vadd.f32 %v1586_v5, %v5468_v46  ;;  %v5523_v27 = vld [vmem:[%s6436_s0] ss:$0 sm:$0xff]  ;;  %s4629_s0 = smov 6  }
  0xc7   :  { %6550 = vst [vmem:[#allocation96_spill] sm:$0xff] %v5488_v22  ;;  %6551 = vst [vmem:[#allocation97_spill] sm:$0xff] %v5491_v54  ;;  %v5512_v6 = vadd.f32 %v1587_v47, %v5466_v9  ;;  %v5515_v63 = vadd.f32 %v1794_v28, %v5468_v46  ;;  %v5518_v34 = vadd.f32 %v1795_v50, %v5466_v9  ;;  %v6565_v54 = vld [vmem:[#allocation20_spill] sm:$0xff] }
  0xc8   :  { %6552 = vst [vmem:[#allocation98_spill] sm:$0xff] %v5494_v23  ;;  %6553 = vst [vmem:[#allocation99_spill] sm:$0xff] %v5497_v55  ;;  %v183_v30 = vmul.f32 %v5523_v27, %v5042_v2  ;;  %v187_v5 = vmul.f32 %v5523_v27, %v5078_v17  ;;  %v181_v45 = vmul.f32 %v5523_v27, %v4878_v49 }
  0xc9   :  { %6554 = vst [vmem:[#allocation100_spill] sm:$0xff] %v5500_v12  ;;  %6555 = vst [vmem:[#allocation101_spill] sm:$0xff] %v5503_v35  ;;  %v182_v28 = vmul.f32 %v5523_v27, %v4922_v1  ;;  %v185_v47 = vmul.f32 %v5523_v27, %v4876_v48  ;;  %v184_v50 = vmul.f32 %v5523_v27, %v5040_v62  ;;  %v6564_v1 = vld [vmem:[#allocation7_spill] sm:$0xff] }
  0xca   :  { %6556 = vst [vmem:[#allocation102_spill] sm:$0xff] %v5506_v38  ;;  %6557 = vst [vmem:[#allocation103_spill] sm:$0xff] %v5509_v41  ;;  %v279_v17 = vadd.f32 %v5142_v25, %v183_v30  ;;  %v283_v49 = vadd.f32 %v5184_v16, %v187_v5  ;;  %v6563_v38 = vld [vmem:[#allocation8_spill] sm:$0xff]  ;;  %v6567_v16 = vld [vmem:[#allocation41_spill] sm:$0xff] }
  0xcb   :  { %6558 = vst [vmem:[#allocation104_spill] sm:$0xff] %v5512_v6  ;;  %6559 = vst [vmem:[#allocation105_spill] sm:$0xff] %v5515_v63  ;;  %v6562_v6 = vld [vmem:[#allocation39_spill] sm:$0xff]  ;;  %v277_v35 = vadd.f32 %v6563_v38, %v181_v45  ;;  %v278_v12 = vadd.f32 %v6564_v1, %v182_v28  ;;  %v281_v62 = vadd.f32 %v6565_v54, %v185_v47 }
  0xcc   :  { %6560 = vst [vmem:[#allocation106_spill] sm:$0xff] %v5518_v34  ;;  %v6561_v34 = vld [vmem:[#allocation6_spill] sm:$0xff]  ;;  %v188_v2 = vmul.f32 %v5523_v27, %v6562_v6  ;;  %v280_v56 = vadd.f32 %v5140_v26, %v184_v50  ;;  %v189_v38 = vmul.f32 %v5523_v27, %v6567_v16  ;;  %v191_v54 = vmul.f32 %v5523_v27, %v5276_v37 }
  0xcd   :  { %v186_v63 = vmul.f32 %v5523_v27, %v6561_v34  ;;  %v6566_v34 = vld [vmem:[#allocation19_spill] sm:$0xff] }
  0xce   :  { %v284_v30 = vadd.f32 %v5182_v3, %v188_v2 }
  0xcf   :  { %v282_v22 = vadd.f32 %v6566_v34, %v186_v63 }
  0xd9   :  { %v3861_v41 = vpop.f32.mrb[0].mxu0  ;;  %v3865_v48 = vpop.f32.mrb[0].mxu1 }
  0xda   :  { %v401_v55 = vadd.f32 %v3861_v41, %v279_v17  ;;  %v392_v23 = vpop.f32.mrb[1].mxu0  ;;  %v417_v58 = vadd.f32 %v3865_v48, %v283_v49  ;;  %v408_v33 = vpop.f32.mrb[1].mxu1  ;;  %v285_v48 = vadd.f32 %v5230_v11, %v189_v38  ;;  %v195_v11 = vmul.f32 %v5523_v27, %v5432_v0 }
  0xdb   :  { %v393_v6 = vadd.f32 %v392_v23, %v277_v35  ;;  %v3862_v25 = vpop.f32.mrb[2].mxu0  ;;  %v409_v45 = vadd.f32 %v408_v33, %v281_v62  ;;  %v3866_v28 = vpop.f32.mrb[2].mxu1  ;;  %v192_v33 = vmul.f32 %v5523_v27, %v5274_v29 }
  0xdc   :  { %v457_v5 = vmul.f32 0.5, %v401_v55  ;;  %v404_v41 = vadd.f32 %v3862_v25, %v280_v56  ;;  %v395_v17 = vpop.f32.mrb[3].mxu0  ;;  %v473_v26 = vmul.f32 0.5, %v417_v58  ;;  %v420_v63 = vadd.f32 %v3866_v28, %v284_v30  ;;  %v411_v23 = vpop.f32.mrb[3].mxu1  ;;  %v6568_v55 = vld [vmem:[#allocation40_spill] sm:$0xff] }
  0xdd   :  { %v455_v47 = vmul.f32 0.5, %v393_v6  ;;  %v396_v50 = vadd.f32 %v395_v17, %v278_v12  ;;  %v471_v35 = vmul.f32 0.5, %v409_v45  ;;  %v412_v3 = vadd.f32 %v411_v23, %v282_v22 }
  0xde   :  { %4277 = vtanh.f32 %v457_v5  ;;  %v458_v49 = vmul.f32 0.5, %v404_v41  ;;  %v474_v2 = vmul.f32 0.5, %v420_v63  ;;  %v190_v1 = vmul.f32 %v5523_v27, %v6568_v55 }
  0xdf   :  { %4279 = vtanh.f32 %v473_v26  ;;  %v456_v56 = vmul.f32 0.5, %v396_v50  ;;  %v472_v37 = vmul.f32 0.5, %v412_v3  ;;  %v287_v58 = vadd.f32 %v5312_v59, %v191_v54 }
  0xe0   :  { %4281 = vtanh.f32 %v455_v47  ;;  %v288_v34 = vadd.f32 %v5310_v44, %v192_v33  ;;  %v286_v25 = vadd.f32 %v5228_v39, %v190_v1  ;;  %v193_v59 = vmul.f32 %v5523_v27, %v5354_v24 }
  0xe1   :  { %4283 = vtanh.f32 %v471_v35  ;;  %v3869_v12 = vpop.f32.mrb[4].mxu1  ;;  %v291_v45 = vadd.f32 %v5468_v46, %v195_v11  ;;  %v196_v39 = vmul.f32 %v5523_v27, %v5430_v4  ;;  %v194_v24 = vmul.f32 %v5523_v27, %v5352_v18 }
  0xe2   :  { %4285 = vtanh.f32 %v458_v49  ;;  %v433_v22 = vadd.f32 %v3869_v12, %v287_v58  ;;  %v424_v62 = vpop.f32.mrb[5].mxu1  ;;  %v289_v26 = vadd.f32 %v5390_v42, %v193_v59 }
  0xe3   :  { %4287 = vtanh.f32 %v474_v2  ;;  %v425_v29 = vadd.f32 %v424_v62, %v285_v48  ;;  %v3870_v6 = vpop.f32.mrb[6].mxu1  ;;  %v292_v50 = vadd.f32 %v5466_v9, %v196_v39  ;;  %v290_v27 = vadd.f32 %v5388_v15, %v194_v24 }
  0xe4   :  { %4289 = vtanh.f32 %v456_v56  ;;  %v436_v30 = vadd.f32 %v3870_v6, %v288_v34  ;;  %v427_v16 = vpop.f32.mrb[7].mxu1 }
  0xe5   :  { %4291 = vtanh.f32 %v472_v37  ;;  %v428_v5 = vadd.f32 %v427_v16, %v286_v25 }
  0xe6   :  { %4293 = vtanh.f32 %v433_v22 }
  0xe7   :  { %4295 = vtanh.f32 %v425_v29 }
  0xe8   :  { %v4278_v38 = vpop.eup %4277  ;;  %4297 = vtanh.f32 %v436_v30 }
  0xe9   :  { %v4280_v44 = vpop.eup %4279  ;;  %4299 = vtanh.f32 %v428_v5  ;;  %v465_v28 = vmul.f32 0.5, %v4278_v38  ;;  %v3873_v54 = vpop.f32.mrb[8].mxu1 }
  0xea   :  { %v4282_v41 = vpop.eup %4281  ;;  %v481_v17 = vmul.f32 0.5, %v4280_v44  ;;  %v449_v0 = vadd.f32 %v3873_v54, %v291_v45  ;;  %v440_v63 = vpop.f32.mrb[9].mxu1 }
  0xeb   :  { %v4284_v47 = vpop.eup %4283  ;;  %v463_v46 = vmul.f32 0.5, %v4282_v41  ;;  %v441_v3 = vadd.f32 %v440_v63, %v289_v26  ;;  %v3874_v4 = vpop.f32.mrb[10].mxu1  ;;  %v469_v37 = vadd.f32 0.5, %v465_v28 }
  0xec   :  { %v4286_v23 = vpop.eup %4285  ;;  %v485_v35 = vadd.f32 0.5, %v481_v17  ;;  %v479_v49 = vmul.f32 0.5, %v4284_v47  ;;  %v493_v56 = vmul.f32 0.5, %v449_v0  ;;  %v452_v55 = vadd.f32 %v3874_v4, %v292_v50  ;;  %v443_v1 = vpop.f32.mrb[11].mxu1 }
  0xed   :  { %v4288_v2 = vpop.eup %4287  ;;  %v466_v33 = vmul.f32 0.5, %v4286_v23  ;;  %v491_v9 = vmul.f32 0.5, %v441_v3  ;;  %v467_v29 = vadd.f32 0.5, %v463_v46  ;;  %v444_v59 = vadd.f32 %v443_v1, %v290_v27 }
  0xee   :  { %v4290_v42 = vpop.eup %4289  ;;  %v483_v58 = vadd.f32 0.5, %v479_v49  ;;  %v482_v18 = vmul.f32 0.5, %v4288_v2  ;;  %4301 = vtanh.f32 %v493_v56  ;;  %v494_v22 = vmul.f32 0.5, %v452_v55 }
  0xef   :  { %v4292_v12 = vpop.eup %4291  ;;  %v464_v48 = vmul.f32 0.5, %v4290_v42  ;;  %v509_v34 = vmul.f32 0.0, %v485_v35  ;;  %v470_v16 = vadd.f32 0.5, %v466_v33  ;;  %v492_v0 = vmul.f32 0.5, %v444_v59  ;;  %v5622_v59 = vld [vmem:[%s6432_s3] sm:$0xff]  }
  0xf0   :  { %v4294_v62 = vpop.eup %4293  ;;  %v486_v6 = vadd.f32 0.5, %v482_v18  ;;  %v480_v25 = vmul.f32 0.5, %v4292_v12  ;;  %4303 = vtanh.f32 %v494_v22  ;;  %v507_v38 = vmul.f32 0.0, %v483_v58 }
  0xf1   :  { %v4296_v30 = vpop.eup %4295  ;;  %v513_v5 = vmul.f32 %v4294_v62, %v469_v37  ;;  %v468_v44 = vadd.f32 0.5, %v464_v48  ;;  %4305 = vtanh.f32 %v491_v9 }
  0xf2   :  { %v4298_v11 = vpop.eup %4297  ;;  %v484_v45 = vadd.f32 0.5, %v480_v25  ;;  %v511_v15 = vmul.f32 %v4296_v30, %v467_v29  ;;  %v510_v41 = vmul.f32 0.0, %v486_v6  ;;  %v5595_v29 = vld [vmem:[%s6432_s3 + $0x10] sm:$0xff]   ;;  %v5602_v6 = vld [vmem:[%s6432_s3 + $0x18] sm:$0xff]   ;;  %v5609_v25 = vld [vmem:[%s6432_s3 + $0x20] sm:$0xff]  }
  0xf3   :  { %v4300_v39 = vpop.eup %4299  ;;  %v5573_v28 = vadd.f32 %v513_v5, %v509_v34  ;;  %v514_v17 = vmul.f32 %v4298_v11, %v470_v16  ;;  %v5588_v34 = vld [vmem:[%s6432_s3 + $0x8] sm:$0xff]   ;;  %v6569_v30 = vld [vmem:[#allocation3_spill] sm:$0xff]  ;;  %v6570_v16 = vld [vmem:[#allocation4_spill] sm:$0xff] }
  0xf4   :  { %v508_v54 = vmul.f32 0.0, %v484_v45  ;;  %v5575_v26 = vadd.f32 %v511_v15, %v507_v38  ;;  %v512_v24 = vmul.f32 %v4300_v39, %v468_v44  ;;  %v6571_v5 = vld [vmem:[#allocation5_spill] sm:$0xff] }
  0xf5   :  { %4307 = vtanh.f32 %v5573_v28  ;;  %v5578_v47 = vadd.f32 %v514_v17, %v510_v41  ;;  %v6572_v45 = vld [vmem:[#allocation9_spill] sm:$0xff] }
  0xf6   :  { %v5580_v63 = vadd.f32 %v512_v24, %v508_v54  ;;  %v6573_v24 = vld [vmem:[#allocation10_spill] sm:$0xff] }
  0xf7   :  { %4309 = vtanh.f32 %v5578_v47 }
  0xf8   :  { %v4302_v50 = vpop.eup %4301  ;;  %4311 = vtanh.f32 %v492_v0 }
  0xf9   :  { %4313 = vtanh.f32 %v5575_v26  ;;  %v501_v23 = vmul.f32 0.5, %v4302_v50 }
  0xfa   :  { %v4304_v35 = vpop.eup %4303  ;;  %4315 = vtanh.f32 %v5580_v63 }
  0xfb   :  { %v502_v46 = vmul.f32 0.5, %v4304_v35  ;;  %v4306_v49 = vpop.eup %4305  ;;  %v505_v3 = vadd.f32 0.5, %v501_v23 }
  0xfc   :  { %v499_v33 = vmul.f32 0.5, %v4306_v49 }
  0xfd   :  { %v506_v4 = vadd.f32 0.5, %v502_v46 }
  0xfe   :  { %v503_v58 = vadd.f32 0.5, %v499_v33 }
  0xff   :  { %v4308_v2 = vpop.eup %4307 }
 0x100   :  { %v525_v55 = vmul.f32 %v4308_v2, %v505_v3 }
 0x101   :  { %v4310_v56 = vpop.eup %4309 }
 0x102   :  { %v526_v1 = vmul.f32 %v4310_v56, %v506_v4  ;;  %v4312_v42 = vpop.eup %4311 }
 0x103   :  { %v4314_v37 = vpop.eup %4313  ;;  %v500_v18 = vmul.f32 0.5, %v4312_v42 }
 0x104   :  { %v565_v27 = vpack.c.bf16 %v526_v1, %v525_v55  ;;  %v4316_v12 = vpop.eup %4315  ;;  %v523_v9 = vmul.f32 %v4314_v37, %v503_v58  ;;  %v6575_v1 = vld [vmem:[#allocation26_spill] sm:$0xff] }
 0x105   :  { %v504_v48 = vadd.f32 0.5, %v500_v18 }
 0x107   :  { %v524_v22 = vmul.f32 %v4316_v12, %v504_v48 }
 0x109   :  { %v564_v62 = vpack.c.bf16 %v524_v22, %v523_v9 }
 0x10b   :  { %3875 = vmatprep.subr.bf16.mxu1 %v564_v62 }
 0x10c   :  { %3876 = vmatpush3.bf16.msra.mxu1 %v564_v62 }
 0x10d   :  { %3877 = vmatprep.subr.bf16.mxu1 %v565_v27 }
 0x110   :  { %3878 = vmatpush3.bf16.msra.mxu1 %v565_v27 }
 0x113   :  { %3880 = vmatmul.mubr.msk.bf16.vlgmr.msra.gmra.mrb[12].mxu1 %vm333_vm0, %v5588_v34 }
 0x114   :  { %3883 = vmatprep.mubr.msk.bf16.mxu1 %vm333_vm0, %v5595_v29 }
 0x11b   :  { %3884 = vmatmul.mubr.msk.bf16.gmra.mrb[16].mxu1 %vm333_vm0, %v5602_v6 }
 0x11c   :  { %3887 = vmatprep.mubr.msk.bf16.mxu1 %vm333_vm0, %v5609_v25 }
 0x123   :  { %3888 = vmatmul.mubr.msk.bf16.gmra.mrb[20].mxu1 %vm333_vm0, %v6569_v30 }
 0x124   :  { %3891 = vmatprep.mubr.msk.bf16.mxu1 %vm333_vm0, %v6570_v16 }
 0x12b   :  { %3892 = vmatmul.mubr.msk.bf16.gmra.mrb[24].mxu1 %vm333_vm0, %v6571_v5 }
 0x12c   :  { %3899 = vmatprep.mubr.msk.bf16.mxu1 %vm333_vm0, %v5622_v59 }
 0x1e6   :  { %v3881_v11 = vpop.f32.mrb[12].mxu1 }
 0x1e7   :  { %v609_v38 = vadd.f32 %v3881_v11, %v5153_v36  ;;  %v600_v44 = vpop.f32.mrb[13].mxu1  ;;  %v6574_v36 = vld [vmem:[#allocation25_spill] sm:$0xff] }
 0x1e8   :  { %v601_v15 = vadd.f32 %v600_v44, %v6572_v45  ;;  %v3882_v39 = vpop.f32.mrb[14].mxu1 }
 0x1e9   :  { %v612_v41 = vadd.f32 %v3882_v39, %v5156_v19  ;;  %v603_v17 = vpop.f32.mrb[15].mxu1  ;;  %v665_v54 = vmul.f32 0.5, %v609_v38 }
 0x1ea   :  { %v604_v0 = vadd.f32 %v603_v17, %v6573_v24  ;;  %v663_v50 = vmul.f32 0.5, %v601_v15 }
 0x1eb   :  { %v666_v23 = vmul.f32 0.5, %v612_v41  ;;  %4317 = vtanh.f32 %v665_v54 }
 0x1ec   :  { %v664_v35 = vmul.f32 0.5, %v604_v0  ;;  %4319 = vtanh.f32 %v663_v50 }
 0x1ed   :  { %4321 = vtanh.f32 %v666_v23 }
 0x1ee   :  { %v3885_v46 = vpop.f32.mrb[16].mxu1  ;;  %4323 = vtanh.f32 %v664_v35 }
 0x1ef   :  { %v625_v49 = vadd.f32 %v3885_v46, %v5199_v13  ;;  %v616_v3 = vpop.f32.mrb[17].mxu1 }
 0x1f0   :  { %v617_v4 = vadd.f32 %v616_v3, %v6574_v36  ;;  %v3886_v2 = vpop.f32.mrb[18].mxu1 }
 0x1f1   :  { %v681_v33 = vmul.f32 0.5, %v625_v49  ;;  %v628_v19 = vadd.f32 %v3886_v2, %v5202_v14  ;;  %v619_v56 = vpop.f32.mrb[19].mxu1 }
 0x1f2   :  { %v679_v55 = vmul.f32 0.5, %v617_v4  ;;  %v620_v42 = vadd.f32 %v619_v56, %v6575_v1 }
 0x1f3   :  { %4325 = vtanh.f32 %v681_v33  ;;  %v682_v37 = vmul.f32 0.5, %v628_v19 }
 0x1f4   :  { %4327 = vtanh.f32 %v679_v55  ;;  %v680_v58 = vmul.f32 0.5, %v620_v42 }
 0x1f5   :  { %4329 = vtanh.f32 %v682_v37  ;;  %v4318_v12 = vpop.eup %4317 }
 0x1f6   :  { %4331 = vtanh.f32 %v680_v58  ;;  %v3889_v13 = vpop.f32.mrb[20].mxu1  ;;  %v4320_v62 = vpop.eup %4319  ;;  %v673_v5 = vmul.f32 0.5, %v4318_v12 }
 0x1f7   :  { %v641_v18 = vadd.f32 %v3889_v13, %v5323_v52  ;;  %v632_v27 = vpop.f32.mrb[21].mxu1  ;;  %v4322_v16 = vpop.eup %4321  ;;  %v671_v44 = vmul.f32 0.5, %v4320_v62 }
 0x1f8   :  { %v633_v48 = vadd.f32 %v632_v27, %v5245_v57  ;;  %v3890_v9 = vpop.f32.mrb[22].mxu1  ;;  %v4324_v11 = vpop.eup %4323  ;;  %v677_v39 = vadd.f32 0.5, %v673_v5  ;;  %v674_v41 = vmul.f32 0.5, %v4322_v16 }
 0x1f9   :  { %4333 = vtanh.f32 %v641_v18  ;;  %v644_v14 = vadd.f32 %v3890_v9, %v5326_v40  ;;  %v635_v22 = vpop.f32.mrb[23].mxu1  ;;  %v672_v0 = vmul.f32 0.5, %v4324_v11  ;;  %v675_v2 = vadd.f32 0.5, %v671_v44 }
 0x1fa   :  { %4335 = vtanh.f32 %v633_v48  ;;  %v636_v30 = vadd.f32 %v635_v22, %v5248_v60  ;;  %v678_v55 = vadd.f32 0.5, %v674_v41 }
 0x1fb   :  { %4337 = vtanh.f32 %v644_v14  ;;  %v676_v27 = vadd.f32 0.5, %v672_v0 }
 0x1fc   :  { %4339 = vtanh.f32 %v636_v30 }
 0x1fd   :  { %v4326_v38 = vpop.eup %4325 }
 0x1fe   :  { %v4328_v52 = vpop.eup %4327  ;;  %v689_v45 = vmul.f32 0.5, %v4326_v38  ;;  %v3893_v15 = vpop.f32.mrb[24].mxu1 }
 0x1ff   :  { %v4330_v57 = vpop.eup %4329  ;;  %v687_v17 = vmul.f32 0.5, %v4328_v52  ;;  %v657_v40 = vadd.f32 %v3893_v15, %v5479_v43  ;;  %v648_v54 = vpop.f32.mrb[25].mxu1 }
 0x200   :  { %v4332_v24 = vpop.eup %4331  ;;  %v693_v60 = vadd.f32 0.5, %v689_v45  ;;  %v690_v50 = vmul.f32 0.5, %v4330_v57  ;;  %v649_v23 = vadd.f32 %v648_v54, %v5401_v32  ;;  %v3894_v35 = vpop.f32.mrb[26].mxu1 }
 0x201   :  { %v691_v46 = vadd.f32 0.5, %v687_v17  ;;  %v688_v49 = vmul.f32 0.5, %v4332_v24  ;;  %v701_v3 = vmul.f32 0.5, %v657_v40  ;;  %v660_v36 = vadd.f32 %v3894_v35, %v5482_v51  ;;  %v651_v4 = vpop.f32.mrb[27].mxu1 }
 0x202   :  { %v694_v33 = vadd.f32 0.5, %v690_v50  ;;  %v699_v19 = vmul.f32 0.5, %v649_v23  ;;  %v652_v56 = vadd.f32 %v651_v4, %v5404_v31  ;;  %v717_v32 = vmul.f32 %v693_v60, %v5573_v28 }
 0x203   :  { %v4334_v43 = vpop.eup %4333  ;;  %v692_v1 = vadd.f32 0.5, %v688_v49  ;;  %4341 = vtanh.f32 %v701_v3  ;;  %v702_v42 = vmul.f32 0.5, %v660_v36  ;;  %v715_v51 = vmul.f32 %v691_v46, %v5575_v26  ;;  %v5669_v46 = vld [vmem:[%s6432_s3 + $0x28] sm:$0xff]   ;;  %v5676_v49 = vld [vmem:[%s6432_s3 + $0x30] sm:$0xff]   ;;  %v5683_v3 = vld [vmem:[%s6432_s3 + $0x38] sm:$0xff]  }
 0x204   :  { %v4336_v37 = vpop.eup %4335  ;;  %v721_v58 = vmul.f32 %v4334_v43, %v677_v39  ;;  %4343 = vtanh.f32 %v699_v19  ;;  %v700_v13 = vmul.f32 0.5, %v652_v56  ;;  %v718_v31 = vmul.f32 %v694_v33, %v5578_v47  ;;  %v6576_v33 = vld [vmem:[#allocation11_spill] sm:$0xff]  ;;  %v6577_v43 = vld [vmem:[#allocation42_spill] sm:$0xff] }
 0x205   :  { %v4338_v18 = vpop.eup %4337  ;;  %v719_v12 = vmul.f32 %v4336_v37, %v675_v2  ;;  %4345 = vtanh.f32 %v702_v42  ;;  %v716_v22 = vmul.f32 %v692_v1, %v5580_v63  ;;  %v6578_v37 = vld [vmem:[#allocation12_spill] sm:$0xff] }
 0x206   :  { %v4340_v48 = vpop.eup %4339  ;;  %v5645_v9 = vadd.f32 %v721_v58, %v717_v32  ;;  %v722_v14 = vmul.f32 %v4338_v18, %v678_v55  ;;  %4347 = vtanh.f32 %v700_v13 }
 0x207   :  { %v5648_v62 = vadd.f32 %v719_v12, %v715_v51  ;;  %v720_v28 = vmul.f32 %v4340_v48, %v676_v27 }
 0x208   :  { %4349 = vtanh.f32 %v5645_v9  ;;  %v5651_v30 = vadd.f32 %v722_v14, %v718_v31 }
 0x209   :  { %4351 = vtanh.f32 %v5648_v62  ;;  %v5654_v26 = vadd.f32 %v720_v28, %v716_v22 }
 0x20a   :  { %4353 = vtanh.f32 %v5651_v30 }
 0x20b   :  { %4355 = vtanh.f32 %v5654_v26 }
 0x20d   :  { %v4342_v47 = vpop.eup %4341 }
 0x20e   :  { %v4344_v16 = vpop.eup %4343  ;;  %v709_v5 = vmul.f32 0.5, %v4342_v47 }
 0x20f   :  { %v4346_v11 = vpop.eup %4345  ;;  %v707_v63 = vmul.f32 0.5, %v4344_v16  ;;  %v6580_v16 = vld [vmem:[#allocation28_spill] sm:$0xff] }
 0x210   :  { %v4348_v38 = vpop.eup %4347  ;;  %v710_v52 = vmul.f32 0.5, %v4346_v11  ;;  %v713_v44 = vadd.f32 0.5, %v709_v5 }
 0x211   :  { %v708_v45 = vmul.f32 0.5, %v4348_v38  ;;  %v711_v57 = vadd.f32 0.5, %v707_v63 }
 0x212   :  { %v4350_v15 = vpop.eup %4349  ;;  %v714_v39 = vadd.f32 0.5, %v710_v52 }
 0x213   :  { %v4352_v41 = vpop.eup %4351  ;;  %v712_v17 = vadd.f32 0.5, %v708_v45  ;;  %v733_v24 = vmul.f32 %v4350_v15, %v713_v44 }
 0x214   :  { %v4354_v40 = vpop.eup %4353  ;;  %v731_v60 = vmul.f32 %v4352_v41, %v711_v57 }
 0x215   :  { %v4356_v54 = vpop.eup %4355  ;;  %v734_v0 = vmul.f32 %v4354_v40, %v714_v39 }
 0x216   :  { %v732_v50 = vmul.f32 %v4356_v54, %v712_v17 }
 0x217   :  { %v773_v23 = vpack.c.bf16 %v734_v0, %v733_v24 }
 0x218   :  { %v772_v35 = vpack.c.bf16 %v732_v50, %v731_v60 }
 0x21a   :  { %3895 = vmatprep.subr.bf16.mxu1 %v772_v35 }
 0x21b   :  { %3896 = vmatpush3.bf16.msra.mxu1 %v772_v35 }
 0x21c   :  { %3897 = vmatprep.subr.bf16.mxu1 %v773_v23 }
 0x21f   :  { %3898 = vmatpush3.bf16.msra.mxu1 %v773_v23 }
 0x222   :  { %3900 = vmatmul.mubr.msk.bf16.vlgmr.msra.gmra.mrb[28].mxu1 %vm333_vm0, %v5588_v34 }
 0x223   :  { %3903 = vmatprep.mubr.msk.bf16.mxu1 %vm333_vm0, %v5595_v29 }
 0x22a   :  { %3904 = vmatmul.mubr.msk.bf16.gmra.mrb[32].mxu1 %vm333_vm0, %v5602_v6 }
 0x22b   :  { %3907 = vmatprep.mubr.msk.bf16.mxu1 %vm333_vm0, %v5609_v25 }
 0x232   :  { %3908 = vmatmul.mubr.msk.bf16.gmra.mrb[36].mxu1 %vm333_vm0, %v5669_v46 }
 0x233   :  { %3911 = vmatprep.mubr.msk.bf16.mxu1 %vm333_vm0, %v5676_v49 }
 0x23a   :  { %3912 = vmatmul.mubr.msk.bf16.gmra.mrb[40].mxu1 %vm333_vm0, %v5683_v3 }
 0x23b   :  { %3919 = vmatprep.mubr.msk.bf16.mxu1 %vm333_vm0, %v5622_v59 }
 0x2f5   :  { %v3901_v36 = vpop.f32.mrb[28].mxu1 }
 0x2f6   :  { %v817_v4 = vadd.f32 %v3901_v36, %v5159_v20  ;;  %v808_v2 = vpop.f32.mrb[29].mxu1  ;;  %v6579_v20 = vld [vmem:[#allocation27_spill] sm:$0xff] }
 0x2f7   :  { %v809_v19 = vadd.f32 %v808_v2, %v6576_v33  ;;  %v3902_v56 = vpop.f32.mrb[30].mxu1 }
 0x2f8   :  { %v820_v55 = vadd.f32 %v3902_v56, %v6577_v43  ;;  %v811_v1 = vpop.f32.mrb[31].mxu1  ;;  %v873_v42 = vmul.f32 0.5, %v817_v4  ;;  %v6582_v43 = vld [vmem:[#allocation83_spill] sm:$0xff] }
 0x2f9   :  { %v812_v32 = vadd.f32 %v811_v1, %v6578_v37  ;;  %v871_v58 = vmul.f32 0.5, %v809_v19 }
 0x2fa   :  { %v874_v13 = vmul.f32 0.5, %v820_v55  ;;  %4357 = vtanh.f32 %v873_v42 }
 0x2fb   :  { %v872_v18 = vmul.f32 0.5, %v812_v32  ;;  %4359 = vtanh.f32 %v871_v58  ;;  %v6583_v58 = vld [vmem:[#allocation96_spill] sm:$0xff] }
 0x2fc   :  { %4361 = vtanh.f32 %v874_v13 }
 0x2fd   :  { %v3905_v27 = vpop.f32.mrb[32].mxu1  ;;  %4363 = vtanh.f32 %v872_v18 }
 0x2fe   :  { %v833_v51 = vadd.f32 %v3905_v27, %v5205_v8  ;;  %v824_v12 = vpop.f32.mrb[33].mxu1 }
 0x2ff   :  { %v825_v48 = vadd.f32 %v824_v12, %v6579_v20  ;;  %v3906_v31 = vpop.f32.mrb[34].mxu1  ;;  %v6584_v20 = vld [vmem:[#allocation84_spill] sm:$0xff] }
 0x300   :  { %v889_v14 = vmul.f32 0.5, %v833_v51  ;;  %v836_v22 = vadd.f32 %v3906_v31, %v5208_v21  ;;  %v827_v28 = vpop.f32.mrb[35].mxu1 }
 0x301   :  { %v887_v47 = vmul.f32 0.5, %v825_v48  ;;  %v828_v5 = vadd.f32 %v827_v28, %v6580_v16 }
 0x302   :  { %4365 = vtanh.f32 %v889_v14  ;;  %v890_v11 = vmul.f32 0.5, %v836_v22 }
 0x303   :  { %4367 = vtanh.f32 %v887_v47  ;;  %v888_v63 = vmul.f32 0.5, %v828_v5 }
 0x304   :  { %4369 = vtanh.f32 %v890_v11  ;;  %v4358_v44 = vpop.eup %4357 }
 0x305   :  { %4371 = vtanh.f32 %v888_v63  ;;  %v3909_v8 = vpop.f32.mrb[36].mxu1  ;;  %v4360_v39 = vpop.eup %4359  ;;  %v881_v40 = vmul.f32 0.5, %v4358_v44 }
 0x306   :  { %v849_v38 = vadd.f32 %v3909_v8, %v5329_v61  ;;  %v840_v52 = vpop.f32.mrb[37].mxu1  ;;  %v4362_v17 = vpop.eup %4361  ;;  %v879_v0 = vmul.f32 0.5, %v4360_v39 }
 0x307   :  { %v841_v45 = vadd.f32 %v840_v52, %v5251_v10  ;;  %v3910_v15 = vpop.f32.mrb[38].mxu1  ;;  %v4364_v54 = vpop.eup %4363  ;;  %v885_v23 = vadd.f32 0.5, %v881_v40  ;;  %v882_v35 = vmul.f32 0.5, %v4362_v17 }
 0x308   :  { %4373 = vtanh.f32 %v849_v38  ;;  %v852_v21 = vadd.f32 %v3910_v15, %v5332_v7  ;;  %v843_v57 = vpop.f32.mrb[39].mxu1  ;;  %v6581_v7 = vld [vmem:[#allocation95_spill] sm:$0xff]  ;;  %v880_v19 = vmul.f32 0.5, %v4364_v54  ;;  %v883_v27 = vadd.f32 0.5, %v879_v0 }
 0x309   :  { %4375 = vtanh.f32 %v841_v45  ;;  %v844_v41 = vadd.f32 %v843_v57, %v5254_v53  ;;  %v886_v14 = vadd.f32 0.5, %v882_v35 }
 0x30a   :  { %4377 = vtanh.f32 %v852_v21  ;;  %v884_v8 = vadd.f32 0.5, %v880_v19 }
 0x30b   :  { %4379 = vtanh.f32 %v844_v41 }
 0x30c   :  { %v4366_v24 = vpop.eup %4365 }
 0x30d   :  { %v4368_v61 = vpop.eup %4367  ;;  %v897_v60 = vmul.f32 0.5, %v4366_v24  ;;  %v3913_v50 = vpop.f32.mrb[40].mxu1 }
 0x30e   :  { %v4370_v10 = vpop.eup %4369  ;;  %v895_v36 = vmul.f32 0.5, %v4368_v61  ;;  %v865_v4 = vadd.f32 %v3913_v50, %v6581_v7  ;;  %v856_v2 = vpop.f32.mrb[41].mxu1 }
 0x30f   :  { %v4372_v33 = vpop.eup %4371  ;;  %v901_v53 = vadd.f32 0.5, %v897_v60  ;;  %v898_v56 = vmul.f32 0.5, %v4370_v10  ;;  %v857_v55 = vadd.f32 %v856_v2, %v6582_v43  ;;  %v3914_v1 = vpop.f32.mrb[42].mxu1 }
 0x310   :  { %v899_v42 = vadd.f32 0.5, %v895_v36  ;;  %v896_v37 = vmul.f32 0.5, %v4372_v33  ;;  %v909_v32 = vmul.f32 0.5, %v865_v4  ;;  %v868_v13 = vadd.f32 %v3914_v1, %v6583_v58  ;;  %v859_v18 = vpop.f32.mrb[43].mxu1  ;;  %v6585_v1 = vld [vmem:[#allocation43_spill] sm:$0xff] }
 0x311   :  { %v902_v51 = vadd.f32 0.5, %v898_v56  ;;  %v907_v12 = vmul.f32 0.5, %v857_v55  ;;  %v860_v48 = vadd.f32 %v859_v18, %v6584_v20  ;;  %v925_v16 = vmul.f32 %v901_v53, %v5645_v9  ;;  %v6587_v18 = vld [vmem:[#allocation44_spill] sm:$0xff]  ;;  %v6588_v20 = vld [vmem:[#allocation14_spill] sm:$0xff] }
 0x312   :  { %v4374_v31 = vpop.eup %4373  ;;  %v900_v22 = vadd.f32 0.5, %v896_v37  ;;  %4381 = vtanh.f32 %v909_v32  ;;  %v910_v28 = vmul.f32 0.5, %v868_v13  ;;  %v923_v38 = vmul.f32 %v899_v42, %v5648_v62  ;;  %v6586_v32 = vld [vmem:[#allocation13_spill] sm:$0xff] }
 0x313   :  { %v4376_v47 = vpop.eup %4375  ;;  %v929_v5 = vmul.f32 %v4374_v31, %v885_v23  ;;  %4383 = vtanh.f32 %v907_v12  ;;  %v908_v11 = vmul.f32 0.5, %v860_v48  ;;  %v926_v45 = vmul.f32 %v902_v51, %v5651_v30 }
 0x314   :  { %v4378_v63 = vpop.eup %4377  ;;  %v927_v52 = vmul.f32 %v4376_v47, %v883_v27  ;;  %4385 = vtanh.f32 %v910_v28  ;;  %v924_v57 = vmul.f32 %v900_v22, %v5654_v26  ;;  %v6589_v47 = vld [vmem:[#allocation53_spill] sm:$0xff] }
 0x315   :  { %v4380_v44 = vpop.eup %4379  ;;  %v5708_v15 = vadd.f32 %v929_v5, %v925_v16  ;;  %v930_v21 = vmul.f32 %v4378_v63, %v886_v14  ;;  %4387 = vtanh.f32 %v908_v11  ;;  %v6590_v11 = vld [vmem:[#allocation29_spill] sm:$0xff] }
 0x316   :  { %v5711_v39 = vadd.f32 %v927_v52, %v923_v38  ;;  %v928_v9 = vmul.f32 %v4380_v44, %v884_v8  ;;  %v6591_v52 = vld [vmem:[#allocation54_spill] sm:$0xff] }
 0x317   :  { %4389 = vtanh.f32 %v5708_v15  ;;  %v5714_v41 = vadd.f32 %v930_v21, %v926_v45 }
 0x318   :  { %4391 = vtanh.f32 %v5711_v39  ;;  %v5717_v62 = vadd.f32 %v928_v9, %v924_v57  ;;  %v6592_v57 = vld [vmem:[#allocation30_spill] sm:$0xff] }
 0x319   :  { %4393 = vtanh.f32 %v5714_v41 }
 0x31a   :  { %4395 = vtanh.f32 %v5717_v62 }
 0x31c   :  { %v4382_v30 = vpop.eup %4381 }
 0x31d   :  { %v4384_v17 = vpop.eup %4383  ;;  %v917_v40 = vmul.f32 0.5, %v4382_v30 }
 0x31e   :  { %v4386_v54 = vpop.eup %4385  ;;  %v915_v26 = vmul.f32 0.5, %v4384_v17 }
 0x31f   :  { %v4388_v24 = vpop.eup %4387  ;;  %v918_v61 = vmul.f32 0.5, %v4386_v54  ;;  %v921_v0 = vadd.f32 0.5, %v917_v40  ;;  %v6593_v54 = vld [vmem:[#allocation73_spill] sm:$0xff] }
 0x320   :  { %v916_v60 = vmul.f32 0.5, %v4388_v24  ;;  %v919_v10 = vadd.f32 0.5, %v915_v26 }
 0x321   :  { %v4390_v50 = vpop.eup %4389  ;;  %v922_v23 = vadd.f32 0.5, %v918_v61 }
 0x322   :  { %v4392_v35 = vpop.eup %4391  ;;  %v920_v36 = vadd.f32 0.5, %v916_v60  ;;  %v941_v2 = vmul.f32 %v4390_v50, %v921_v0  ;;  %v6594_v0 = vld [vmem:[#allocation63_spill] sm:$0xff] }
 0x323   :  { %v4394_v7 = vpop.eup %4393  ;;  %v939_v19 = vmul.f32 %v4392_v35, %v919_v10  ;;  %v6595_v10 = vld [vmem:[#allocation74_spill] sm:$0xff] }
 0x324   :  { %v4396_v4 = vpop.eup %4395  ;;  %v942_v33 = vmul.f32 %v4394_v7, %v922_v23  ;;  %v6596_v7 = vld [vmem:[#allocation64_spill] sm:$0xff] }
 0x325   :  { %v940_v53 = vmul.f32 %v4396_v4, %v920_v36 }
 0x326   :  { %v981_v56 = vpack.c.bf16 %v942_v33, %v941_v2 }
 0x327   :  { %v980_v43 = vpack.c.bf16 %v940_v53, %v939_v19 }
 0x329   :  { %3915 = vmatprep.subr.bf16.mxu1 %v980_v43 }
 0x32a   :  { %3916 = vmatpush3.bf16.msra.mxu1 %v980_v43 }
 0x32b   :  { %3917 = vmatprep.subr.bf16.mxu1 %v981_v56 }
 0x32e   :  { %3918 = vmatpush3.bf16.msra.mxu1 %v981_v56 }
 0x331   :  { %3920 = vmatmul.mubr.msk.bf16.vlgmr.msra.gmra.mrb[44].mxu1 %vm333_vm0, %v5588_v34 }
 0x332   :  { %3923 = vmatprep.mubr.msk.bf16.mxu1 %vm333_vm0, %v5595_v29 }
 0x339   :  { %3924 = vmatmul.mubr.msk.bf16.gmra.mrb[48].mxu1 %vm333_vm0, %v5602_v6 }
 0x33a   :  { %3927 = vmatprep.mubr.msk.bf16.mxu1 %vm333_vm0, %v5609_v25 }
 0x341   :  { %3928 = vmatmul.mubr.msk.bf16.gmra.mrb[52].mxu1 %vm333_vm0, %v5669_v46 }
 0x342   :  { %3931 = vmatprep.mubr.msk.bf16.mxu1 %vm333_vm0, %v5676_v49 }
 0x349   :  { %3932 = vmatmul.mubr.msk.bf16.gmra.mrb[56].mxu1 %vm333_vm0, %v5683_v3 }
 0x34a   :  { %3959 = vmatprep.mubr.msk.bf16.mxu1 %vm333_vm0, %v5622_v59 }
 0x404   :  { %v3921_v55 = vpop.f32.mrb[44].mxu1 }
 0x405   :  { %v1025_v42 = vadd.f32 %v3921_v55, %v6585_v1  ;;  %v1016_v37 = vpop.f32.mrb[45].mxu1 }
 0x406   :  { %v1017_v58 = vadd.f32 %v1016_v37, %v6586_v32  ;;  %v3922_v13 = vpop.f32.mrb[46].mxu1 }
 0x407   :  { %v1028_v27 = vadd.f32 %v3922_v13, %v6587_v18  ;;  %v1019_v51 = vpop.f32.mrb[47].mxu1  ;;  %v1081_v12 = vmul.f32 0.5, %v1025_v42  ;;  %v6597_v13 = vld [vmem:[#allocation97_spill] sm:$0xff] }
 0x408   :  { %v1020_v48 = vadd.f32 %v1019_v51, %v6588_v20  ;;  %v1079_v31 = vmul.f32 0.5, %v1017_v58 }
 0x409   :  { %v1082_v14 = vmul.f32 0.5, %v1028_v27  ;;  %4397 = vtanh.f32 %v1081_v12 }
 0x40a   :  { %v1080_v22 = vmul.f32 0.5, %v1020_v48  ;;  %4399 = vtanh.f32 %v1079_v31  ;;  %v6598_v31 = vld [vmem:[#allocation85_spill] sm:$0xff] }
 0x40b   :  { %4401 = vtanh.f32 %v1082_v14 }
 0x40c   :  { %v3925_v28 = vpop.f32.mrb[48].mxu1  ;;  %4403 = vtanh.f32 %v1080_v22 }
 0x40d   :  { %v1041_v16 = vadd.f32 %v3925_v28, %v6589_v47  ;;  %v1032_v5 = vpop.f32.mrb[49].mxu1 }
 0x40e   :  { %v1033_v63 = vadd.f32 %v1032_v5, %v6590_v11  ;;  %v3926_v8 = vpop.f32.mrb[50].mxu1  ;;  %v6599_v5 = vld [vmem:[#allocation98_spill] sm:$0xff] }
 0x40f   :  { %v1097_v38 = vmul.f32 0.5, %v1041_v16  ;;  %v1044_v44 = vadd.f32 %v3926_v8, %v6591_v52  ;;  %v1035_v45 = vpop.f32.mrb[51].mxu1 }
 0x410   :  { %v1095_v21 = vmul.f32 0.5, %v1033_v63  ;;  %v1036_v9 = vadd.f32 %v1035_v45, %v6592_v57 }
 0x411   :  { %4405 = vtanh.f32 %v1097_v38  ;;  %v1098_v30 = vmul.f32 0.5, %v1044_v44  ;;  %v6600_v44 = vld [vmem:[#allocation86_spill] sm:$0xff] }
 0x412   :  { %4407 = vtanh.f32 %v1095_v21  ;;  %v1096_v17 = vmul.f32 0.5, %v1036_v9 }
 0x413   :  { %4409 = vtanh.f32 %v1098_v30  ;;  %v4398_v61 = vpop.eup %4397 }
 0x414   :  { %4411 = vtanh.f32 %v1096_v17  ;;  %v3929_v40 = vpop.f32.mrb[52].mxu1  ;;  %v4400_v36 = vpop.eup %4399  ;;  %v1089_v33 = vmul.f32 0.5, %v4398_v61 }
 0x415   :  { %v1057_v26 = vadd.f32 %v3929_v40, %v6593_v54  ;;  %v1048_v24 = vpop.f32.mrb[53].mxu1  ;;  %v4402_v2 = vpop.eup %4401  ;;  %v1087_v43 = vmul.f32 0.5, %v4400_v36 }
 0x416   :  { %v1049_v60 = vadd.f32 %v1048_v24, %v6594_v0  ;;  %v3930_v50 = vpop.f32.mrb[54].mxu1  ;;  %v4404_v19 = vpop.eup %4403  ;;  %v1093_v37 = vadd.f32 0.5, %v1089_v33  ;;  %v1090_v32 = vmul.f32 0.5, %v4402_v2 }
 0x417   :  { %4413 = vtanh.f32 %v1057_v26  ;;  %v1060_v23 = vadd.f32 %v3930_v50, %v6595_v10  ;;  %v1051_v35 = vpop.f32.mrb[55].mxu1  ;;  %v1088_v12 = vmul.f32 0.5, %v4404_v19  ;;  %v1091_v8 = vadd.f32 0.5, %v1087_v43 }
 0x418   :  { %4415 = vtanh.f32 %v1049_v60  ;;  %v1052_v4 = vadd.f32 %v1051_v35, %v6596_v7  ;;  %v1094_v57 = vadd.f32 0.5, %v1090_v32 }
 0x419   :  { %4417 = vtanh.f32 %v1060_v23  ;;  %v1092_v61 = vadd.f32 0.5, %v1088_v12 }
 0x41a   :  { %4419 = vtanh.f32 %v1052_v4 }
 0x41b   :  { %v4406_v53 = vpop.eup %4405 }
 0x41c   :  { %v4408_v56 = vpop.eup %4407  ;;  %v1105_v55 = vmul.f32 0.5, %v4406_v53  ;;  %v3933_v1 = vpop.f32.mrb[56].mxu1 }
 0x41d   :  { %v4410_v42 = vpop.eup %4409  ;;  %v1103_v58 = vmul.f32 0.5, %v4408_v56  ;;  %v1073_v18 = vadd.f32 %v3933_v1, %v6597_v13  ;;  %v1064_v27 = vpop.f32.mrb[57].mxu1 }
 0x41e   :  { %v4412_v51 = vpop.eup %4411  ;;  %v1109_v20 = vadd.f32 0.5, %v1105_v55  ;;  %v1106_v48 = vmul.f32 0.5, %v4410_v42  ;;  %v1065_v14 = vadd.f32 %v1064_v27, %v6598_v31  ;;  %v3934_v22 = vpop.f32.mrb[58].mxu1 }
 0x41f   :  { %v1107_v28 = vadd.f32 0.5, %v1103_v58  ;;  %v1104_v47 = vmul.f32 0.5, %v4412_v51  ;;  %v1117_v16 = vmul.f32 0.5, %v1073_v18  ;;  %v1076_v11 = vadd.f32 %v3934_v22, %v6599_v5  ;;  %v1067_v63 = vpop.f32.mrb[59].mxu1 }
 0x420   :  { %v1110_v38 = vadd.f32 0.5, %v1106_v48  ;;  %v1115_v52 = vmul.f32 0.5, %v1065_v14  ;;  %v1068_v45 = vadd.f32 %v1067_v63, %v6600_v44  ;;  %v1133_v40 = vmul.f32 %v1109_v20, %v5708_v15  ;;  %v6604_v63 = vld [vmem:[#allocation16_spill] sm:$0xff] }
 0x421   :  { %v4414_v21 = vpop.eup %4413  ;;  %v1108_v9 = vadd.f32 0.5, %v1104_v47  ;;  %4421 = vtanh.f32 %v1117_v16  ;;  %v1118_v30 = vmul.f32 0.5, %v1076_v11  ;;  %v1131_v0 = vmul.f32 %v1107_v28, %v5711_v39 }
 0x422   :  { %v4416_v17 = vpop.eup %4415  ;;  %v1137_v54 = vmul.f32 %v4414_v21, %v1093_v37  ;;  %4423 = vtanh.f32 %v1115_v52  ;;  %v1116_v26 = vmul.f32 0.5, %v1068_v45  ;;  %v1134_v10 = vmul.f32 %v1110_v38, %v5714_v41  ;;  %v6605_v21 = vld [vmem:[#allocation55_spill] sm:$0xff] }
 0x423   :  { %v4418_v24 = vpop.eup %4417  ;;  %v1135_v60 = vmul.f32 %v4416_v17, %v1091_v8  ;;  %4425 = vtanh.f32 %v1118_v30  ;;  %v1132_v36 = vmul.f32 %v1108_v9, %v5717_v62  ;;  %v6606_v9 = vld [vmem:[#allocation31_spill] sm:$0xff] }
 0x424   :  { %v4420_v50 = vpop.eup %4419  ;;  %v5756_v23 = vadd.f32 %v1137_v54, %v1133_v40  ;;  %v1138_v35 = vmul.f32 %v4418_v24, %v1094_v57  ;;  %4427 = vtanh.f32 %v1116_v26  ;;  %v6607_v54 = vld [vmem:[#allocation56_spill] sm:$0xff] }
 0x425   :  { %v5759_v7 = vadd.f32 %v1135_v60, %v1131_v0  ;;  %v1136_v15 = vmul.f32 %v4420_v50, %v1092_v61  ;;  %v6608_v0 = vld [vmem:[#allocation32_spill] sm:$0xff] }
 0x426   :  { %4429 = vtanh.f32 %v5756_v23  ;;  %v5762_v4 = vadd.f32 %v1138_v35, %v1134_v10 }
 0x427   :  { %4431 = vtanh.f32 %v5759_v7  ;;  %v5765_v39 = vadd.f32 %v1136_v15, %v1132_v36  ;;  %v6609_v36 = vld [vmem:[#allocation75_spill] sm:$0xff] }
 0x428   :  { %4433 = vtanh.f32 %v5762_v4 }
 0x429   :  { %4435 = vtanh.f32 %v5765_v39 }
 0x42b   :  { %v4422_v41 = vpop.eup %4421 }
 0x42c   :  { %v4424_v2 = vpop.eup %4423  ;;  %v1125_v33 = vmul.f32 0.5, %v4422_v41 }
 0x42d   :  { %v4426_v19 = vpop.eup %4425  ;;  %v1123_v62 = vmul.f32 0.5, %v4424_v2 }
 0x42e   :  { %v4428_v53 = vpop.eup %4427  ;;  %v1126_v56 = vmul.f32 0.5, %v4426_v19  ;;  %v1129_v43 = vadd.f32 0.5, %v1125_v33  ;;  %v6610_v33 = vld [vmem:[#allocation65_spill] sm:$0xff] }
 0x42f   :  { %v1124_v55 = vmul.f32 0.5, %v4428_v53  ;;  %v1127_v42 = vadd.f32 0.5, %v1123_v62  ;;  %v6611_v53 = vld [vmem:[#allocation76_spill] sm:$0xff] }
 0x430   :  { %v4430_v1 = vpop.eup %4429  ;;  %v1130_v37 = vadd.f32 0.5, %v1126_v56 }
 0x431   :  { %v4432_v32 = vpop.eup %4431  ;;  %v1128_v58 = vadd.f32 0.5, %v1124_v55  ;;  %v1149_v27 = vmul.f32 %v4430_v1, %v1129_v43  ;;  %v6612_v1 = vld [vmem:[#allocation66_spill] sm:$0xff] }
 0x432   :  { %v4434_v13 = vpop.eup %4433  ;;  %v1147_v12 = vmul.f32 %v4432_v32, %v1127_v42 }
 0x433   :  { %v4436_v18 = vpop.eup %4435  ;;  %v1150_v51 = vmul.f32 %v4434_v13, %v1130_v37 }
 0x434   :  { %v1148_v20 = vmul.f32 %v4436_v18, %v1128_v58 }
 0x435   :  { %v1189_v48 = vpack.c.bf16 %v1150_v51, %v1149_v27 }
 0x436   :  { %v1188_v31 = vpack.c.bf16 %v1148_v20, %v1147_v12 }
 0x438   :  { %3935 = vmatprep.subr.bf16.mxu0 %v1188_v31 }
 0x439   :  { %3936 = vmatpush3.bf16.msra.mxu0 %v1188_v31 }
 0x43a   :  { %3937 = vmatprep.subr.bf16.mxu0 %v1189_v48 }
 0x43d   :  { %3938 = vmatpush3.bf16.msra.mxu0 %v1189_v48 }
 0x440   :  { %3940 = vmatmul.mubr.msk.bf16.vlgmr.msra.gmra.mrb[4].mxu0 %vm333_vm0, %v5588_v34 }
 0x441   :  { %3943 = vmatprep.mubr.msk.bf16.mxu0 %vm333_vm0, %v5595_v29  ;;  %v6601_v29 = vld [vmem:[#allocation45_spill] sm:$0xff] }
 0x448   :  { %3944 = vmatmul.mubr.msk.bf16.gmra.mrb[8].mxu0 %vm333_vm0, %v5602_v6  ;;  %v6602_v6 = vld [vmem:[#allocation15_spill] sm:$0xff] }
 0x449   :  { %3947 = vmatprep.mubr.msk.bf16.mxu0 %vm333_vm0, %v5609_v25  ;;  %v6603_v25 = vld [vmem:[#allocation46_spill] sm:$0xff] }
 0x450   :  { %3948 = vmatmul.mubr.msk.bf16.gmra.mrb[12].mxu0 %vm333_vm0, %v5669_v46 }
 0x451   :  { %3951 = vmatprep.mubr.msk.bf16.mxu0 %vm333_vm0, %v5676_v49 }
 0x458   :  { %3952 = vmatmul.mubr.msk.bf16.gmra.mrb[16].mxu0 %vm333_vm0, %v5683_v3 }
 0x459   :  { %3979 = vmatprep.mubr.msk.bf16.mxu0 %vm333_vm0, %v5622_v59 }
 0x513   :  { %v3941_v34 = vpop.f32.mrb[4].mxu0 }
 0x514   :  { %v1233_v14 = vadd.f32 %v3941_v34, %v6601_v29  ;;  %v1224_v22 = vpop.f32.mrb[5].mxu0  ;;  %v6613_v29 = vld [vmem:[#allocation99_spill] sm:$0xff] }
 0x515   :  { %v1225_v28 = vadd.f32 %v1224_v22, %v6602_v6  ;;  %v3942_v47 = vpop.f32.mrb[6].mxu0 }
 0x516   :  { %v1236_v16 = vadd.f32 %v3942_v47, %v6603_v25  ;;  %v1227_v5 = vpop.f32.mrb[7].mxu0  ;;  %v1289_v11 = vmul.f32 0.5, %v1233_v14 }
 0x517   :  { %v1228_v8 = vadd.f32 %v1227_v5, %v6604_v63  ;;  %v1287_v38 = vmul.f32 0.5, %v1225_v28 }
 0x518   :  { %v1290_v52 = vmul.f32 0.5, %v1236_v16  ;;  %4437 = vtanh.f32 %v1289_v11  ;;  %v6614_v16 = vld [vmem:[#allocation87_spill] sm:$0xff] }
 0x519   :  { %v1288_v44 = vmul.f32 0.5, %v1228_v8  ;;  %4439 = vtanh.f32 %v1287_v38 }
 0x51a   :  { %4441 = vtanh.f32 %v1290_v52  ;;  %v6615_v52 = vld [vmem:[#allocation100_spill] sm:$0xff] }
 0x51b   :  { %v3945_v45 = vpop.f32.mrb[8].mxu0  ;;  %4443 = vtanh.f32 %v1288_v44 }
 0x51c   :  { %v1249_v59 = vadd.f32 %v3945_v45, %v6605_v21  ;;  %v1240_v57 = vpop.f32.mrb[9].mxu0 }
 0x51d   :  { %v1241_v30 = vadd.f32 %v1240_v57, %v6606_v9  ;;  %v3946_v17 = vpop.f32.mrb[10].mxu0  ;;  %v6616_v9 = vld [vmem:[#allocation88_spill] sm:$0xff] }
 0x51e   :  { %v1305_v40 = vmul.f32 0.5, %v1249_v59  ;;  %v1252_v26 = vadd.f32 %v3946_v17, %v6607_v54  ;;  %v1243_v24 = vpop.f32.mrb[11].mxu0 }
 0x51f   :  { %v1303_v61 = vmul.f32 0.5, %v1241_v30  ;;  %v1244_v60 = vadd.f32 %v1243_v24, %v6608_v0 }
 0x520   :  { %4445 = vtanh.f32 %v1305_v40  ;;  %v1306_v50 = vmul.f32 0.5, %v1252_v26 }
 0x521   :  { %4447 = vtanh.f32 %v1303_v61  ;;  %v1304_v10 = vmul.f32 0.5, %v1244_v60 }
 0x522   :  { %4449 = vtanh.f32 %v1306_v50  ;;  %v4438_v2 = vpop.eup %4437 }
 0x523   :  { %4451 = vtanh.f32 %v1304_v10  ;;  %v3949_v35 = vpop.f32.mrb[12].mxu0  ;;  %v4440_v55 = vpop.eup %4439  ;;  %v1297_v32 = vmul.f32 0.5, %v4438_v2 }
 0x524   :  { %v1265_v15 = vadd.f32 %v3949_v35, %v6609_v36  ;;  %v1256_v41 = vpop.f32.mrb[13].mxu0  ;;  %v4442_v37 = vpop.eup %4441  ;;  %v1295_v27 = vmul.f32 0.5, %v4440_v55 }
 0x525   :  { %v1257_v19 = vadd.f32 %v1256_v41, %v6610_v33  ;;  %v3950_v62 = vpop.f32.mrb[14].mxu0  ;;  %v4444_v58 = vpop.eup %4443  ;;  %v1301_v48 = vadd.f32 0.5, %v1297_v32  ;;  %v1298_v31 = vmul.f32 0.5, %v4442_v37 }
 0x526   :  { %4453 = vtanh.f32 %v1265_v15  ;;  %v1268_v56 = vadd.f32 %v3950_v62, %v6611_v53  ;;  %v1259_v43 = vpop.f32.mrb[15].mxu0  ;;  %v1296_v28 = vmul.f32 0.5, %v4444_v58  ;;  %v1299_v21 = vadd.f32 0.5, %v1295_v27 }
 0x527   :  { %4455 = vtanh.f32 %v1257_v19  ;;  %v1260_v42 = vadd.f32 %v1259_v43, %v6612_v1  ;;  %v1302_v40 = vadd.f32 0.5, %v1298_v31 }
 0x528   :  { %4457 = vtanh.f32 %v1268_v56  ;;  %v1300_v10 = vadd.f32 0.5, %v1296_v28  ;;  %v5827_v28 = vld [vmem:[%s6432_s3 + $0x10] sm:$0xff]  }
 0x529   :  { %4459 = vtanh.f32 %v1260_v42 }
 0x52a   :  { %v4446_v13 = vpop.eup %4445 }
 0x52b   :  { %v4448_v18 = vpop.eup %4447  ;;  %v1313_v51 = vmul.f32 0.5, %v4446_v13  ;;  %v3953_v12 = vpop.f32.mrb[16].mxu0 }
 0x52c   :  { %v4450_v20 = vpop.eup %4449  ;;  %v1311_v34 = vmul.f32 0.5, %v4448_v18  ;;  %v1281_v14 = vadd.f32 %v3953_v12, %v6613_v29  ;;  %v1272_v22 = vpop.f32.mrb[17].mxu0 }
 0x52d   :  { %v4452_v6 = vpop.eup %4451  ;;  %v1317_v47 = vadd.f32 0.5, %v1313_v51  ;;  %v1314_v25 = vmul.f32 0.5, %v4450_v20  ;;  %v1273_v5 = vadd.f32 %v1272_v22, %v6614_v16  ;;  %v3954_v11 = vpop.f32.mrb[18].mxu0  ;;  %v4613_v16 = vld [vmem:[%s6432_s3] sm:$0xff]  }
 0x52e   :  { %v1315_v63 = vadd.f32 0.5, %v1311_v34  ;;  %v1312_v8 = vmul.f32 0.5, %v4452_v6  ;;  %v1325_v38 = vmul.f32 0.5, %v1281_v14  ;;  %v1284_v44 = vadd.f32 %v3954_v11, %v6615_v52  ;;  %v1275_v45 = vpop.f32.mrb[19].mxu0  ;;  %v5820_v6 = vld [vmem:[%s6432_s3 + $0x8] sm:$0xff]   ;;  %v6617_v11 = vld [vmem:[#allocation47_spill] sm:$0xff] }
 0x52f   :  { %v1318_v59 = vadd.f32 0.5, %v1314_v25  ;;  %v1323_v57 = vmul.f32 0.5, %v1273_v5  ;;  %v1276_v30 = vadd.f32 %v1275_v45, %v6616_v9  ;;  %v1341_v61 = vmul.f32 %v1317_v47, %v5756_v23  ;;  %v5834_v47 = vld [vmem:[%s6432_s3 + $0x18] sm:$0xff]   ;;  %v5841_v25 = vld [vmem:[%s6432_s3 + $0x20] sm:$0xff]  }
 0x530   :  { %v4454_v17 = vpop.eup %4453  ;;  %v1316_v54 = vadd.f32 0.5, %v1312_v8  ;;  %4461 = vtanh.f32 %v1325_v38  ;;  %v1326_v26 = vmul.f32 0.5, %v1284_v44  ;;  %v1339_v35 = vmul.f32 %v1315_v63, %v5759_v7  ;;  %v6618_v38 = vld [vmem:[#allocation17_spill] sm:$0xff] }
 0x531   :  { %v4456_v24 = vpop.eup %4455  ;;  %v1345_v0 = vmul.f32 %v4454_v17, %v1301_v48  ;;  %4463 = vtanh.f32 %v1323_v57  ;;  %v1324_v60 = vmul.f32 0.5, %v1276_v30  ;;  %v1342_v41 = vmul.f32 %v1318_v59, %v5762_v4  ;;  %v6620_v59 = vld [vmem:[#allocation18_spill] sm:$0xff] }
 0x532   :  { %v4458_v50 = vpop.eup %4457  ;;  %v1343_v36 = vmul.f32 %v4456_v24, %v1299_v21  ;;  %4465 = vtanh.f32 %v1326_v26  ;;  %v1340_v19 = vmul.f32 %v1316_v54, %v5765_v39  ;;  %v6622_v24 = vld [vmem:[#allocation33_spill] sm:$0xff] }
 0x533   :  { %v4460_v15 = vpop.eup %4459  ;;  %v5804_v2 = vadd.f32 %v1345_v0, %v1341_v61  ;;  %v1346_v33 = vmul.f32 %v4458_v50, %v1302_v40  ;;  %4467 = vtanh.f32 %v1324_v60  ;;  %v6621_v40 = vld [vmem:[#allocation57_spill] sm:$0xff]  ;;  %v6623_v50 = vld [vmem:[#allocation58_spill] sm:$0xff] }
 0x534   :  { %v5807_v62 = vadd.f32 %v1343_v36, %v1339_v35  ;;  %v1344_v23 = vmul.f32 %v4460_v15, %v1300_v10  ;;  %v6624_v15 = vld [vmem:[#allocation34_spill] sm:$0xff] }
 0x535   :  { %4469 = vtanh.f32 %v5804_v2  ;;  %v5810_v53 = vadd.f32 %v1346_v33, %v1342_v41 }
 0x536   :  { %4471 = vtanh.f32 %v5807_v62  ;;  %v5813_v7 = vadd.f32 %v1344_v23, %v1340_v19 }
 0x537   :  { %4473 = vtanh.f32 %v5810_v53 }
 0x538   :  { %4475 = vtanh.f32 %v5813_v7 }
 0x53a   :  { %v4462_v4 = vpop.eup %4461 }
 0x53b   :  { %v4464_v56 = vpop.eup %4463  ;;  %v1333_v43 = vmul.f32 0.5, %v4462_v4  ;;  %v6625_v4 = vld [vmem:[#allocation77_spill] sm:$0xff] }
 0x53c   :  { %v4466_v55 = vpop.eup %4465  ;;  %v1331_v39 = vmul.f32 0.5, %v4464_v56 }
 0x53d   :  { %v4468_v1 = vpop.eup %4467  ;;  %v1334_v42 = vmul.f32 0.5, %v4466_v55  ;;  %v1337_v37 = vadd.f32 0.5, %v1333_v43 }
 0x53e   :  { %v1332_v32 = vmul.f32 0.5, %v4468_v1  ;;  %v1335_v13 = vadd.f32 0.5, %v1331_v39  ;;  %v6626_v39 = vld [vmem:[#allocation67_spill] sm:$0xff] }
 0x53f   :  { %v4470_v58 = vpop.eup %4469  ;;  %v1338_v18 = vadd.f32 0.5, %v1334_v42 }
 0x540   :  { %v4472_v27 = vpop.eup %4471  ;;  %v1336_v51 = vadd.f32 0.5, %v1332_v32  ;;  %v1357_v48 = vmul.f32 %v4470_v58, %v1337_v37  ;;  %v6627_v37 = vld [vmem:[#allocation78_spill] sm:$0xff] }
 0x541   :  { %v4474_v12 = vpop.eup %4473  ;;  %v1355_v34 = vmul.f32 %v4472_v27, %v1335_v13 }
 0x542   :  { %v4476_v20 = vpop.eup %4475  ;;  %v1358_v31 = vmul.f32 %v4474_v12, %v1338_v18  ;;  %v6628_v18 = vld [vmem:[#allocation68_spill] sm:$0xff] }
 0x543   :  { %v1356_v29 = vmul.f32 %v4476_v20, %v1336_v51 }
 0x544   :  { %v1397_v14 = vpack.c.bf16 %v1358_v31, %v1357_v48 }
 0x545   :  { %v1396_v22 = vpack.c.bf16 %v1356_v29, %v1355_v34 }
 0x547   :  { %3955 = vmatprep.subr.bf16.mxu1 %v1396_v22 }
 0x548   :  { %3956 = vmatpush3.bf16.msra.mxu1 %v1396_v22 }
 0x549   :  { %3957 = vmatprep.subr.bf16.mxu1 %v1397_v14 }
 0x54c   :  { %3958 = vmatpush3.bf16.msra.mxu1 %v1397_v14 }
 0x54f   :  { %3960 = vmatmul.mubr.msk.bf16.vlgmr.msra.gmra.mrb[60].mxu1 %vm333_vm0, %v5820_v6 }
 0x550   :  { %3963 = vmatprep.mubr.msk.bf16.mxu1 %vm333_vm0, %v5827_v28 }
 0x557   :  { %3964 = vmatmul.mubr.msk.bf16.gmra.mrb[64].mxu1 %vm333_vm0, %v5834_v47 }
 0x558   :  { %3967 = vmatprep.mubr.msk.bf16.mxu1 %vm333_vm0, %v5841_v25 }
 0x55f   :  { %3968 = vmatmul.mubr.msk.bf16.gmra.mrb[68].mxu1 %vm333_vm0, %v5669_v46  ;;  %v6619_v46 = vld [vmem:[#allocation48_spill] sm:$0xff] }
 0x560   :  { %3971 = vmatprep.mubr.msk.bf16.mxu1 %vm333_vm0, %v5676_v49 }
 0x567   :  { %3972 = vmatmul.mubr.msk.bf16.gmra.mrb[72].mxu1 %vm333_vm0, %v5683_v3 }
 0x568   :  { %3999 = vmatprep.mubr.msk.bf16.mxu1 %vm333_vm0, %v4613_v16 }
 0x622   :  { %v3961_v5 = vpop.f32.mrb[60].mxu1 }
 0x623   :  { %v1441_v63 = vadd.f32 %v3961_v5, %v6617_v11  ;;  %v1432_v8 = vpop.f32.mrb[61].mxu1 }
 0x624   :  { %v1433_v52 = vadd.f32 %v1432_v8, %v6618_v38  ;;  %v3962_v44 = vpop.f32.mrb[62].mxu1 }
 0x625   :  { %v1444_v45 = vadd.f32 %v3962_v44, %v6619_v46  ;;  %v1435_v21 = vpop.f32.mrb[63].mxu1  ;;  %v1497_v49 = vmul.f32 0.5, %v1441_v63  ;;  %v6629_v63 = vld [vmem:[#allocation101_spill] sm:$0xff] }
 0x626   :  { %v1436_v57 = vadd.f32 %v1435_v21, %v6620_v59  ;;  %v1495_v3 = vmul.f32 0.5, %v1433_v52  ;;  %v6630_v21 = vld [vmem:[#allocation89_spill] sm:$0xff] }
 0x627   :  { %v1498_v9 = vmul.f32 0.5, %v1444_v45  ;;  %4477 = vtanh.f32 %v1497_v49 }
 0x628   :  { %v1496_v30 = vmul.f32 0.5, %v1436_v57  ;;  %4479 = vtanh.f32 %v1495_v3 }
 0x629   :  { %4481 = vtanh.f32 %v1498_v9 }
 0x62a   :  { %v3965_v17 = vpop.f32.mrb[64].mxu1  ;;  %4483 = vtanh.f32 %v1496_v30  ;;  %v6631_v30 = vld [vmem:[#allocation102_spill] sm:$0xff] }
 0x62b   :  { %v1457_v54 = vadd.f32 %v3965_v17, %v6621_v40  ;;  %v1448_v26 = vpop.f32.mrb[65].mxu1 }
 0x62c   :  { %v1449_v61 = vadd.f32 %v1448_v26, %v6622_v24  ;;  %v3966_v0 = vpop.f32.mrb[66].mxu1 }
 0x62d   :  { %v1513_v60 = vmul.f32 0.5, %v1457_v54  ;;  %v1460_v10 = vadd.f32 %v3966_v0, %v6623_v50  ;;  %v1451_v35 = vpop.f32.mrb[67].mxu1 }
 0x62e   :  { %v1511_v36 = vmul.f32 0.5, %v1449_v61  ;;  %v1452_v41 = vadd.f32 %v1451_v35, %v6624_v15  ;;  %v6632_v61 = vld [vmem:[#allocation90_spill] sm:$0xff] }
 0x62f   :  { %4485 = vtanh.f32 %v1513_v60  ;;  %v1514_v33 = vmul.f32 0.5, %v1460_v10 }
 0x630   :  { %4487 = vtanh.f32 %v1511_v36  ;;  %v1512_v19 = vmul.f32 0.5, %v1452_v41 }
 0x631   :  { %4489 = vtanh.f32 %v1514_v33  ;;  %v4478_v55 = vpop.eup %4477 }
 0x632   :  { %4491 = vtanh.f32 %v1512_v19  ;;  %v3969_v23 = vpop.f32.mrb[68].mxu1  ;;  %v4480_v13 = vpop.eup %4479  ;;  %v1505_v12 = vmul.f32 0.5, %v4478_v55 }
 0x633   :  { %v1473_v56 = vadd.f32 %v3969_v23, %v6625_v4  ;;  %v1464_v43 = vpop.f32.mrb[69].mxu1  ;;  %v4482_v51 = vpop.eup %4481  ;;  %v1503_v34 = vmul.f32 0.5, %v4480_v13 }
 0x634   :  { %v1465_v1 = vadd.f32 %v1464_v43, %v6626_v39  ;;  %v3970_v42 = vpop.f32.mrb[70].mxu1  ;;  %v4484_v20 = vpop.eup %4483  ;;  %v1509_v16 = vadd.f32 0.5, %v1505_v12  ;;  %v1506_v5 = vmul.f32 0.5, %v4482_v51 }
 0x635   :  { %4493 = vtanh.f32 %v1473_v56  ;;  %v1476_v32 = vadd.f32 %v3970_v42, %v6627_v37  ;;  %v1467_v58 = vpop.f32.mrb[71].mxu1  ;;  %v1504_v44 = vmul.f32 0.5, %v4484_v20  ;;  %v1507_v54 = vadd.f32 0.5, %v1503_v34 }
 0x636   :  { %4495 = vtanh.f32 %v1465_v1  ;;  %v1468_v27 = vadd.f32 %v1467_v58, %v6628_v18  ;;  %v1510_v50 = vadd.f32 0.5, %v1506_v5 }
 0x637   :  { %4497 = vtanh.f32 %v1476_v32  ;;  %v1508_v23 = vadd.f32 0.5, %v1504_v44  ;;  %v5898_v44 = vld [vmem:[%s6432_s3 + $0x28] sm:$0xff]  }
 0x638   :  { %4499 = vtanh.f32 %v1468_v27 }
 0x639   :  { %v4486_v48 = vpop.eup %4485 }
 0x63a   :  { %v4488_v31 = vpop.eup %4487  ;;  %v1521_v29 = vmul.f32 0.5, %v4486_v48  ;;  %v3973_v14 = vpop.f32.mrb[72].mxu1 }
 0x63b   :  { %v4490_v22 = vpop.eup %4489  ;;  %v1519_v11 = vmul.f32 0.5, %v4488_v31  ;;  %v1489_v8 = vadd.f32 %v3973_v14, %v6629_v63  ;;  %v1480_v38 = vpop.f32.mrb[73].mxu1 }
 0x63c   :  { %v4492_v52 = vpop.eup %4491  ;;  %v1525_v46 = vadd.f32 0.5, %v1521_v29  ;;  %v1522_v45 = vmul.f32 0.5, %v4490_v22  ;;  %v1481_v49 = vadd.f32 %v1480_v38, %v6630_v21  ;;  %v3974_v59 = vpop.f32.mrb[74].mxu1 }
 0x63d   :  { %v1523_v57 = vadd.f32 0.5, %v1519_v11  ;;  %v1520_v3 = vmul.f32 0.5, %v4492_v52  ;;  %v1533_v9 = vmul.f32 0.5, %v1489_v8  ;;  %v1492_v17 = vadd.f32 %v3974_v59, %v6631_v30  ;;  %v1483_v40 = vpop.f32.mrb[75].mxu1 }
 0x63e   :  { %v1526_v26 = vadd.f32 0.5, %v1522_v45  ;;  %v1531_v24 = vmul.f32 0.5, %v1481_v49  ;;  %v1484_v0 = vadd.f32 %v1483_v40, %v6632_v61  ;;  %v1549_v15 = vmul.f32 %v1525_v46, %v5804_v2  ;;  %v5905_v46 = vld [vmem:[%s6432_s3 + $0x30] sm:$0xff]   ;;  %v5912_v45 = vld [vmem:[%s6432_s3 + $0x38] sm:$0xff]   ;;  %v6633_v49 = vld [vmem:[#allocation49_spill] sm:$0xff] }
 0x63f   :  { %v4494_v60 = vpop.eup %4493  ;;  %v1524_v10 = vadd.f32 0.5, %v1520_v3  ;;  %4501 = vtanh.f32 %v1533_v9  ;;  %v1534_v35 = vmul.f32 0.5, %v1492_v17  ;;  %v1547_v4 = vmul.f32 %v1523_v57, %v5807_v62  ;;  %v6634_v3 = vld [vmem:[#allocation21_spill] sm:$0xff]  ;;  %v6635_v17 = vld [vmem:[#allocation50_spill] sm:$0xff] }
 0x640   :  { %v4496_v36 = vpop.eup %4495  ;;  %v1553_v41 = vmul.f32 %v4494_v60, %v1509_v16  ;;  %4503 = vtanh.f32 %v1531_v24  ;;  %v1532_v33 = vmul.f32 0.5, %v1484_v0  ;;  %v1550_v55 = vmul.f32 %v1526_v26, %v5810_v53  ;;  %v6636_v24 = vld [vmem:[#allocation22_spill] sm:$0xff] }
 0x641   :  { %v4498_v19 = vpop.eup %4497  ;;  %v1551_v56 = vmul.f32 %v4496_v36, %v1507_v54  ;;  %4505 = vtanh.f32 %v1534_v35  ;;  %v1548_v42 = vmul.f32 %v1524_v10, %v5813_v7  ;;  %v6637_v35 = vld [vmem:[#allocation59_spill] sm:$0xff] }
 0x642   :  { %v4500_v43 = vpop.eup %4499  ;;  %v5874_v39 = vadd.f32 %v1553_v41, %v1549_v15  ;;  %v1554_v1 = vmul.f32 %v4498_v19, %v1510_v50  ;;  %4507 = vtanh.f32 %v1532_v33  ;;  %v6638_v41 = vld [vmem:[#allocation35_spill] sm:$0xff] }
 0x643   :  { %v5877_v37 = vadd.f32 %v1551_v56, %v1547_v4  ;;  %v1552_v2 = vmul.f32 %v4500_v43, %v1508_v23  ;;  %v6639_v4 = vld [vmem:[#allocation60_spill] sm:$0xff] }
 0x644   :  { %4509 = vtanh.f32 %v5874_v39  ;;  %v5880_v32 = vadd.f32 %v1554_v1, %v1550_v55  ;;  %v6640_v1 = vld [vmem:[#allocation36_spill] sm:$0xff] }
 0x645   :  { %4511 = vtanh.f32 %v5877_v37  ;;  %v5883_v62 = vadd.f32 %v1552_v2, %v1548_v42 }
 0x646   :  { %4513 = vtanh.f32 %v5880_v32 }
 0x647   :  { %4515 = vtanh.f32 %v5883_v62 }
 0x649   :  { %v4502_v53 = vpop.eup %4501 }
 0x64a   :  { %v4504_v58 = vpop.eup %4503  ;;  %v1541_v13 = vmul.f32 0.5, %v4502_v53 }
 0x64b   :  { %v4506_v18 = vpop.eup %4505  ;;  %v1539_v7 = vmul.f32 0.5, %v4504_v58 }
 0x64c   :  { %v4508_v27 = vpop.eup %4507  ;;  %v1542_v51 = vmul.f32 0.5, %v4506_v18  ;;  %v1545_v12 = vadd.f32 0.5, %v1541_v13  ;;  %v6641_v13 = vld [vmem:[#allocation79_spill] sm:$0xff] }
 0x64d   :  { %v1540_v20 = vmul.f32 0.5, %v4508_v27  ;;  %v1543_v31 = vadd.f32 0.5, %v1539_v7 }
 0x64e   :  { %v4510_v48 = vpop.eup %4509  ;;  %v1546_v34 = vadd.f32 0.5, %v1542_v51  ;;  %v6642_v51 = vld [vmem:[#allocation69_spill] sm:$0xff] }
 0x64f   :  { %v4512_v29 = vpop.eup %4511  ;;  %v1544_v14 = vadd.f32 0.5, %v1540_v20  ;;  %v1565_v5 = vmul.f32 %v4510_v48, %v1545_v12  ;;  %v6643_v48 = vld [vmem:[#allocation80_spill] sm:$0xff] }
 0x650   :  { %v4514_v22 = vpop.eup %4513  ;;  %v1563_v63 = vmul.f32 %v4512_v29, %v1543_v31 }
 0x651   :  { %v4516_v16 = vpop.eup %4515  ;;  %v1566_v11 = vmul.f32 %v4514_v22, %v1546_v34 }
 0x652   :  { %v1564_v8 = vmul.f32 %v4516_v16, %v1544_v14  ;;  %v6644_v14 = vld [vmem:[#allocation70_spill] sm:$0xff] }
 0x653   :  { %v1605_v38 = vpack.c.bf16 %v1566_v11, %v1565_v5 }
 0x654   :  { %v1604_v52 = vpack.c.bf16 %v1564_v8, %v1563_v63 }
 0x656   :  { %3975 = vmatprep.subr.bf16.mxu0 %v1604_v52 }
 0x657   :  { %3976 = vmatpush3.bf16.msra.mxu0 %v1604_v52 }
 0x658   :  { %3977 = vmatprep.subr.bf16.mxu0 %v1605_v38 }
 0x65b   :  { %3978 = vmatpush3.bf16.msra.mxu0 %v1605_v38 }
 0x65e   :  { %3980 = vmatmul.mubr.msk.bf16.vlgmr.msra.gmra.mrb[20].mxu0 %vm333_vm0, %v5820_v6 }
 0x65f   :  { %3983 = vmatprep.mubr.msk.bf16.mxu0 %vm333_vm0, %v5827_v28 }
 0x666   :  { %3984 = vmatmul.mubr.msk.bf16.gmra.mrb[24].mxu0 %vm333_vm0, %v5834_v47 }
 0x667   :  { %3987 = vmatprep.mubr.msk.bf16.mxu0 %vm333_vm0, %v5841_v25 }
 0x66e   :  { %3988 = vmatmul.mubr.msk.bf16.gmra.mrb[28].mxu0 %vm333_vm0, %v5898_v44 }
 0x66f   :  { %3991 = vmatprep.mubr.msk.bf16.mxu0 %vm333_vm0, %v5905_v46 }
 0x676   :  { %3992 = vmatmul.mubr.msk.bf16.gmra.mrb[32].mxu0 %vm333_vm0, %v5912_v45 }
 0x731   :  { %v3981_v21 = vpop.f32.mrb[20].mxu0 }
 0x732   :  { %v1649_v59 = vadd.f32 %v3981_v21, %v6633_v49  ;;  %v1640_v57 = vpop.f32.mrb[21].mxu0 }
 0x733   :  { %v1641_v9 = vadd.f32 %v1640_v57, %v6634_v3  ;;  %v3982_v30 = vpop.f32.mrb[22].mxu0 }
 0x734   :  { %v1652_v40 = vadd.f32 %v3982_v30, %v6635_v17  ;;  %v1643_v54 = vpop.f32.mrb[23].mxu0  ;;  %v1705_v26 = vmul.f32 0.5, %v1649_v59 }
 0x735   :  { %v1644_v61 = vadd.f32 %v1643_v54, %v6636_v24  ;;  %v1703_v0 = vmul.f32 0.5, %v1641_v9  ;;  %v6645_v9 = vld [vmem:[#allocation103_spill] sm:$0xff] }
 0x736   :  { %v1706_v60 = vmul.f32 0.5, %v1652_v40  ;;  %4517 = vtanh.f32 %v1705_v26 }
 0x737   :  { %v1704_v50 = vmul.f32 0.5, %v1644_v61  ;;  %4519 = vtanh.f32 %v1703_v0  ;;  %v6646_v61 = vld [vmem:[#allocation91_spill] sm:$0xff] }
 0x738   :  { %4521 = vtanh.f32 %v1706_v60 }
 0x739   :  { %v3985_v10 = vpop.f32.mrb[24].mxu0  ;;  %4523 = vtanh.f32 %v1704_v50 }
 0x73a   :  { %v1665_v36 = vadd.f32 %v3985_v10, %v6637_v35  ;;  %v1656_v15 = vpop.f32.mrb[25].mxu0 }
 0x73b   :  { %v1657_v33 = vadd.f32 %v1656_v15, %v6638_v41  ;;  %v3986_v19 = vpop.f32.mrb[26].mxu0 }
 0x73c   :  { %v1721_v23 = vmul.f32 0.5, %v1665_v36  ;;  %v1668_v56 = vadd.f32 %v3986_v19, %v6639_v4  ;;  %v1659_v43 = vpop.f32.mrb[27].mxu0  ;;  %v6647_v36 = vld [vmem:[#allocation104_spill] sm:$0xff] }
 0x73d   :  { %v1719_v55 = vmul.f32 0.5, %v1657_v33  ;;  %v1660_v42 = vadd.f32 %v1659_v43, %v6640_v1  ;;  %v6648_v4 = vld [vmem:[#allocation92_spill] sm:$0xff] }
 0x73e   :  { %4525 = vtanh.f32 %v1721_v23  ;;  %v1722_v2 = vmul.f32 0.5, %v1668_v56 }
 0x73f   :  { %4527 = vtanh.f32 %v1719_v55  ;;  %v1720_v53 = vmul.f32 0.5, %v1660_v42 }
 0x740   :  { %4529 = vtanh.f32 %v1722_v2  ;;  %v4518_v27 = vpop.eup %4517 }
 0x741   :  { %4531 = vtanh.f32 %v1720_v53  ;;  %v3989_v58 = vpop.f32.mrb[28].mxu0  ;;  %v4520_v29 = vpop.eup %4519  ;;  %v1713_v5 = vmul.f32 0.5, %v4518_v27 }
 0x742   :  { %v1681_v18 = vadd.f32 %v3989_v58, %v6641_v13  ;;  %v1672_v7 = vpop.f32.mrb[29].mxu0  ;;  %v4522_v16 = vpop.eup %4521  ;;  %v1711_v38 = vmul.f32 0.5, %v4520_v29 }
 0x743   :  { %v1673_v12 = vadd.f32 %v1672_v7, %v6642_v51  ;;  %v3990_v20 = vpop.f32.mrb[30].mxu0  ;;  %v4524_v11 = vpop.eup %4523  ;;  %v1717_v59 = vadd.f32 0.5, %v1713_v5  ;;  %v1714_v57 = vmul.f32 0.5, %v4522_v16 }
 0x744   :  { %4533 = vtanh.f32 %v1681_v18  ;;  %v1684_v31 = vadd.f32 %v3990_v20, %v6643_v48  ;;  %v1675_v34 = vpop.f32.mrb[31].mxu0  ;;  %v1712_v54 = vmul.f32 0.5, %v4524_v11  ;;  %v1715_v33 = vadd.f32 0.5, %v1711_v38 }
 0x745   :  { %4535 = vtanh.f32 %v1673_v12  ;;  %v1676_v22 = vadd.f32 %v1675_v34, %v6644_v14  ;;  %v1718_v55 = vadd.f32 0.5, %v1714_v57 }
 0x746   :  { %4537 = vtanh.f32 %v1684_v31  ;;  %v1716_v7 = vadd.f32 0.5, %v1712_v54 }
 0x747   :  { %4539 = vtanh.f32 %v1676_v22 }
 0x748   :  { %v4526_v63 = vpop.eup %4525 }
 0x749   :  { %v4528_v8 = vpop.eup %4527  ;;  %v1729_v52 = vmul.f32 0.5, %v4526_v63  ;;  %v3993_v21 = vpop.f32.mrb[32].mxu0 }
 0x74a   :  { %v4530_v49 = vpop.eup %4529  ;;  %v1727_v3 = vmul.f32 0.5, %v4528_v8  ;;  %v1697_v30 = vadd.f32 %v3993_v21, %v6645_v9  ;;  %v1688_v17 = vpop.f32.mrb[33].mxu0 }
 0x74b   :  { %v4532_v40 = vpop.eup %4531  ;;  %v1733_v26 = vadd.f32 0.5, %v1729_v52  ;;  %v1730_v24 = vmul.f32 0.5, %v4530_v49  ;;  %v1689_v0 = vadd.f32 %v1688_v17, %v6646_v61  ;;  %v3994_v60 = vpop.f32.mrb[34].mxu0  ;;  %v4618_v61 = vmov 0.0  }
 0x74c   :  { %v1731_v50 = vadd.f32 0.5, %v1727_v3  ;;  %v1728_v10 = vmul.f32 0.5, %v4532_v40  ;;  %v1741_v35 = vmul.f32 0.5, %v1697_v30  ;;  %v1700_v15 = vadd.f32 %v3994_v60, %v6647_v36  ;;  %v1691_v41 = vpop.f32.mrb[35].mxu0  ;;  %4015 = vmatprep.subr.bf16.mxu0 %v4618_v61  ;;  %4019 = vmatprep.mubr.msk.bf16.mxu0 %vm4619_vm1, %v4618_v61  ;;  %v6652_v36 = vld [vmem:[#allocation24_spill] sm:$0xff] }
 0x74d   :  { %v1734_v19 = vadd.f32 0.5, %v1730_v24  ;;  %v1739_v23 = vmul.f32 0.5, %v1689_v0  ;;  %v1692_v56 = vadd.f32 %v1691_v41, %v6648_v4  ;;  %v1757_v53 = vmul.f32 %v1733_v26, %v5874_v39  ;;  %v6650_v0 = vld [vmem:[#allocation23_spill] sm:$0xff] }
 0x74e   :  { %v4534_v43 = vpop.eup %4533  ;;  %v1732_v1 = vadd.f32 0.5, %v1728_v10  ;;  %4541 = vtanh.f32 %v1741_v35  ;;  %v1742_v42 = vmul.f32 0.5, %v1700_v15  ;;  %v1755_v27 = vmul.f32 %v1731_v50, %v5877_v37  ;;  %v6651_v50 = vld [vmem:[#allocation52_spill] sm:$0xff] }
 0x74f   :  { %v4536_v2 = vpop.eup %4535  ;;  %v1761_v58 = vmul.f32 %v4534_v43, %v1717_v59  ;;  %4543 = vtanh.f32 %v1739_v23  ;;  %v1740_v13 = vmul.f32 0.5, %v1692_v56  ;;  %v1758_v20 = vmul.f32 %v1734_v19, %v5880_v32  ;;  %v6653_v23 = vld [vmem:[#allocation61_spill] sm:$0xff] }
 0x750   :  { %v4538_v18 = vpop.eup %4537  ;;  %v1759_v51 = vmul.f32 %v4536_v2, %v1715_v33  ;;  %4545 = vtanh.f32 %v1742_v42  ;;  %v1756_v34 = vmul.f32 %v1732_v1, %v5883_v62  ;;  %v6654_v43 = vld [vmem:[#allocation37_spill] sm:$0xff]  ;;  %v6655_v2 = vld [vmem:[#allocation62_spill] sm:$0xff] }
 0x751   :  { %v4540_v12 = vpop.eup %4539  ;;  %v5935_v48 = vadd.f32 %v1761_v58, %v1757_v53  ;;  %v1762_v31 = vmul.f32 %v4538_v18, %v1718_v55  ;;  %4547 = vtanh.f32 %v1740_v13  ;;  %v6656_v18 = vld [vmem:[#allocation38_spill] sm:$0xff] }
 0x752   :  { %v5938_v29 = vadd.f32 %v1759_v51, %v1755_v27  ;;  %v1760_v39 = vmul.f32 %v4540_v12, %v1716_v7 }
 0x753   :  { %4549 = vtanh.f32 %v5935_v48  ;;  %v5941_v14 = vadd.f32 %v1762_v31, %v1758_v20  ;;  %v6657_v20 = vld [vmem:[#allocation81_spill] sm:$0xff] }
 0x754   :  { %4551 = vtanh.f32 %v5938_v29  ;;  %v5944_v37 = vadd.f32 %v1760_v39, %v1756_v34 }
 0x755   :  { %4553 = vtanh.f32 %v5941_v14 }
 0x756   :  { %4555 = vtanh.f32 %v5944_v37 }
 0x758   :  { %v4542_v32 = vpop.eup %4541 }
 0x759   :  { %v4544_v22 = vpop.eup %4543  ;;  %v1749_v16 = vmul.f32 0.5, %v4542_v32  ;;  %v6658_v32 = vld [vmem:[#allocation71_spill] sm:$0xff] }
 0x75a   :  { %v4546_v5 = vpop.eup %4545  ;;  %v1747_v62 = vmul.f32 0.5, %v4544_v22 }
 0x75b   :  { %v4548_v11 = vpop.eup %4547  ;;  %v1750_v63 = vmul.f32 0.5, %v4546_v5  ;;  %v1753_v8 = vadd.f32 0.5, %v1749_v16  ;;  %v6659_v5 = vld [vmem:[#allocation82_spill] sm:$0xff] }
 0x75c   :  { %v1748_v38 = vmul.f32 0.5, %v4548_v11  ;;  %v1751_v21 = vadd.f32 0.5, %v1747_v62 }
 0x75d   :  { %v4550_v52 = vpop.eup %4549  ;;  %v1754_v49 = vadd.f32 0.5, %v1750_v63 }
 0x75e   :  { %v4552_v59 = vpop.eup %4551  ;;  %v1752_v57 = vadd.f32 0.5, %v1748_v38  ;;  %v1773_v30 = vmul.f32 %v4550_v52, %v1753_v8  ;;  %v6660_v8 = vld [vmem:[#allocation72_spill] sm:$0xff] }
 0x75f   :  { %v4554_v3 = vpop.eup %4553  ;;  %v1771_v40 = vmul.f32 %v4552_v59, %v1751_v21 }
 0x760   :  { %v4556_v9 = vpop.eup %4555  ;;  %v1774_v17 = vmul.f32 %v4554_v3, %v1754_v49 }
 0x761   :  { %v1772_v54 = vmul.f32 %v4556_v9, %v1752_v57 }
 0x762   :  { %v1813_v26 = vpack.c.bf16 %v1774_v17, %v1773_v30 }
 0x763   :  { %v1812_v24 = vpack.c.bf16 %v1772_v54, %v1771_v40 }
 0x765   :  { %3995 = vmatprep.subr.bf16.mxu1 %v1812_v24 }
 0x766   :  { %3996 = vmatpush3.bf16.msra.mxu1 %v1812_v24  ;;  %v6661_v24 = vld [vmem:[#allocation105_spill] sm:$0xff] }
 0x767   :  { %3997 = vmatprep.subr.bf16.mxu1 %v1813_v26 }
 0x76a   :  { %3998 = vmatpush3.bf16.msra.mxu1 %v1813_v26 }
 0x76d   :  { %4000 = vmatmul.mubr.msk.bf16.vlgmr.msra.gmra.mrb[76].mxu1 %vm333_vm0, %v5820_v6 }
 0x76e   :  { %4003 = vmatprep.mubr.msk.bf16.mxu1 %vm333_vm0, %v5827_v28  ;;  %v6649_v28 = vld [vmem:[#allocation51_spill] sm:$0xff] }
 0x775   :  { %4004 = vmatmul.mubr.msk.bf16.gmra.mrb[80].mxu1 %vm333_vm0, %v5834_v47 }
 0x776   :  { %4007 = vmatprep.mubr.msk.bf16.mxu1 %vm333_vm0, %v5841_v25 }
 0x77d   :  { %4008 = vmatmul.mubr.msk.bf16.gmra.mrb[84].mxu1 %vm333_vm0, %v5898_v44 }
 0x77e   :  { %4011 = vmatprep.mubr.msk.bf16.mxu1 %vm333_vm0, %v5905_v46 }
 0x785   :  { %4012 = vmatmul.mubr.msk.bf16.gmra.mrb[88].mxu1 %vm333_vm0, %v5912_v45 }
 0x840   :  { %v4001_v6 = vpop.f32.mrb[76].mxu1 }
 0x841   :  { %v1857_v47 = vadd.f32 %v4001_v6, %v6649_v28  ;;  %v1848_v25 = vpop.f32.mrb[77].mxu1 }
 0x842   :  { %v1849_v60 = vadd.f32 %v1848_v25, %v6650_v0  ;;  %v4002_v44 = vpop.f32.mrb[78].mxu1 }
 0x843   :  { %v1860_v10 = vadd.f32 %v4002_v44, %v6651_v50  ;;  %v1851_v46 = vpop.f32.mrb[79].mxu1  ;;  %v1913_v35 = vmul.f32 0.5, %v1857_v47  ;;  %v6662_v44 = vld [vmem:[#allocation93_spill] sm:$0xff] }
 0x844   :  { %v1852_v45 = vadd.f32 %v1851_v46, %v6652_v36  ;;  %v1911_v15 = vmul.f32 0.5, %v1849_v60 }
 0x845   :  { %v1914_v41 = vmul.f32 0.5, %v1860_v10  ;;  %4557 = vtanh.f32 %v1913_v35 }
 0x846   :  { %v1912_v33 = vmul.f32 0.5, %v1852_v45  ;;  %4559 = vtanh.f32 %v1911_v15  ;;  %v6663_v45 = vld [vmem:[#allocation106_spill] sm:$0xff] }
 0x847   :  { %4561 = vtanh.f32 %v1914_v41 }
 0x848   :  { %v4005_v19 = vpop.f32.mrb[80].mxu1  ;;  %4563 = vtanh.f32 %v1912_v33 }
 0x849   :  { %v1873_v4 = vadd.f32 %v4005_v19, %v6653_v23  ;;  %v1864_v56 = vpop.f32.mrb[81].mxu1 }
 0x84a   :  { %v1865_v55 = vadd.f32 %v1864_v56, %v6654_v43  ;;  %v4006_v1 = vpop.f32.mrb[82].mxu1 }
 0x84b   :  { %v1929_v42 = vmul.f32 0.5, %v1873_v4  ;;  %v1876_v53 = vadd.f32 %v4006_v1, %v6655_v2  ;;  %v1867_v58 = vpop.f32.mrb[83].mxu1  ;;  %v6664_v4 = vld [vmem:[#allocation94_spill] sm:$0xff] }
 0x84c   :  { %v1927_v13 = vmul.f32 0.5, %v1865_v55  ;;  %v1868_v7 = vadd.f32 %v1867_v58, %v6656_v18 }
 0x84d   :  { %4565 = vtanh.f32 %v1929_v42  ;;  %v1930_v27 = vmul.f32 0.5, %v1876_v53 }
 0x84e   :  { %4567 = vtanh.f32 %v1927_v13  ;;  %v1928_v51 = vmul.f32 0.5, %v1868_v7 }
 0x84f   :  { %4569 = vtanh.f32 %v1930_v27  ;;  %v4558_v39 = vpop.eup %4557 }
 0x850   :  { %4571 = vtanh.f32 %v1928_v51  ;;  %v4009_v12 = vpop.f32.mrb[84].mxu1  ;;  %v4560_v63 = vpop.eup %4559  ;;  %v1921_v21 = vmul.f32 0.5, %v4558_v39 }
 0x851   :  { %v1889_v31 = vadd.f32 %v4009_v12, %v6657_v20  ;;  %v1880_v34 = vpop.f32.mrb[85].mxu1  ;;  %v4562_v52 = vpop.eup %4561  ;;  %v1919_v3 = vmul.f32 0.5, %v4560_v63 }
 0x852   :  { %v1881_v22 = vadd.f32 %v1880_v34, %v6658_v32  ;;  %v4010_v16 = vpop.f32.mrb[86].mxu1  ;;  %v4564_v49 = vpop.eup %4563  ;;  %v1925_v40 = vadd.f32 0.5, %v1921_v21  ;;  %v1922_v54 = vmul.f32 0.5, %v4562_v52 }
 0x853   :  { %4573 = vtanh.f32 %v1889_v31  ;;  %v1892_v62 = vadd.f32 %v4010_v16, %v6659_v5  ;;  %v1883_v11 = vpop.f32.mrb[87].mxu1  ;;  %v1920_v25 = vmul.f32 0.5, %v4564_v49  ;;  %v1923_v33 = vadd.f32 0.5, %v1919_v3 }
 0x854   :  { %4575 = vtanh.f32 %v1881_v22  ;;  %v1884_v38 = vadd.f32 %v1883_v11, %v6660_v8  ;;  %v1926_v55 = vadd.f32 0.5, %v1922_v54 }
 0x855   :  { %4577 = vtanh.f32 %v1892_v62  ;;  %v1924_v7 = vadd.f32 0.5, %v1920_v25  ;;  %v1998_v25 = vpop.permute.xlu1 %1997 }
 0x856   :  { %4579 = vtanh.f32 %v1884_v38 }
 0x857   :  { %v4566_v59 = vpop.eup %4565 }
 0x858   :  { %v4568_v57 = vpop.eup %4567  ;;  %v1937_v9 = vmul.f32 0.5, %v4566_v59  ;;  %v4013_v30 = vpop.f32.mrb[88].mxu1 }
 0x859   :  { %v4570_v17 = vpop.eup %4569  ;;  %v1935_v26 = vmul.f32 0.5, %v4568_v57  ;;  %v1905_v6 = vadd.f32 %v4013_v30, %v6661_v24  ;;  %v1896_v28 = vpop.f32.mrb[89].mxu1 }
 0x85a   :  { %v4572_v47 = vpop.eup %4571  ;;  %v1941_v0 = vadd.f32 0.5, %v1937_v9  ;;  %v1938_v60 = vmul.f32 0.5, %v4570_v17  ;;  %v1897_v50 = vadd.f32 %v1896_v28, %v6662_v44  ;;  %v4014_v10 = vpop.f32.mrb[90].mxu1  ;;  %v3587_v28 = vld [vmem:[%s6438_s1] ss:$0 sm:$0xff]  ;;  %s4620_s1 = smov 126  }
 0x85b   :  { %v1939_v46 = vadd.f32 0.5, %v1935_v26  ;;  %v1936_v35 = vmul.f32 0.5, %v4572_v47  ;;  %v1949_v36 = vmul.f32 0.5, %v1905_v6  ;;  %v1908_v15 = vadd.f32 %v4014_v10, %v6663_v45  ;;  %v1899_v41 = vpop.f32.mrb[91].mxu1  ;;  %v4242_v6 = vld [vmem:[%s6437_s5] sm:$0xff]   ;;  %v1993_v47 = vpop.permute.xlu0 %1992  ;;  %s4621_s5 = smov 124  }
 0x85c   :  { %v1942_v19 = vadd.f32 0.5, %v1938_v60  ;;  %v1947_v23 = vmul.f32 0.5, %v1897_v50  ;;  %v1900_v56 = vadd.f32 %v1899_v41, %v6664_v4  ;;  %v1965_v53 = vmul.f32 %v1941_v0, %v5935_v48  ;;  %v2067_v41 = vpop.permute.xlu1 %2066  ;;  %v2302_v4 = vld [vmem:[%s6439_s9] sm:$0xff] }
 0x85d   :  { %v4574_v43 = vpop.eup %4573  ;;  %v1940_v1 = vadd.f32 0.5, %v1936_v35  ;;  %4581 = vtanh.f32 %v1949_v36  ;;  %v1950_v42 = vmul.f32 0.5, %v1908_v15  ;;  %v1963_v27 = vmul.f32 %v1939_v46, %v5938_v29 }
 0x85e   :  { %v4576_v2 = vpop.eup %4575  ;;  %v1969_v58 = vmul.f32 %v4574_v43, %v1925_v40  ;;  %4583 = vtanh.f32 %v1947_v23  ;;  %v1948_v13 = vmul.f32 0.5, %v1900_v56  ;;  %v1966_v20 = vmul.f32 %v1942_v19, %v5941_v14  ;;  %v4243_v56 = vld [vmem:[%s6440_s8] sm:$0xff]   ;;  %v2303_v43 = vld [vmem:[%s6439_s9 + $0x8] sm:$0xff] }
 0x85f   :  { %v4578_v18 = vpop.eup %4577  ;;  %v1967_v51 = vmul.f32 %v4576_v2, %v1923_v33  ;;  %4585 = vtanh.f32 %v1950_v42  ;;  %v1964_v39 = vmul.f32 %v1940_v1, %v5944_v37  ;;  %v2006_v0 = vmul.f32 %v3587_v28, %v1993_v47  ;;  %v2062_v46 = vpop.permute.xlu0 %2061  ;;  %4025 = vmatprep.mubr.msk.bf16.mxu1 %vm2336_vm3, %v4243_v56  ;;  %v2305_v1 = vld [vmem:[%s6439_s9 + $0x18] sm:$0xff] }
 0x860   :  { %v4580_v12 = vpop.eup %4579  ;;  %v1973_v31 = vadd.f32 %v1969_v58, %v1965_v53  ;;  %v1970_v34 = vmul.f32 %v4578_v18, %v1926_v55  ;;  %4587 = vtanh.f32 %v1948_v13  ;;  %v2007_v44 = vmul.f32 %v3587_v28, %v1998_v25  ;;  %v2304_v55 = vld [vmem:[%s6439_s9 + $0x10] sm:$0xff] }
 0x861   :  { %v1971_v32 = vadd.f32 %v1967_v51, %v1963_v27  ;;  %v1968_v22 = vmul.f32 %v4580_v12, %v1924_v7 }
 0x862   :  { %4589 = vtanh.f32 %v1973_v31  ;;  %v1974_v48 = vadd.f32 %v1970_v34, %v1966_v20 }
 0x863   :  { %4591 = vtanh.f32 %v1971_v32  ;;  %v1972_v16 = vadd.f32 %v1968_v22, %v1964_v39 }
 0x864   :  { %4593 = vtanh.f32 %v1974_v48 }
 0x865   :  { %4595 = vtanh.f32 %v1972_v16 }
 0x867   :  { %v4582_v5 = vpop.eup %4581 }
 0x868   :  { %v4584_v29 = vpop.eup %4583  ;;  %v1957_v62 = vmul.f32 0.5, %v4582_v5 }
 0x869   :  { %v4586_v11 = vpop.eup %4585  ;;  %v1955_v63 = vmul.f32 0.5, %v4584_v29 }
 0x86a   :  { %v4588_v8 = vpop.eup %4587  ;;  %v1961_v14 = vadd.f32 0.5, %v1957_v62  ;;  %v1958_v38 = vmul.f32 0.5, %v4586_v11 }
 0x86b   :  { %v1959_v52 = vadd.f32 0.5, %v1955_v63  ;;  %v1956_v21 = vmul.f32 0.5, %v4588_v8 }
 0x86c   :  { %v4590_v49 = vpop.eup %4589  ;;  %v1962_v37 = vadd.f32 0.5, %v1958_v38 }
 0x86d   :  { %v4592_v59 = vpop.eup %4591  ;;  %v1981_v57 = vmul.f32 %v4590_v49, %v1961_v14  ;;  %v1960_v3 = vadd.f32 0.5, %v1956_v21 }
 0x86e   :  { %v4594_v9 = vpop.eup %4593  ;;  %v1979_v30 = vmul.f32 %v4592_v59, %v1959_v52 }
 0x86f   :  { %v4596_v17 = vpop.eup %4595  ;;  %v1982_v40 = vmul.f32 %v4594_v9, %v1962_v37 }
 0x870   :  { %v1980_v54 = vmul.f32 %v4596_v17, %v1960_v3 }
 0x871   :  { %v1987_v26 = vpack.c.bf16 %v1982_v40, %v1981_v57  ;;  %v4244_v57 = vld [vmem:[%s6440_s8 + $0x8] sm:$0xff]  }
 0x872   :  { %v1986_v24 = vpack.c.bf16 %v1980_v54, %v1979_v30 }
 0x874   :  { %4016 = vmatpush3.bf16.msra.mxu0 %v1986_v24 }
 0x875   :  { %4017 = vmatprep.subr.bf16.mxu0 %v4618_v61 }
 0x878   :  { %4018 = vmatpush3.bf16.msra.mxu0 %v1987_v26 }
 0x87b   :  { %4020 = vmatmul.mubr.msk.bf16.vlgmr.msra.gmra.mrb[36].mxu0 %vm333_vm0, %v4242_v6 }
 0x94e   :  { %v2050_v60 = vpop.f32.mrb[36].mxu0 }
 0x94f   :  { %v2051_v50 = vadd.f32 %v2050_v60, %v2006_v0  ;;  %v4021_v10 = vpop.f32.mrb[37].mxu0  ;;  %v4245_v0 = vld [vmem:[%s6441_s10 + $0x20] sm:$0xff]  }
 0x950   :  { %v2053_v35 = vpop.f32.mrb[38].mxu0  ;;  %4033 = vmatprep.mubr.msk.bf16.mxu0 %vm333_vm0, %v4245_v0 }
 0x951   :  { %v2069_v36 = vadd.f32 %v2062_v46, %v2051_v50  ;;  %v2054_v45 = vadd.f32 %v2053_v35, %v2007_v44  ;;  %v4022_v15 = vpop.f32.mrb[39].mxu0  ;;  %v3338_v35 = vld [vmem:[%s6442_s11 + $0x8] sm:$0xff] }
 0x952   :  { %v3339_v15 = vld [vmem:[%s6442_s11 + $0x10] sm:$0xff] }
 0x953   :  { %v5993_v33 = vmax.f32 %v2069_v36, 0.0  ;;  %v2070_v19 = vadd.f32 %v2067_v41, %v2054_v45  ;;  %v3337_v36 = vld [vmem:[%s6442_s11] sm:$0xff]  ;;  %v3340_v45 = vld [vmem:[%s6442_s11 + $0x18] sm:$0xff]  ;;  %v3342_v41 = vld [vmem:[%s6442_s11 + $0x28] sm:$0xff] }
 0x955   :  { %v5995_v23 = vmax.f32 %v2070_v19, 0.0  ;;  %2141 = vrot.lane.b32.xlu0 %v5993_v33, %s4620_s1  ;;  %2074 = vst.msk [vmem:[#allocation2] sm:$0x1] %vm2073_vm2, %v5993_v33  ;;  %v3344_v19 = vld [vmem:[%s6442_s11 + $0x38] sm:$0xff] }
 0x957   :  { %2152 = vrot.lane.b32.xlu1 %v5995_v23, %s4620_s1  ;;  %2111 = vst.msk [vmem:[#allocation2 + $0x1] sm:$0x1] %vm2073_vm2, %v5995_v23 }
 0x959   :  { %2163 = vrot.lane.b32.xlu0 %v5993_v33, %s4621_s5 }
 0x95b   :  { %2174 = vrot.lane.b32.xlu1 %v5995_v23, %s4621_s5 }
 0x95d   :  { %2185 = vrot.lane.b32.xlu0 %v5993_v33, %s4622_s26 }
 0x95f   :  { %2196 = vrot.lane.b32.xlu1 %v5995_v23, %s4622_s26 }
 0x961   :  { %2207 = vrot.lane.b32.xlu0 %v5993_v33, %s4623_s27 }
 0x963   :  { %2218 = vrot.lane.b32.xlu1 %v5995_v23, %s4623_s27 }
 0x965   :  { %2229 = vrot.lane.b32.xlu0 %v5993_v33, %s4624_s28 }
 0x967   :  { %2240 = vrot.lane.b32.xlu1 %v5995_v23, %s4624_s28 }
 0x969   :  { %2251 = vrot.lane.b32.xlu0 %v5993_v33, %s4625_s29 }
 0x96b   :  { %2262 = vrot.lane.b32.xlu1 %v5995_v23, %s4625_s29 }
 0x96d   :  { %2273 = vrot.lane.b32.xlu0 %v5993_v33, %s4626_s30 }
 0x96f   :  { %2284 = vrot.lane.b32.xlu1 %v5995_v23, %s4626_s30 }
 0x971   :  { %2076 = vrot.lane.b32.xlu0 %v5993_v33, %s4627_s15 }
 0x973   :  { %2113 = vrot.lane.b32.xlu1 %v5995_v23, %s4627_s15 }
 0x975   :  { %2081 = vrot.lane.b32.xlu0 %v5993_v33, %s4628_s16 }
 0x977   :  { %2117 = vrot.lane.b32.xlu1 %v5995_v23, %s4628_s16 }
 0x979   :  { %2086 = vrot.lane.b32.xlu0 %v5993_v33, %s4629_s0 }
 0x97b   :  { %2121 = vrot.lane.b32.xlu1 %v5995_v23, %s4629_s0 }
 0x97d   :  { %2091 = vrot.lane.b32.xlu0 %v5993_v33, %s4630_s2 }
 0x97f   :  { %2125 = vrot.lane.b32.xlu1 %v5995_v23, %s4630_s2 }
 0x981   :  { %2096 = vrot.lane.b32.xlu0 %v5993_v33, %s4631_s17 }
 0x983   :  { %2129 = vrot.lane.b32.xlu1 %v5995_v23, %s4631_s17 }
 0x985   :  { %2101 = vrot.lane.b32.xlu0 %v5993_v33, %s4632_s18 }
 0x987   :  { %2133 = vrot.lane.b32.xlu1 %v5995_v23, %s4632_s18 }
 0x989   :  { %2106 = vrot.lane.b32.xlu0 %v5993_v33, %s4633_s19 }
 0x98b   :  { %2137 = vrot.lane.b32.xlu1 %v5995_v23, %s4633_s19 }
 0x98d   :  { %2308 = vperm.xlu0 %4232, %v2302_v4   ;;  %v3402_v4 = vld [vmem:[%s6443_s13] sm:$0xff] }
 0x98f   :  { %2313 = vperm.xlu1 %4233, %v2303_v43  }
 0x991   :  { %2318 = vperm.xlu0 %4232, %v2304_v55   ;;  %v4246_v55 = vld [vmem:[%s6441_s10 + $0x28] sm:$0xff]  }
 0x993   :  { %2323 = vperm.xlu1 %4233, %v2305_v1   ;;  %v4247_v1 = vld [vmem:[%s6441_s10 + $0x30] sm:$0xff]  }
 0x9c7   :  { %v6059_v42 = vpop.permute.xlu0 %2141 }
 0x9c8   :  { %2144 = vst.msk [vmem:[#allocation2 + $0x2] sm:$0x1] %vm2073_vm2, %v6059_v42 }
 0x9c9   :  { %v6063_v2 = vpop.permute.xlu1 %2152  ;;  %2145 = vst.msk [vmem:[#allocation2 + $0x1] sm:$0x2] %vm2079_vm4, %v5993_v33 }
 0x9ca   :  { %2155 = vst.msk [vmem:[#allocation2 + $0x3] sm:$0x1] %vm2073_vm2, %v6063_v2 }
 0x9cb   :  { %v6069_v53 = vpop.permute.xlu0 %2163  ;;  %2156 = vst.msk [vmem:[#allocation2 + $0x2] sm:$0x2] %vm2079_vm4, %v5995_v23 }
 0x9cc   :  { %2166 = vst.msk [vmem:[#allocation2 + $0x4] sm:$0x1] %vm2073_vm2, %v6069_v53 }
 0x9cd   :  { %2167 = vst.msk [vmem:[#allocation2 + $0x3] sm:$0x2] %vm2079_vm4, %v6059_v42  ;;  %v6077_v58 = vpop.permute.xlu1 %2174 }
 0x9ce   :  { %2177 = vst.msk [vmem:[#allocation2 + $0x5] sm:$0x1] %vm2073_vm2, %v6077_v58 }
 0x9cf   :  { %2168 = vst.msk [vmem:[#allocation2 + $0x2] sm:$0x4] %vm2084_vm5, %v5993_v33  ;;  %v6085_v13 = vpop.permute.xlu0 %2185 }
 0x9d0   :  { %2178 = vst.msk [vmem:[#allocation2 + $0x4] sm:$0x2] %vm2079_vm4, %v6063_v2 }
 0x9d1   :  { %2188 = vst.msk [vmem:[#allocation2 + $0x6] sm:$0x1] %vm2073_vm2, %v6085_v13  ;;  %v6093_v18 = vpop.permute.xlu1 %2196 }
 0x9d2   :  { %2179 = vst.msk [vmem:[#allocation2 + $0x3] sm:$0x4] %vm2084_vm5, %v5995_v23 }
 0x9d3   :  { %2189 = vst.msk [vmem:[#allocation2 + $0x5] sm:$0x2] %vm2079_vm4, %v6069_v53  ;;  %v2208_v7 = vpop.permute.xlu0 %2207 }
 0x9d4   :  { %2190 = vst.msk [vmem:[#allocation2 + $0x4] sm:$0x4] %vm2084_vm5, %v6059_v42 }
 0x9d5   :  { %2199 = vst.msk [vmem:[#allocation2 + $0x7] sm:$0x1] %vm2073_vm2, %v6093_v18  ;;  %2210 = vst.msk [vmem:[#allocation2 + $0x8] sm:$0x1] %vm2073_vm2, %v2208_v7  ;;  %v2219_v27 = vpop.permute.xlu1 %2218 }
 0x9d6   :  { %2200 = vst.msk [vmem:[#allocation2 + $0x6] sm:$0x2] %vm2079_vm4, %v6077_v58  ;;  %2211 = vst.msk [vmem:[#allocation2 + $0x7] sm:$0x2] %vm2079_vm4, %v6085_v13 }
 0x9d7   :  { %2191 = vst.msk [vmem:[#allocation2 + $0x3] sm:$0x8] %vm2089_vm6, %v5993_v33  ;;  %v2230_v51 = vpop.permute.xlu0 %2229 }
 0x9d8   :  { %2201 = vst.msk [vmem:[#allocation2 + $0x5] sm:$0x4] %vm2084_vm5, %v6063_v2  ;;  %2212 = vst.msk [vmem:[#allocation2 + $0x6] sm:$0x4] %vm2084_vm5, %v6069_v53 }
 0x9d9   :  { %2202 = vst.msk [vmem:[#allocation2 + $0x4] sm:$0x8] %vm2089_vm6, %v5995_v23  ;;  %2213 = vst.msk [vmem:[#allocation2 + $0x5] sm:$0x8] %vm2089_vm6, %v6059_v42  ;;  %v2241_v12 = vpop.permute.xlu1 %2240 }
 0x9da   :  { %2221 = vst.msk [vmem:[#allocation2 + $0x9] sm:$0x1] %vm2073_vm2, %v2219_v27  ;;  %2232 = vst.msk [vmem:[#allocation2 + $0xa] sm:$0x1] %vm2073_vm2, %v2230_v51 }
 0x9db   :  { %2222 = vst.msk [vmem:[#allocation2 + $0x8] sm:$0x2] %vm2079_vm4, %v6093_v18  ;;  %2233 = vst.msk [vmem:[#allocation2 + $0x9] sm:$0x2] %vm2079_vm4, %v2208_v7  ;;  %v2252_v20 = vpop.permute.xlu0 %2251 }
 0x9dc   :  { %2214 = vst.msk [vmem:[#allocation2 + $0x4] sm:$0x10] %vm2094_vm7, %v5993_v33 }
 0x9dd   :  { %2223 = vst.msk [vmem:[#allocation2 + $0x7] sm:$0x4] %vm2084_vm5, %v6077_v58  ;;  %2234 = vst.msk [vmem:[#allocation2 + $0x8] sm:$0x4] %vm2084_vm5, %v6085_v13  ;;  %v2263_v31 = vpop.permute.xlu1 %2262 }
 0x9de   :  { %2224 = vst.msk [vmem:[#allocation2 + $0x6] sm:$0x8] %vm2089_vm6, %v6063_v2  ;;  %2235 = vst.msk [vmem:[#allocation2 + $0x7] sm:$0x8] %vm2089_vm6, %v6069_v53 }
 0x9df   :  { %2225 = vst.msk [vmem:[#allocation2 + $0x5] sm:$0x10] %vm2094_vm7, %v5995_v23  ;;  %2236 = vst.msk [vmem:[#allocation2 + $0x6] sm:$0x10] %vm2094_vm7, %v6059_v42  ;;  %v2274_v34 = vpop.permute.xlu0 %2273 }
 0x9e0   :  { %2243 = vst.msk [vmem:[#allocation2 + $0xb] sm:$0x1] %vm2073_vm2, %v2241_v12  ;;  %2254 = vst.msk [vmem:[#allocation2 + $0xc] sm:$0x1] %vm2073_vm2, %v2252_v20 }
 0x9e1   :  { %2244 = vst.msk [vmem:[#allocation2 + $0xa] sm:$0x2] %vm2079_vm4, %v2219_v27  ;;  %2255 = vst.msk [vmem:[#allocation2 + $0xb] sm:$0x2] %vm2079_vm4, %v2230_v51  ;;  %v2285_v39 = vpop.permute.xlu1 %2284 }
 0x9e2   :  { %2245 = vst.msk [vmem:[#allocation2 + $0x9] sm:$0x4] %vm2084_vm5, %v6093_v18  ;;  %2256 = vst.msk [vmem:[#allocation2 + $0xa] sm:$0x4] %vm2084_vm5, %v2208_v7 }
 0x9e3   :  { %2237 = vst.msk [vmem:[#allocation2 + $0x5] sm:$0x20] %vm2099_vm8, %v5993_v33  ;;  %v2077_v32 = vpop.permute.xlu0 %2076 }
 0x9e4   :  { %2246 = vst.msk [vmem:[#allocation2 + $0x8] sm:$0x8] %vm2089_vm6, %v6077_v58  ;;  %2257 = vst.msk [vmem:[#allocation2 + $0x9] sm:$0x8] %vm2089_vm6, %v6085_v13 }
 0x9e5   :  { %2247 = vst.msk [vmem:[#allocation2 + $0x7] sm:$0x10] %vm2094_vm7, %v6063_v2  ;;  %2258 = vst.msk [vmem:[#allocation2 + $0x8] sm:$0x10] %vm2094_vm7, %v6069_v53  ;;  %v2114_v22 = vpop.permute.xlu1 %2113 }
 0x9e6   :  { %2265 = vst.msk [vmem:[#allocation2 + $0xd] sm:$0x1] %vm2073_vm2, %v2263_v31  ;;  %2276 = vst.msk [vmem:[#allocation2 + $0xe] sm:$0x1] %vm2073_vm2, %v2274_v34  ;;  %v4256_v34 = vld [vmem:[%s6441_s10 + $0x58] sm:$0xff]  }
 0x9e7   :  { %2248 = vst.msk [vmem:[#allocation2 + $0x6] sm:$0x20] %vm2099_vm8, %v5995_v23  ;;  %2259 = vst.msk [vmem:[#allocation2 + $0x7] sm:$0x20] %vm2099_vm8, %v6059_v42  ;;  %v2082_v48 = vpop.permute.xlu0 %2081 }
 0x9e8   :  { %2266 = vst.msk [vmem:[#allocation2 + $0xc] sm:$0x2] %vm2079_vm4, %v2241_v12  ;;  %2277 = vst.msk [vmem:[#allocation2 + $0xd] sm:$0x2] %vm2079_vm4, %v2252_v20  ;;  %v4255_v20 = vld [vmem:[%s6441_s10 + $0x50] sm:$0xff]  }
 0x9e9   :  { %2267 = vst.msk [vmem:[#allocation2 + $0xb] sm:$0x4] %vm2084_vm5, %v2219_v27  ;;  %2278 = vst.msk [vmem:[#allocation2 + $0xc] sm:$0x4] %vm2084_vm5, %v2230_v51  ;;  %v2118_v16 = vpop.permute.xlu1 %2117  ;;  %v4253_v51 = vld [vmem:[%s6441_s10 + $0x40] sm:$0xff]  }
 0x9ea   :  { %2268 = vst.msk [vmem:[#allocation2 + $0xa] sm:$0x8] %vm2089_vm6, %v6093_v18  ;;  %2279 = vst.msk [vmem:[#allocation2 + $0xb] sm:$0x8] %vm2089_vm6, %v2208_v7  ;;  %v4252_v7 = vld [vmem:[%s6441_s10 + $0x18] sm:$0xff]  }
 0x9eb   :  { %2260 = vst.msk [vmem:[#allocation2 + $0x6] sm:$0x40] %vm2104_vm9, %v5993_v33  ;;  %2238 = vst.msk [vmem:[#allocation2 + $0x4] sm:$0x40] %vm2104_vm9, %v2077_v32  ;;  %v2087_v5 = vpop.permute.xlu0 %2086 }
 0x9ec   :  { %2269 = vst.msk [vmem:[#allocation2 + $0x9] sm:$0x10] %vm2094_vm7, %v6077_v58  ;;  %2280 = vst.msk [vmem:[#allocation2 + $0xa] sm:$0x10] %vm2094_vm7, %v6085_v13  ;;  %v4251_v13 = vld [vmem:[%s6441_s10 + $0x10] sm:$0xff]  }
 0x9ed   :  { %2287 = vst.msk [vmem:[#allocation2 + $0xf] sm:$0x1] %vm2073_vm2, %v2285_v39  ;;  %v2122_v29 = vpop.permute.xlu1 %2121 }
 0x9ee   :  { %2270 = vst.msk [vmem:[#allocation2 + $0x8] sm:$0x20] %vm2099_vm8, %v6063_v2  ;;  %2215 = vst.msk [vmem:[#allocation2 + $0x3] sm:$0x20] %vm2099_vm8, %v2077_v32 }
 0x9ef   :  { %2288 = vst.msk [vmem:[#allocation2 + $0xe] sm:$0x2] %vm2079_vm4, %v2263_v31  ;;  %2080 = vst.msk [vmem:[#allocation2 - $0x1] sm:$0x2] %vm2079_vm4, %v2077_v32  ;;  %v2092_v62 = vpop.permute.xlu0 %2091 }
 0x9f0   :  { %2271 = vst.msk [vmem:[#allocation2 + $0x7] sm:$0x40] %vm2104_vm9, %v5995_v23  ;;  %2249 = vst.msk [vmem:[#allocation2 + $0x5] sm:$0x40] %vm2104_vm9, %v2114_v22 }
 0x9f1   :  { %2289 = vst.msk [vmem:[#allocation2 + $0xd] sm:$0x4] %vm2084_vm5, %v2241_v12  ;;  %2146 = vst.msk [vmem:[#allocation2] sm:$0x4] %vm2084_vm5, %v2077_v32  ;;  %v2126_v11 = vpop.permute.xlu1 %2125  ;;  %v4254_v12 = vld [vmem:[%s6441_s10 + $0x48] sm:$0xff]  }
 0x9f2   :  { %2261 = vst.msk [vmem:[#allocation2 + $0x5] sm:$0x80] %vm2109_vm10, %v2077_v32  ;;  %2272 = vst.msk [vmem:[#allocation2 + $0x6] sm:$0x80] %vm2109_vm10, %v2114_v22 }
 0x9f3   :  { %2169 = vst.msk [vmem:[#allocation2 + $0x1] sm:$0x8] %vm2089_vm6, %v2077_v32  ;;  %2290 = vst.msk [vmem:[#allocation2 + $0xc] sm:$0x8] %vm2089_vm6, %v2219_v27  ;;  %v2097_v63 = vpop.permute.xlu0 %2096 }
 0x9f4   :  { %2192 = vst.msk [vmem:[#allocation2 + $0x2] sm:$0x10] %vm2094_vm7, %v2077_v32  ;;  %2291 = vst.msk [vmem:[#allocation2 + $0xb] sm:$0x10] %vm2094_vm7, %v6093_v18  ;;  %v4257_v32 = vld [vmem:[%s6441_s10 + $0x60] sm:$0xff]  }
 0x9f5   :  { %2281 = vst.msk [vmem:[#allocation2 + $0x9] sm:$0x20] %vm2099_vm8, %v6069_v53  ;;  %2226 = vst.msk [vmem:[#allocation2 + $0x4] sm:$0x20] %vm2099_vm8, %v2114_v22  ;;  %v2130_v8 = vpop.permute.xlu1 %2129  ;;  %v4249_v53 = vld [vmem:[%s6441_s10] sm:$0xff]  }
 0x9f6   :  { %2282 = vst.msk [vmem:[#allocation2 + $0x8] sm:$0x40] %vm2104_vm9, %v6059_v42  ;;  %2216 = vst.msk [vmem:[#allocation2 + $0x2] sm:$0x40] %vm2104_vm9, %v2082_v48  ;;  %v4248_v42 = vld [vmem:[%s6441_s10 + $0x38] sm:$0xff]  }
 0x9f7   :  { %2116 = vst.msk [vmem:[#allocation2] sm:$0x2] %vm2079_vm4, %v2114_v22  ;;  %v2102_v14 = vpop.permute.xlu0 %2101 }
 0x9f8   :  { %2157 = vst.msk [vmem:[#allocation2 + $0x1] sm:$0x4] %vm2084_vm5, %v2114_v22  ;;  %2085 = vst.msk [vmem:[#allocation2 - $0x2] sm:$0x4] %vm2084_vm5, %v2082_v48 }
 0x9f9   :  { %2180 = vst.msk [vmem:[#allocation2 + $0x2] sm:$0x8] %vm2089_vm6, %v2114_v22  ;;  %2147 = vst.msk [vmem:[#allocation2 - $0x1] sm:$0x8] %vm2089_vm6, %v2082_v48  ;;  %v2134_v38 = vpop.permute.xlu1 %2133 }
 0x9fa   :  { %2203 = vst.msk [vmem:[#allocation2 + $0x3] sm:$0x10] %vm2094_vm7, %v2114_v22  ;;  %2170 = vst.msk [vmem:[#allocation2] sm:$0x10] %vm2094_vm7, %v2082_v48  ;;  %v4258_v22 = vld [vmem:[%s6441_s10 + $0x68] sm:$0xff]  }
 0x9fb   :  { %2283 = vst.msk [vmem:[#allocation2 + $0x7] sm:$0x80] %vm2109_vm10, %v5993_v33  ;;  %2239 = vst.msk [vmem:[#allocation2 + $0x3] sm:$0x80] %vm2109_vm10, %v2082_v48  ;;  %v2107_v52 = vpop.permute.xlu0 %2106  ;;  %v3341_v33 = vld [vmem:[%s6442_s11 + $0x20] sm:$0xff] }
 0x9fc   :  { %2292 = vst.msk [vmem:[#allocation2 + $0xa] sm:$0x20] %vm2099_vm8, %v6077_v58  ;;  %2193 = vst.msk [vmem:[#allocation2 + $0x1] sm:$0x20] %vm2099_vm8, %v2082_v48  ;;  %v4250_v58 = vld [vmem:[%s6441_s10 + $0x8] sm:$0xff]   ;;  %v4259_v48 = vld [vmem:[%s6441_s10 + $0x70] sm:$0xff]  }
 0x9fd   :  { %2293 = vst.msk [vmem:[#allocation2 + $0x9] sm:$0x40] %vm2104_vm9, %v6063_v2  ;;  %2227 = vst.msk [vmem:[#allocation2 + $0x3] sm:$0x40] %vm2104_vm9, %v2118_v16  ;;  %v2138_v21 = vpop.permute.xlu1 %2137 }
 0x9fe   :  { %2294 = vst.msk [vmem:[#allocation2 + $0x8] sm:$0x80] %vm2109_vm10, %v5995_v23  ;;  %2250 = vst.msk [vmem:[#allocation2 + $0x4] sm:$0x80] %vm2109_vm10, %v2118_v16  ;;  %v3343_v23 = vld [vmem:[%s6442_s11 + $0x30] sm:$0xff] }
 0x9ff   :  { %2120 = vst.msk [vmem:[#allocation2 - $0x1] sm:$0x4] %vm2084_vm5, %v2118_v16 }
 0xa00   :  { %2158 = vst.msk [vmem:[#allocation2] sm:$0x8] %vm2089_vm6, %v2118_v16  ;;  %2090 = vst.msk [vmem:[#allocation2 - $0x3] sm:$0x8] %vm2089_vm6, %v2087_v5 }
 0xa01   :  { %2181 = vst.msk [vmem:[#allocation2 + $0x1] sm:$0x10] %vm2094_vm7, %v2118_v16  ;;  %2148 = vst.msk [vmem:[#allocation2 - $0x2] sm:$0x10] %vm2094_vm7, %v2087_v5 }
 0xa02   :  { %2204 = vst.msk [vmem:[#allocation2 + $0x2] sm:$0x20] %vm2099_vm8, %v2118_v16  ;;  %2171 = vst.msk [vmem:[#allocation2 - $0x1] sm:$0x20] %vm2099_vm8, %v2087_v5 }
 0xa03   :  { %2217 = vst.msk [vmem:[#allocation2 + $0x1] sm:$0x80] %vm2109_vm10, %v2087_v5  ;;  %2228 = vst.msk [vmem:[#allocation2 + $0x2] sm:$0x80] %vm2109_vm10, %v2122_v29 }
 0xa04   :  { %2194 = vst.msk [vmem:[#allocation2] sm:$0x40] %vm2104_vm9, %v2087_v5  ;;  %2205 = vst.msk [vmem:[#allocation2 + $0x1] sm:$0x40] %vm2104_vm9, %v2122_v29  ;;  %v4260_v5 = vld [vmem:[%s6441_s10 + $0x78] sm:$0xff]  }
 0xa05   :  { %2124 = vst.msk [vmem:[#allocation2 - $0x2] sm:$0x8] %vm2089_vm6, %v2122_v29 }
 0xa06   :  { %2159 = vst.msk [vmem:[#allocation2 - $0x1] sm:$0x10] %vm2094_vm7, %v2122_v29  ;;  %2095 = vst.msk [vmem:[#allocation2 - $0x4] sm:$0x10] %vm2094_vm7, %v2092_v62 }
 0xa07   :  { %2182 = vst.msk [vmem:[#allocation2] sm:$0x20] %vm2099_vm8, %v2122_v29  ;;  %2149 = vst.msk [vmem:[#allocation2 - $0x3] sm:$0x20] %vm2099_vm8, %v2092_v62 }
 0xa08   :  { %2195 = vst.msk [vmem:[#allocation2 - $0x1] sm:$0x80] %vm2109_vm10, %v2092_v62  ;;  %2206 = vst.msk [vmem:[#allocation2] sm:$0x80] %vm2109_vm10, %v2126_v11 }
 0xa09   :  { %2172 = vst.msk [vmem:[#allocation2 - $0x2] sm:$0x40] %vm2104_vm9, %v2092_v62  ;;  %2183 = vst.msk [vmem:[#allocation2 - $0x1] sm:$0x40] %vm2104_vm9, %v2126_v11  ;;  %v4261_v62 = vld [vmem:[%s6441_s10 + $0x80] sm:$0xff]  }
 0xa0a   :  { %2128 = vst.msk [vmem:[#allocation2 - $0x3] sm:$0x10] %vm2094_vm7, %v2126_v11  ;;  %v2296_v37 = vld [vmem:[#allocation2 + $0x8] sm:$0xff] }
 0xa0b   :  { %2160 = vst.msk [vmem:[#allocation2 - $0x2] sm:$0x20] %vm2099_vm8, %v2126_v11  ;;  %2100 = vst.msk [vmem:[#allocation2 - $0x5] sm:$0x20] %vm2099_vm8, %v2097_v63  ;;  %v4262_v11 = vld [vmem:[%s6441_s10 + $0x88] sm:$0xff]  }
 0xa0c   :  { %2150 = vst.msk [vmem:[#allocation2 - $0x4] sm:$0x40] %vm2104_vm9, %v2097_v63  ;;  %2161 = vst.msk [vmem:[#allocation2 - $0x3] sm:$0x40] %vm2104_vm9, %v2130_v8  ;;  %v2309_v3 = vpop.permute.xlu0 %2308 }
 0xa0d   :  { %2173 = vst.msk [vmem:[#allocation2 - $0x3] sm:$0x80] %vm2109_vm10, %v2097_v63  ;;  %2184 = vst.msk [vmem:[#allocation2 - $0x2] sm:$0x80] %vm2109_vm10, %v2130_v8  ;;  %v4263_v63 = vld [vmem:[%s6441_s10 + $0x90] sm:$0xff]  }
 0xa0e   :  { %2132 = vst.msk [vmem:[#allocation2 - $0x4] sm:$0x20] %vm2099_vm8, %v2130_v8  ;;  %v2314_v9 = vpop.permute.xlu1 %2313 }
 0xa0f   :  { %2105 = vst.msk [vmem:[#allocation2 - $0x6] sm:$0x40] %vm2104_vm9, %v2102_v14  ;;  %2136 = vst.msk [vmem:[#allocation2 - $0x5] sm:$0x40] %vm2104_vm9, %v2134_v38 }
 0xa10   :  { %2151 = vst.msk [vmem:[#allocation2 - $0x5] sm:$0x80] %vm2109_vm10, %v2102_v14  ;;  %2162 = vst.msk [vmem:[#allocation2 - $0x4] sm:$0x80] %vm2109_vm10, %v2134_v38  ;;  %v2319_v30 = vpop.permute.xlu0 %2318  ;;  %v4264_v14 = vld [vmem:[%s6441_s10 + $0x98] sm:$0xff]  }
 0xa11   :  { %2110 = vst.msk [vmem:[#allocation2 - $0x7] sm:$0x80] %vm2109_vm10, %v2107_v52  ;;  %2140 = vst.msk [vmem:[#allocation2 - $0x6] sm:$0x80] %vm2109_vm10, %v2138_v21  ;;  %v4265_v52 = vld [vmem:[%s6441_s10 + $0xa0] sm:$0xff]   ;;  %v4266_v21 = vld [vmem:[%s6441_s10 + $0xa8] sm:$0xff]  }
 0xa12   :  { %v2324_v26 = vpop.permute.xlu1 %2323 }
 0xa18   :  { %v2295_v49 = vld [vmem:[#allocation2] sm:$0xff] }
 0xa19   :  { %v2301_v59 = vpack.c.bf16 %v2296_v37, %v2295_v49  ;;  %v4267_v49 = vld [vmem:[%s6441_s10 + $0xb0] sm:$0xff]  }
 0xa1b   :  { %4023 = vmatprep.subr.bf16.mxu1 %v2301_v59 }
 0xa1c   :  { %4024 = vmatpush3.bf16.msra.mxu1 %v2301_v59  ;;  %v4268_v59 = vld [vmem:[%s6441_s10 + $0xb8] sm:$0xff]  }
 0xa1f   :  { %4026 = vmatmul.mubr.msk.bf16.vlgmr.msra.gmra.mrb[92].mxu1 %vm2336_vm3, %v4244_v57 }
 0xa20   :  { %4141 = vmatprep.mubr.msk.f32.mxu1 %vm4619_vm1, %v4618_v61 }
 0xaf2   :  { %v4027_v17 = vpop.f32.mrb[92].mxu1 }
 0xaf3   :  { %v2386_v40 = vadd.f32 %v4027_v17, %v2319_v30  ;;  %v2377_v54 = vpop.f32.mrb[93].mxu1  ;;  %v4271_v30 = vld [vmem:[%s6441_s10 + $0xd0] sm:$0xff]  }
 0xaf4   :  { %v2378_v24 = vadd.f32 %v2377_v54, %v2309_v3  ;;  %v4028_v6 = vpop.f32.mrb[94].mxu1  ;;  %v4269_v3 = vld [vmem:[%s6441_s10 + $0xc0] sm:$0xff]  }
 0xaf5   :  { %v2389_v28 = vadd.f32 %v4028_v6, %v2324_v26  ;;  %v2380_v47 = vpop.f32.mrb[95].mxu1  ;;  %v2394_v60 = vmax.f32 %v2386_v40, 0.0  ;;  %v4272_v40 = vld [vmem:[%s6441_s10 + $0xd8] sm:$0xff]   ;;  %v4273_v54 = vld [vmem:[%s6441_s10 + $0xe0] sm:$0xff]   ;;  %v4274_v26 = vld [vmem:[%s6441_s10 + $0xe8] sm:$0xff]  }
 0xaf6   :  { %v2381_v25 = vadd.f32 %v2380_v47, %v2314_v9  ;;  %v2392_v50 = vmax.f32 %v2378_v24, 0.0  ;;  %v4270_v9 = vld [vmem:[%s6441_s10 + $0xc8] sm:$0xff]   ;;  %v4275_v24 = vld [vmem:[%s6441_s10 + $0xf0] sm:$0xff]   ;;  %v4276_v6 = vld [vmem:[%s6441_s10 + $0xf8] sm:$0xff]  }
 0xaf7   :  { %v2395_v44 = vmax.f32 %v2389_v28, 0.0  ;;  %v4634_v28 = vmov 0.0|0.0  }
 0xaf8   :  { %v2393_v61 = vmax.f32 %v2381_v25, 0.0  ;;  %4144 = vmatprep.subr.bf16.mxu1 %v4634_v28 }
 0xaf9   :  { %v2397_v10 = vpack.c.bf16 %v2395_v44, %v2394_v60 }
 0xafa   :  { %v2396_v46 = vpack.c.bf16 %v2393_v61, %v2392_v50 }
 0xafb   :  { %2439 = vrot.lane.b32.xlu1 %v2397_v10, %s4620_s1 }
 0xafc   :  { %2437 = vrot.lane.b32.xlu0 %v2396_v46, %s4620_s1 }
 0xaff   :  { %2648 = vrot.lane.b32.xlu1 %v2397_v10, %s4621_s5 }
 0xb00   :  { %2646 = vrot.lane.b32.xlu0 %v2396_v46, %s4621_s5 }
 0xb03   :  { %2768 = vrot.lane.b32.xlu1 %v2397_v10, %s4622_s26 }
 0xb04   :  { %2766 = vrot.lane.b32.xlu0 %v2396_v46, %s4622_s26 }
 0xb07   :  { %2888 = vrot.lane.b32.xlu1 %v2397_v10, %s4623_s27 }
 0xb08   :  { %2886 = vrot.lane.b32.xlu0 %v2396_v46, %s4623_s27 }
 0xb0b   :  { %3008 = vrot.lane.b32.xlu1 %v2397_v10, %s4624_s28 }
 0xb0c   :  { %3006 = vrot.lane.b32.xlu0 %v2396_v46, %s4624_s28 }
 0xb0f   :  { %3128 = vrot.lane.b32.xlu1 %v2397_v10, %s4625_s29 }
 0xb10   :  { %3126 = vrot.lane.b32.xlu0 %v2396_v46, %s4625_s29 }
 0xb13   :  { %3248 = vrot.lane.b32.xlu1 %v2397_v10, %s4626_s30 }
 0xb14   :  { %3246 = vrot.lane.b32.xlu0 %v2396_v46, %s4626_s30 }
 0xb17   :  { %3352 = vperm.xlu1 %4233, %v3338_v35  }
 0xb18   :  { %3347 = vperm.xlu0 %4232, %v3337_v36  }
 0xb1b   :  { %3362 = vperm.xlu1 %4233, %v3340_v45  }
 0xb1c   :  { %3357 = vperm.xlu0 %4232, %v3339_v15  }
 0xb1f   :  { %3372 = vperm.xlu1 %4233, %v3342_v41  }
 0xb20   :  { %3367 = vperm.xlu0 %4232, %v3341_v33  }
 0xb23   :  { %3382 = vperm.xlu1 %4233, %v3344_v19  }
 0xb24   :  { %3377 = vperm.xlu0 %4232, %v3343_v23  }
 0xb28   :  { %3405 = vperm.xlu0 %4232, %v3402_v4  }
 0xb6d   :  { %v2440_v43 = vpop.permute.xlu1 %2439 }
 0xb6e   :  { %v2438_v56 = vpop.permute.xlu0 %2437 }
 0xb6f   :  { %4029 = vmatprep.subr.bf16.mxu0 %v2438_v56 }
 0xb70   :  { %4030 = vmatpush3.bf16.msra.mxu0 %v2438_v56 }
 0xb71   :  { %4031 = vmatprep.subr.bf16.mxu0 %v2440_v43  ;;  %v2649_v18 = vpop.permute.xlu1 %2648 }
 0xb72   :  { %v2647_v2 = vpop.permute.xlu0 %2646 }
 0xb74   :  { %4032 = vmatpush3.bf16.msra.mxu0 %v2440_v43 }
 0xb75   :  { %4041 = vmatprep.subr.bf16.mxu0 %v2396_v46  ;;  %v2769_v31 = vpop.permute.xlu1 %2768 }
 0xb76   :  { %v2767_v27 = vpop.permute.xlu0 %2766 }
 0xb77   :  { %4034 = vmatmul.mubr.msk.bf16.vlgmr.msra.gmra.mrb[40].mxu0 %vm333_vm0, %v4246_v55 }
 0xb78   :  { %4042 = vmatpush3.bf16.msra.mxu0 %v2396_v46  ;;  %4037 = vmatprep.mubr.msk.bf16.mxu0 %vm333_vm0, %v4247_v1 }
 0xb79   :  { %4043 = vmatprep.subr.bf16.mxu0 %v2397_v10  ;;  %v2889_v16 = vpop.permute.xlu1 %2888 }
 0xb7a   :  { %v2887_v39 = vpop.permute.xlu0 %2886 }
 0xb7c   :  { %4044 = vmatpush3.bf16.msra.mxu0 %v2397_v10 }
 0xb7d   :  { %4053 = vmatprep.subr.bf16.mxu0 %v2647_v2  ;;  %v3009_v8 = vpop.permute.xlu1 %3008 }
 0xb7e   :  { %v3007_v29 = vpop.permute.xlu0 %3006 }
 0xb7f   :  { %4038 = vmatmul.mubr.msk.bf16.gmra.mrb[44].mxu0 %vm333_vm0, %v4248_v42 }
 0xb80   :  { %4045 = vmatprep.mubr.msk.bf16.mxu0 %vm333_vm0, %v4249_v53 }
 0xb81   :  { %v3129_v37 = vpop.permute.xlu1 %3128 }
 0xb82   :  { %v3127_v38 = vpop.permute.xlu0 %3126 }
 0xb85   :  { %v3249_v17 = vpop.permute.xlu1 %3248 }
 0xb86   :  { %v3247_v57 = vpop.permute.xlu0 %3246 }
 0xb87   :  { %4046 = vmatmul.mubr.msk.bf16.vlgmr.msra.gmra.mrb[40].mxu0 %vm333_vm0, %v4250_v58 }
 0xb88   :  { %4054 = vmatpush3.bf16.msra.mxu0 %v2647_v2  ;;  %4049 = vmatprep.mubr.msk.bf16.mxu0 %vm333_vm0, %v4251_v13 }
 0xb89   :  { %4055 = vmatprep.subr.bf16.mxu0 %v2649_v18 }
 0xb8c   :  { %4056 = vmatpush3.bf16.msra.mxu0 %v2649_v18 }
 0xb8d   :  { %4065 = vmatprep.subr.bf16.mxu0 %v2767_v27 }
 0xb8f   :  { %4050 = vmatmul.mubr.msk.bf16.gmra.mrb[44].mxu0 %vm333_vm0, %v4252_v7 }
 0xb90   :  { %4057 = vmatprep.mubr.msk.bf16.mxu0 %vm333_vm0, %v4253_v51 }
 0xb96   :  { %v3353_v25 = vpop.permute.xlu1 %3352 }
 0xb97   :  { %4058 = vmatmul.mubr.msk.bf16.vlgmr.msra.gmra.mrb[40].mxu0 %vm333_vm0, %v4254_v12  ;;  %v3348_v47 = vpop.permute.xlu0 %3347 }
 0xb98   :  { %4066 = vmatpush3.bf16.msra.mxu0 %v2767_v27  ;;  %4061 = vmatprep.mubr.msk.bf16.mxu0 %vm333_vm0, %v4255_v20 }
 0xb99   :  { %4067 = vmatprep.subr.bf16.mxu0 %v2769_v31 }
 0xb9a   :  { %v3363_v60 = vpop.permute.xlu1 %3362 }
 0xb9b   :  { %v3358_v0 = vpop.permute.xlu0 %3357 }
 0xb9c   :  { %4068 = vmatpush3.bf16.msra.mxu0 %v2769_v31 }
 0xb9d   :  { %4077 = vmatprep.subr.bf16.mxu0 %v2887_v39 }
 0xb9e   :  { %v3373_v15 = vpop.permute.xlu1 %3372 }
 0xb9f   :  { %4062 = vmatmul.mubr.msk.bf16.gmra.mrb[44].mxu0 %vm333_vm0, %v4256_v34  ;;  %v3368_v10 = vpop.permute.xlu0 %3367 }
 0xba0   :  { %4069 = vmatprep.mubr.msk.bf16.mxu0 %vm333_vm0, %v4257_v32  ;;  %v3401_v32 = vld [vmem:[%s6444_s12] sm:$0xff] }
 0xba2   :  { %v3383_v53 = vpop.permute.xlu1 %3382 }
 0xba3   :  { %v3378_v43 = vpop.permute.xlu0 %3377 }
 0xba7   :  { %4070 = vmatmul.mubr.msk.bf16.vlgmr.msra.gmra.mrb[40].mxu0 %vm333_vm0, %v4258_v22  ;;  %v3406_v22 = vpop.permute.xlu0 %3405 }
 0xba8   :  { %4078 = vmatpush3.bf16.msra.mxu0 %v2887_v39  ;;  %4073 = vmatprep.mubr.msk.bf16.mxu0 %vm333_vm0, %v4259_v48 }
 0xba9   :  { %4079 = vmatprep.subr.bf16.mxu0 %v2889_v16 }
 0xbac   :  { %4080 = vmatpush3.bf16.msra.mxu0 %v2889_v16 }
 0xbad   :  { %4089 = vmatprep.subr.bf16.mxu0 %v3007_v29 }
 0xbaf   :  { %4074 = vmatmul.mubr.msk.bf16.gmra.mrb[44].mxu0 %vm333_vm0, %v4260_v5 }
 0xbb0   :  { %4081 = vmatprep.mubr.msk.bf16.mxu0 %vm333_vm0, %v4261_v62 }
 0xbb7   :  { %4082 = vmatmul.mubr.msk.bf16.vlgmr.msra.gmra.mrb[40].mxu0 %vm333_vm0, %v4262_v11 }
 0xbb8   :  { %4090 = vmatpush3.bf16.msra.mxu0 %v3007_v29  ;;  %4085 = vmatprep.mubr.msk.bf16.mxu0 %vm333_vm0, %v4263_v63 }
 0xbb9   :  { %4091 = vmatprep.subr.bf16.mxu0 %v3009_v8 }
 0xbbc   :  { %4092 = vmatpush3.bf16.msra.mxu0 %v3009_v8 }
 0xbbd   :  { %4101 = vmatprep.subr.bf16.mxu0 %v3127_v38 }
 0xbbf   :  { %4086 = vmatmul.mubr.msk.bf16.gmra.mrb[44].mxu0 %vm333_vm0, %v4264_v14 }
 0xbc0   :  { %4093 = vmatprep.mubr.msk.bf16.mxu0 %vm333_vm0, %v4265_v52 }
 0xbc7   :  { %4094 = vmatmul.mubr.msk.bf16.vlgmr.msra.gmra.mrb[40].mxu0 %vm333_vm0, %v4266_v21 }
 0xbc8   :  { %4102 = vmatpush3.bf16.msra.mxu0 %v3127_v38  ;;  %4097 = vmatprep.mubr.msk.bf16.mxu0 %vm333_vm0, %v4267_v49 }
 0xbc9   :  { %4103 = vmatprep.subr.bf16.mxu0 %v3129_v37 }
 0xbcc   :  { %4104 = vmatpush3.bf16.msra.mxu0 %v3129_v37 }
 0xbcd   :  { %4113 = vmatprep.subr.bf16.mxu0 %v3247_v57 }
 0xbcf   :  { %4098 = vmatmul.mubr.msk.bf16.gmra.mrb[44].mxu0 %vm333_vm0, %v4268_v59 }
 0xbd0   :  { %4105 = vmatprep.mubr.msk.bf16.mxu0 %vm333_vm0, %v4269_v3 }
 0xbd7   :  { %4106 = vmatmul.mubr.msk.bf16.vlgmr.msra.gmra.mrb[40].mxu0 %vm333_vm0, %v4270_v9 }
 0xbd8   :  { %4114 = vmatpush3.bf16.msra.mxu0 %v3247_v57  ;;  %4109 = vmatprep.mubr.msk.bf16.mxu0 %vm333_vm0, %v4271_v30 }
 0xbd9   :  { %4115 = vmatprep.subr.bf16.mxu0 %v3249_v17 }
 0xbdc   :  { %4116 = vmatpush3.bf16.msra.mxu0 %v3249_v17 }
 0xbdf   :  { %4110 = vmatmul.mubr.msk.bf16.gmra.mrb[44].mxu0 %vm333_vm0, %v4272_v40 }
 0xbe0   :  { %4117 = vmatprep.mubr.msk.bf16.mxu0 %vm333_vm0, %v4273_v54 }
 0xbe7   :  { %4118 = vmatmul.mubr.msk.bf16.vlgmr.msra.gmra.mrb[40].mxu0 %vm333_vm0, %v4274_v26 }
 0xbe8   :  { %4121 = vmatprep.mubr.msk.bf16.mxu0 %vm333_vm0, %v4275_v24 }
 0xbef   :  { %4122 = vmatmul.mubr.msk.bf16.gmra.mrb[44].mxu0 %vm333_vm0, %v4276_v6 }
 0xcba   :  { %v4119_v44 = vpop.f32.mrb[40].mxu0 }
 0xcbb   :  { %v3387_v50 = vadd.f32 %v4119_v44, %v3358_v0  ;;  %v3298_v61 = vpop.f32.mrb[41].mxu0 }
 0xcbc   :  { %v3385_v46 = vadd.f32 %v3348_v47, %v3298_v61  ;;  %v4120_v35 = vpop.f32.mrb[42].mxu0 }
 0xcbd   :  { %v3388_v36 = vadd.f32 %v4120_v35, %v3363_v60  ;;  %v3301_v45 = vpop.f32.mrb[43].mxu0  ;;  %v3395_v33 = vmax.f32 %v3387_v50, 0.0 }
 0xcbe   :  { %v3386_v41 = vadd.f32 %v3353_v25, %v3301_v45  ;;  %v3393_v23 = vmax.f32 %v3385_v46, 0.0 }
 0xcbf   :  { %v3396_v19 = vmax.f32 %v3388_v36, 0.0 }
 0xcc0   :  { %v3394_v4 = vmax.f32 %v3386_v41, 0.0 }
 0xcc1   :  { %v4148_v56 = vpack.c.bf16 %v3396_v19, %v3395_v33 }
 0xcc2   :  { %v4145_v55 = vpack.c.bf16 %v3394_v4, %v3393_v23  ;;  %v4123_v1 = vpop.f32.mrb[44].mxu0 }
 0xcc3   :  { %v3391_v42 = vadd.f32 %v4123_v1, %v3378_v43  ;;  %v3314_v2 = vpop.f32.mrb[45].mxu0 }
 0xcc4   :  { %v3389_v58 = vadd.f32 %v3368_v10, %v3314_v2  ;;  %v4124_v13 = vpop.f32.mrb[46].mxu0  ;;  %4146 = vmatpush3.bf16.msra.mxu1 %v4145_v55 }
 0xcc5   :  { %v3392_v18 = vadd.f32 %v4124_v13, %v3383_v53  ;;  %v3317_v7 = vpop.f32.mrb[47].mxu0  ;;  %4147 = vmatprep.subr.bf16.mxu1 %v4634_v28  ;;  %v3399_v51 = vmax.f32 %v3391_v42, 0.0 }
 0xcc6   :  { %v3390_v27 = vadd.f32 %v3373_v15, %v3317_v7  ;;  %v3397_v20 = vmax.f32 %v3389_v58, 0.0 }
 0xcc7   :  { %v3400_v12 = vmax.f32 %v3392_v18, 0.0 }
 0xcc8   :  { %v3398_v31 = vmax.f32 %v3390_v27, 0.0  ;;  %4149 = vmatpush3.bf16.msra.mxu1 %v4148_v56 }
 0xcc9   :  { %v4154_v34 = vpack.c.bf16 %v3400_v12, %v3399_v51  ;;  %4150 = vmatprep.subr.bf16.mxu1 %v4634_v28 }
 0xcca   :  { %v4151_v39 = vpack.c.bf16 %v3398_v31, %v3397_v20 }
 0xccc   :  { %4152 = vmatpush3.bf16.msra.mxu1 %v4151_v39 }
 0xccd   :  { %4153 = vmatprep.subr.bf16.mxu1 %v4634_v28 }
 0xcd0   :  { %4155 = vmatpush3.bf16.msra.mxu1 %v4154_v34 }
 0xcd3   :  { %4142 = vmatmul.mubr.msk.f32.vlgmr.msra.gmra.mrb[96].mxu1 %vm3408_vm11, %v3401_v32 }
 0xda6   :  { %v3478_v48 = vpop.f32.mrb[96].mxu1 }
 0xda7   :  { %v3479_v16 = vadd.f32 %v3478_v48, %v3406_v22  ;;  %v4143_v5 = vpop.f32.mrb[97].mxu1 }
 0xda9   :  { %v3483_v29 = vsel %vm3482_vm12, %v3479_v16, -inf }
 0xdaa   :  { %v3484_v62 = vrot.slane %v3483_v29, 4 }
 0xdac   :  { %v3485_v11 = vmax.f32 %v3483_v29, %v3484_v62 }
 0xdae   :  { %v3486_v63 = vrot.slane %v3485_v11, 2 }
 0xdb0   :  { %v3487_v8 = vmax.f32 %v3485_v11, %v3486_v63 }
 0xdb2   :  { %v3488_v14 = vrot.slane %v3487_v8, 1 }
 0xdb4   :  { %v3489_v38 = vmax.f32 %v3487_v8, %v3488_v14 }
 0xdb6   :  { %v3490_v52 = vsub.f32 %v3479_v16, %v3489_v38 }
 0xdb8   :  { %v3491_v21 = vmul.f32 1.442695, %v3490_v52 }
 0xdba   :  { %4597 = vpow2.f32 %v3491_v21 }
 0xdc4   :  { %v4598_v49 = vpop.eup %4597 }
 0xdc5   :  { %v3493_v37 = vsel %vm3482_vm12, %v4598_v49, 0.0 }
 0xdc6   :  { %v3494_v59 = vrot.slane %v3493_v37, 4 }
 0xdc8   :  { %v3495_v57 = vadd.f32 %v3494_v59, %v3493_v37 }
 0xdca   :  { %v3496_v3 = vrot.slane %v3495_v57, 2 }
 0xdcc   :  { %v3497_v9 = vadd.f32 %v3496_v3, %v3495_v57 }
 0xdce   :  { %v3498_v30 = vrot.slane %v3497_v9, 1 }
 0xdd0   :  { %v3499_v17 = vadd.f32 %v3498_v30, %v3497_v9 }
 0xdd2   :  { %4599 = vrcp.f32 %v3499_v17 }
 0xddc   :  { %v4600_v40 = vpop.eup %4599 }
 0xddd   :  { %v3501_v54 = vmul.f32 %v4600_v40, %v4598_v49 }
 0xddf   :  { %3502 = vst.msk [vmem:[%s6445_s14] sm:$0xff] %vm3482_vm12, %v3501_v54 }

</bundles_post_ra>
